<compile_context>
chip_gen: v7x
topology: tpu7x:2x2x1
jax: 0.10.0
libtpu: 0.0.40
codegen_flags: <defaults>
</compile_context>

<pallas_src>
import functools

import numpy as np
import jax
import jax.numpy as jnp
from jax import lax
from jax.experimental import pallas as pl
from jax.experimental.pallas import tpu as pltpu


LANE = 128      # output channels padded to this many lanes (dense vst)
SUBLANE = 16    # bf16 sublane tile; block_m rounded to a multiple of this


def _round_up(x, m):
    return ((x + m - 1) // m) * m


# ----------------------------------------------------------------------------
# Pallas kernel: fused (im2col-patches @ weight) * scale + bias -> activation
# ----------------------------------------------------------------------------
def _fused_conv_matmul_kernel(a_ref, w_ref, s_ref, b_ref, o_ref, *, activation):
    # bf16 x bf16 -> f32 accumulation on the MXU; epilogue stays f32 (VPU/EUP).
    acc = jnp.dot(a_ref[...], w_ref[...], preferred_element_type=jnp.float32)
    y = acc * s_ref[...] + b_ref[...]
    if activation == "relu":
        y = jnp.maximum(y, 0.0)
    elif activation == "tanh":
        y = jnp.tanh(y)
    o_ref[...] = y.astype(o_ref.dtype)


def fused_conv_matmul(patches, w2d, scale, bias, activation, out_dtype):
    """patches: (M, K) bf16, w2d: (K, 128) bf16, scale/bias: (1, 128) f32.

    Returns (M, 128) out_dtype.  M is split into at most two grid steps
    (marked "parallel" so a v7x chip uses both TensorCores); each step's
    output block is a full 128-lane tile so stores are unmasked.
    """
    M, K = patches.shape
    Kw, C = w2d.shape
    assert Kw == K and C == LANE

    nblk = 2 if M >= 128 else 1
    bm = _round_up(-(-M // nblk), SUBLANE)   # ceil(M / nblk) rounded up to 16
    Mp = bm * nblk
    if Mp != M:
        patches = jnp.pad(patches, ((0, Mp - M), (0, 0)))

    out = pl.pallas_call(
        functools.partial(_fused_conv_matmul_kernel, activation=activation),
        out_shape=jax.ShapeDtypeStruct((Mp, LANE), out_dtype),
        grid_spec=pltpu.PrefetchScalarGridSpec(
            num_scalar_prefetch=0,
            grid=(nblk,),
            in_specs=[
                pl.BlockSpec((bm, K), lambda i: (i, 0)),
                pl.BlockSpec((K, LANE), lambda i: (0, 0)),
                pl.BlockSpec((1, LANE), lambda i: (0, 0)),
                pl.BlockSpec((1, LANE), lambda i: (0, 0)),
            ],
            out_specs=pl.BlockSpec((bm, LANE), lambda i: (i, 0)),
        ),
        compiler_params=pltpu.CompilerParams(
            dimension_semantics=("parallel",),
            vmem_limit_bytes=32 * 1024 * 1024),
    )(patches, w2d, scale, bias)
    return out[:M]


# ----------------------------------------------------------------------------
# Glue: padding + im2col patch extraction (plain JAX, fused under jit)
# ----------------------------------------------------------------------------
def im2col(x, kh, kw, stride):
    """x: (N, H, W, C) already padded -> (N*Ho*Wo, kh*kw*C)."""
    N, H, W, C = x.shape
    Ho = (H - kh) // stride + 1
    Wo = (W - kw) // stride + 1
    cols = []
    for i in range(kh):
        for j in range(kw):
            cols.append(x[:, i:i + stride * (Ho - 1) + 1:stride,
                          j:j + stride * (Wo - 1) + 1:stride, :])
    p = jnp.stack(cols, axis=3)  # (N, Ho, Wo, kh*kw, C)
    return p.reshape(N * Ho * Wo, kh * kw * C), (N, Ho, Wo)


def conv_bn_act(x, layer, out_dtype):
    pad = layer["pad"]
    if pad > 0:
        x = jnp.pad(x, ((0, 0), (pad, pad), (pad, pad), (0, 0)),
                    mode=layer["pad_mode"])
    k = layer["kernel"]
    patches, (N, Ho, Wo) = im2col(x, k, k, layer["stride"])
    out = fused_conv_matmul(patches, layer["w2d"], layer["scale_p"],
                            layer["bias_p"], layer["activation"], out_dtype)
    cout = layer["cout"]
    return out[:, :cout].reshape(N, Ho, Wo, cout)


def comp_generator_forward(x, layers):
    # Inter-layer activations live in bf16 (halves the mem-bound glue traffic,
    # matmul operands are bf16 anyway); the final layer outputs f32.
    x = x.astype(jnp.bfloat16)
    for li, layer in enumerate(layers):
        last = li == len(layers) - 1
        x = conv_bn_act(x, layer, jnp.float32 if last else jnp.bfloat16)
    return x


# ----------------------------------------------------------------------------
# Deterministic parameter construction (mirrors CompGenerator.__init__ shapes)
# ----------------------------------------------------------------------------
def make_params(key, input_nc, output_nc, ngf=8, n_downsampling=3, eps=1e-5):
    def conv_init(k, kh, kw, cin, cout):
        k1, k2 = jax.random.split(k)
        bound = 1.0 / np.sqrt(cin * kh * kw)
        w = jax.random.uniform(k1, (kh, kw, cin, cout), jnp.float32, -bound, bound)
        b = jax.random.uniform(k2, (cout,), jnp.float32, -bound, bound)
        return w, b

    def bn_init(k, c):
        k1, k2, k3, k4 = jax.random.split(k, 4)
        gamma = 1.0 + 0.1 * jax.random.normal(k1, (c,), jnp.float32)
        beta = 0.1 * jax.random.normal(k2, (c,), jnp.float32)
        mean = 0.1 * jax.random.normal(k3, (c,), jnp.float32)
        var = 1.0 + 0.1 * jax.random.uniform(k4, (c,), jnp.float32)
        return gamma, beta, mean, var

    def finish(layer):
        # Precompute kernel-side tensors once: (K, 128) bf16 weights and
        # (1, 128) f32 scale/bias, padded on the Cout axis (lane-dense store).
        kh, kw, cin, cout = layer["w"].shape
        w2d = layer["w"].reshape(kh * kw * cin, cout)
        layer["w2d"] = jnp.pad(w2d, ((0, 0), (0, LANE - cout))).astype(jnp.bfloat16)
        layer["scale_p"] = jnp.pad(layer["scale"], (0, LANE - cout),
                                   constant_values=1.0)[None, :].astype(jnp.float32)
        layer["bias_p"] = jnp.pad(layer["bias"],
                                  (0, LANE - cout))[None, :].astype(jnp.float32)
        layer["cout"] = cout
        return layer

    layers = []
    keys = jax.random.split(key, n_downsampling + 2)

    # Layer 0: ReflectionPad(3) + Conv7x7(input_nc -> ngf) + BN + ReLU
    w, b = conv_init(keys[0], 7, 7, input_nc, ngf)
    g, be, mu, va = bn_init(jax.random.fold_in(keys[0], 1), ngf)
    scale = g / jnp.sqrt(va + eps)
    layers.append(finish(dict(w=w, scale=scale, bias=be + (b - mu) * scale,
                              kernel=7, stride=1, pad=3, pad_mode="reflect",
                              activation="relu")))

    # Downsampling: Conv3x3 stride 2 pad 1 + BN + ReLU
    for i in range(n_downsampling):
        mult = 2 ** i
        cin, cout = ngf * mult, ngf * mult * 2
        w, b = conv_init(keys[i + 1], 3, 3, cin, cout)
        g, be, mu, va = bn_init(jax.random.fold_in(keys[i + 1], 1), cout)
        scale = g / jnp.sqrt(va + eps)
        layers.append(finish(dict(w=w, scale=scale, bias=be + (b - mu) * scale,
                                  kernel=3, stride=2, pad=1, pad_mode="constant",
                                  activation="relu")))

    # Final: ReflectionPad(3) + Conv7x7(ngf*2^n -> output_nc) + Tanh (no BN)
    cin = ngf * 2 ** n_downsampling
    w, b = conv_init(keys[-1], 7, 7, cin, output_nc)
    layers.append(finish(dict(w=w, scale=jnp.ones((output_nc,), jnp.float32),
                              bias=b, kernel=7, stride=1, pad=3,
                              pad_mode="reflect", activation="tanh")))
    return layers


# ----------------------------------------------------------------------------
# Pure-JAX reference (lax.conv, f32 HIGHEST) for correctness check
# ----------------------------------------------------------------------------
def reference_forward(x, layers):
    for layer in layers:
        pad = layer["pad"]
        if pad > 0:
            x = jnp.pad(x, ((0, 0), (pad, pad), (pad, pad), (0, 0)),
                        mode=layer["pad_mode"])
        y = lax.conv_general_dilated(
            x, layer["w"],
            window_strides=(layer["stride"], layer["stride"]),
            padding="VALID",
            dimension_numbers=("NHWC", "HWIO", "NHWC"),
            precision=lax.Precision.HIGHEST)
        y = y * layer["scale"][None, None, None, :] + layer["bias"][None, None, None, :]
        if layer["activation"] == "relu":
            y = jnp.maximum(y, 0.0)
        elif layer["activation"] == "tanh":
            y = jnp.tanh(y)
        x = y
    return x


if __name__ == "__main__":
    key = jax.random.PRNGKey(0)
    k_x, k_p = jax.random.split(key)

    # Small shapes consistent with the module (n_downsampling=3 requires
    # spatial >= 32 so the final ReflectionPad2d(3) stays valid).
    input_nc, output_nc, ngf, n_down = 3, 3, 8, 3
    N, H, W = 2, 32, 32

    x_nchw = jax.random.normal(k_x, (N, input_nc, H, W), jnp.float32)
    x = jnp.transpose(x_nchw, (0, 2, 3, 1))  # NCHW -> NHWC

    layers = make_params(k_p, input_nc, output_nc, ngf, n_down)

    fwd = jax.jit(lambda xx: comp_generator_forward(xx, layers))
    out = jax.block_until_ready(fwd(x))

    # Expected output spatial: 32 /2/2/2 = 4 ; channels = output_nc
    assert out.shape == (N, H // (2 ** n_down), W // (2 ** n_down), output_nc), out.shape

    ref = jax.block_until_ready(reference_forward(x, layers))
    # bf16 matmul inputs / bf16 inter-layer activations vs. f32 HIGHEST
    # reference; observed error is comfortably inside this tolerance.
    np.testing.assert_allclose(np.asarray(out), np.asarray(ref),
                               rtol=2e-2, atol=2e-2)
    print("KERNEL_OK")
</pallas_src>

<mosaic_0001>
module attributes {stable_mosaic.version = 11 : i64} {
  func.func @_fused_conv_matmul_kernel(%arg0: i32, %arg1: memref<1024x147xbf16, #tpu.memory_space<vmem>>, %arg2: memref<147x128xbf16, #tpu.memory_space<vmem>>, %arg3: memref<1x128xf32, #tpu.memory_space<vmem>>, %arg4: memref<1x128xf32, #tpu.memory_space<vmem>>, %arg5: memref<1024x128xbf16, #tpu.memory_space<vmem>>) attributes {dimension_semantics = [#tpu.dimension_semantics<parallel>], iteration_bounds = array<i64: 2>, scalar_prefetch = 0 : i64, scratch_operands = 0 : i64, tpu.core_type = #tpu.core_type<tc>, window_params = [{transform_indices = @transform_0, window_bounds = array<i64: 1024, 147>}, {pipeline_mode = #tpu.pipeline_mode<synchronous>, transform_indices = @transform_1, window_bounds = array<i64: 147, 128>}, {pipeline_mode = #tpu.pipeline_mode<synchronous>, transform_indices = @transform_2, window_bounds = array<i64: 1, 128>}, {pipeline_mode = #tpu.pipeline_mode<synchronous>, transform_indices = @transform_3, window_bounds = array<i64: 1, 128>}, {transform_indices = @transform_4, window_bounds = array<i64: 1024, 128>}]} {
    %c0 = arith.constant 0 : index
    %c0_0 = arith.constant 0 : index
    %0 = vector.load %arg1[%c0, %c0_0] : memref<1024x147xbf16, #tpu.memory_space<vmem>>, vector<1024x147xbf16>
    %c0_1 = arith.constant 0 : index
    %c0_2 = arith.constant 0 : index
    %1 = vector.load %arg2[%c0_1, %c0_2] : memref<147x128xbf16, #tpu.memory_space<vmem>>, vector<147x128xbf16>
    %cst = arith.constant dense<0.000000e+00> : vector<1024x128xf32>
    %2 = tpu.matmul %0, %1, %cst {dimension_numbers = #tpu.dot_dimension_numbers<[1], [0], [0], [1], [0, 0, 1, 1], [], []>} : vector<1024x147xbf16>, vector<147x128xbf16>, vector<1024x128xf32> -> vector<1024x128xf32>
    %c0_3 = arith.constant 0 : index
    %c0_4 = arith.constant 0 : index
    %3 = vector.load %arg3[%c0_3, %c0_4] : memref<1x128xf32, #tpu.memory_space<vmem>>, vector<1x128xf32>
    %4 = vector.broadcast %3 : vector<1x128xf32> to vector<1024x128xf32>
    %5 = arith.mulf %2, %4 : vector<1024x128xf32>
    %c0_5 = arith.constant 0 : index
    %c0_6 = arith.constant 0 : index
    %6 = vector.load %arg4[%c0_5, %c0_6] : memref<1x128xf32, #tpu.memory_space<vmem>>, vector<1x128xf32>
    %7 = vector.broadcast %6 : vector<1x128xf32> to vector<1024x128xf32>
    %8 = arith.addf %5, %7 : vector<1024x128xf32>
    %cst_7 = arith.constant 0.000000e+00 : f32
    %9 = vector.broadcast %cst_7 : f32 to vector<1024x128xf32>
    %10 = arith.maximumf %8, %9 : vector<1024x128xf32>
    %11 = arith.truncf %10 : vector<1024x128xf32> to vector<1024x128xbf16>
    %c0_8 = arith.constant 0 : index
    %c0_9 = arith.constant 0 : index
    %12 = vector.load %arg5[%c0_8, %c0_9] : memref<1024x128xbf16, #tpu.memory_space<vmem>>, vector<1024x128xbf16>
    tpu.vector_store %arg5[%c0_8, %c0_9], %11 {strides = array<i32>} : memref<1024x128xbf16, #tpu.memory_space<vmem>>, vector<1024x128xbf16>,
    return
  }
  func.func @transform_0(%arg0: i32) -> (i32, i32) {
    %c0_i32 = arith.constant 0 : i32
    %c0_i32_0 = arith.constant 0 : i32
    return %arg0, %c0_i32 : i32, i32
  }
  func.func @transform_1(%arg0: i32) -> (i32, i32) {
    %c0_i32 = arith.constant 0 : i32
    %c0_i32_0 = arith.constant 0 : i32
    %c0_i32_1 = arith.constant 0 : i32
    return %c0_i32, %c0_i32_0 : i32, i32
  }
  func.func @transform_2(%arg0: i32) -> (i32, i32) {
    %c0_i32 = arith.constant 0 : i32
    %c0_i32_0 = arith.constant 0 : i32
    %c0_i32_1 = arith.constant 0 : i32
    return %c0_i32, %c0_i32_0 : i32, i32
  }
  func.func @transform_3(%arg0: i32) -> (i32, i32) {
    %c0_i32 = arith.constant 0 : i32
    %c0_i32_0 = arith.constant 0 : i32
    %c0_i32_1 = arith.constant 0 : i32
    return %c0_i32, %c0_i32_0 : i32, i32
  }
  func.func @transform_4(%arg0: i32) -> (i32, i32) {
    %c0_i32 = arith.constant 0 : i32
    %c0_i32_0 = arith.constant 0 : i32
    return %arg0, %c0_i32 : i32, i32
  }
}

module attributes {stable_mosaic.version = 11 : i64} {
  func.func @_fused_conv_matmul_kernel(%arg0: i32, %arg1: memref<256x72xbf16, #tpu.memory_space<vmem>>, %arg2: memref<72x128xbf16, #tpu.memory_space<vmem>>, %arg3: memref<1x128xf32, #tpu.memory_space<vmem>>, %arg4: memref<1x128xf32, #tpu.memory_space<vmem>>, %arg5: memref<256x128xbf16, #tpu.memory_space<vmem>>) attributes {dimension_semantics = [#tpu.dimension_semantics<parallel>], iteration_bounds = array<i64: 2>, scalar_prefetch = 0 : i64, scratch_operands = 0 : i64, tpu.core_type = #tpu.core_type<tc>, window_params = [{transform_indices = @transform_0, window_bounds = array<i64: 256, 72>}, {pipeline_mode = #tpu.pipeline_mode<synchronous>, transform_indices = @transform_1, window_bounds = array<i64: 72, 128>}, {pipeline_mode = #tpu.pipeline_mode<synchronous>, transform_indices = @transform_2, window_bounds = array<i64: 1, 128>}, {pipeline_mode = #tpu.pipeline_mode<synchronous>, transform_indices = @transform_3, window_bounds = array<i64: 1, 128>}, {transform_indices = @transform_4, window_bounds = array<i64: 256, 128>}]} {
    %c0 = arith.constant 0 : index
    %c0_0 = arith.constant 0 : index
    %0 = vector.load %arg1[%c0, %c0_0] : memref<256x72xbf16, #tpu.memory_space<vmem>>, vector<256x72xbf16>
    %c0_1 = arith.constant 0 : index
    %c0_2 = arith.constant 0 : index
    %1 = vector.load %arg2[%c0_1, %c0_2] : memref<72x128xbf16, #tpu.memory_space<vmem>>, vector<72x128xbf16>
    %cst = arith.constant dense<0.000000e+00> : vector<256x128xf32>
    %2 = tpu.matmul %0, %1, %cst {dimension_numbers = #tpu.dot_dimension_numbers<[1], [0], [0], [1], [0, 0, 1, 1], [], []>} : vector<256x72xbf16>, vector<72x128xbf16>, vector<256x128xf32> -> vector<256x128xf32>
    %c0_3 = arith.constant 0 : index
    %c0_4 = arith.constant 0 : index
    %3 = vector.load %arg3[%c0_3, %c0_4] : memref<1x128xf32, #tpu.memory_space<vmem>>, vector<1x128xf32>
    %4 = vector.broadcast %3 : vector<1x128xf32> to vector<256x128xf32>
    %5 = arith.mulf %2, %4 : vector<256x128xf32>
    %c0_5 = arith.constant 0 : index
    %c0_6 = arith.constant 0 : index
    %6 = vector.load %arg4[%c0_5, %c0_6] : memref<1x128xf32, #tpu.memory_space<vmem>>, vector<1x128xf32>
    %7 = vector.broadcast %6 : vector<1x128xf32> to vector<256x128xf32>
    %8 = arith.addf %5, %7 : vector<256x128xf32>
    %cst_7 = arith.constant 0.000000e+00 : f32
    %9 = vector.broadcast %cst_7 : f32 to vector<256x128xf32>
    %10 = arith.maximumf %8, %9 : vector<256x128xf32>
    %11 = arith.truncf %10 : vector<256x128xf32> to vector<256x128xbf16>
    %c0_8 = arith.constant 0 : index
    %c0_9 = arith.constant 0 : index
    %12 = vector.load %arg5[%c0_8, %c0_9] : memref<256x128xbf16, #tpu.memory_space<vmem>>, vector<256x128xbf16>
    tpu.vector_store %arg5[%c0_8, %c0_9], %11 {strides = array<i32>} : memref<256x128xbf16, #tpu.memory_space<vmem>>, vector<256x128xbf16>,
    return
  }
  func.func @transform_0(%arg0: i32) -> (i32, i32) {
    %c0_i32 = arith.constant 0 : i32
    %c0_i32_0 = arith.constant 0 : i32
    return %arg0, %c0_i32 : i32, i32
  }
  func.func @transform_1(%arg0: i32) -> (i32, i32) {
    %c0_i32 = arith.constant 0 : i32
    %c0_i32_0 = arith.constant 0 : i32
    %c0_i32_1 = arith.constant 0 : i32
    return %c0_i32, %c0_i32_0 : i32, i32
  }
  func.func @transform_2(%arg0: i32) -> (i32, i32) {
    %c0_i32 = arith.constant 0 : i32
    %c0_i32_0 = arith.constant 0 : i32
    %c0_i32_1 = arith.constant 0 : i32
    return %c0_i32, %c0_i32_0 : i32, i32
  }
  func.func @transform_3(%arg0: i32) -> (i32, i32) {
    %c0_i32 = arith.constant 0 : i32
    %c0_i32_0 = arith.constant 0 : i32
    %c0_i32_1 = arith.constant 0 : i32
    return %c0_i32, %c0_i32_0 : i32, i32
  }
  func.func @transform_4(%arg0: i32) -> (i32, i32) {
    %c0_i32 = arith.constant 0 : i32
    %c0_i32_0 = arith.constant 0 : i32
    return %arg0, %c0_i32 : i32, i32
  }
}

module attributes {stable_mosaic.version = 11 : i64} {
  func.func @_fused_conv_matmul_kernel(%arg0: i32, %arg1: memref<64x144xbf16, #tpu.memory_space<vmem>>, %arg2: memref<144x128xbf16, #tpu.memory_space<vmem>>, %arg3: memref<1x128xf32, #tpu.memory_space<vmem>>, %arg4: memref<1x128xf32, #tpu.memory_space<vmem>>, %arg5: memref<64x128xbf16, #tpu.memory_space<vmem>>) attributes {dimension_semantics = [#tpu.dimension_semantics<parallel>], iteration_bounds = array<i64: 2>, scalar_prefetch = 0 : i64, scratch_operands = 0 : i64, tpu.core_type = #tpu.core_type<tc>, window_params = [{transform_indices = @transform_0, window_bounds = array<i64: 64, 144>}, {pipeline_mode = #tpu.pipeline_mode<synchronous>, transform_indices = @transform_1, window_bounds = array<i64: 144, 128>}, {pipeline_mode = #tpu.pipeline_mode<synchronous>, transform_indices = @transform_2, window_bounds = array<i64: 1, 128>}, {pipeline_mode = #tpu.pipeline_mode<synchronous>, transform_indices = @transform_3, window_bounds = array<i64: 1, 128>}, {transform_indices = @transform_4, window_bounds = array<i64: 64, 128>}]} {
    %c0 = arith.constant 0 : index
    %c0_0 = arith.constant 0 : index
    %0 = vector.load %arg1[%c0, %c0_0] : memref<64x144xbf16, #tpu.memory_space<vmem>>, vector<64x144xbf16>
    %c0_1 = arith.constant 0 : index
    %c0_2 = arith.constant 0 : index
    %1 = vector.load %arg2[%c0_1, %c0_2] : memref<144x128xbf16, #tpu.memory_space<vmem>>, vector<144x128xbf16>
    %cst = arith.constant dense<0.000000e+00> : vector<64x128xf32>
    %2 = tpu.matmul %0, %1, %cst {dimension_numbers = #tpu.dot_dimension_numbers<[1], [0], [0], [1], [0, 0, 1, 1], [], []>} : vector<64x144xbf16>, vector<144x128xbf16>, vector<64x128xf32> -> vector<64x128xf32>
    %c0_3 = arith.constant 0 : index
    %c0_4 = arith.constant 0 : index
    %3 = vector.load %arg3[%c0_3, %c0_4] : memref<1x128xf32, #tpu.memory_space<vmem>>, vector<1x128xf32>
    %4 = vector.broadcast %3 : vector<1x128xf32> to vector<64x128xf32>
    %5 = arith.mulf %2, %4 : vector<64x128xf32>
    %c0_5 = arith.constant 0 : index
    %c0_6 = arith.constant 0 : index
    %6 = vector.load %arg4[%c0_5, %c0_6] : memref<1x128xf32, #tpu.memory_space<vmem>>, vector<1x128xf32>
    %7 = vector.broadcast %6 : vector<1x128xf32> to vector<64x128xf32>
    %8 = arith.addf %5, %7 : vector<64x128xf32>
    %cst_7 = arith.constant 0.000000e+00 : f32
    %9 = vector.broadcast %cst_7 : f32 to vector<64x128xf32>
    %10 = arith.maximumf %8, %9 : vector<64x128xf32>
    %11 = arith.truncf %10 : vector<64x128xf32> to vector<64x128xbf16>
    %c0_8 = arith.constant 0 : index
    %c0_9 = arith.constant 0 : index
    %12 = vector.load %arg5[%c0_8, %c0_9] : memref<64x128xbf16, #tpu.memory_space<vmem>>, vector<64x128xbf16>
    tpu.vector_store %arg5[%c0_8, %c0_9], %11 {strides = array<i32>} : memref<64x128xbf16, #tpu.memory_space<vmem>>, vector<64x128xbf16>,
    return
  }
  func.func @transform_0(%arg0: i32) -> (i32, i32) {
    %c0_i32 = arith.constant 0 : i32
    %c0_i32_0 = arith.constant 0 : i32
    return %arg0, %c0_i32 : i32, i32
  }
  func.func @transform_1(%arg0: i32) -> (i32, i32) {
    %c0_i32 = arith.constant 0 : i32
    %c0_i32_0 = arith.constant 0 : i32
    %c0_i32_1 = arith.constant 0 : i32
    return %c0_i32, %c0_i32_0 : i32, i32
  }
  func.func @transform_2(%arg0: i32) -> (i32, i32) {
    %c0_i32 = arith.constant 0 : i32
    %c0_i32_0 = arith.constant 0 : i32
    %c0_i32_1 = arith.constant 0 : i32
    return %c0_i32, %c0_i32_0 : i32, i32
  }
  func.func @transform_3(%arg0: i32) -> (i32, i32) {
    %c0_i32 = arith.constant 0 : i32
    %c0_i32_0 = arith.constant 0 : i32
    %c0_i32_1 = arith.constant 0 : i32
    return %c0_i32, %c0_i32_0 : i32, i32
  }
  func.func @transform_4(%arg0: i32) -> (i32, i32) {
    %c0_i32 = arith.constant 0 : i32
    %c0_i32_0 = arith.constant 0 : i32
    return %arg0, %c0_i32 : i32, i32
  }
}

module attributes {stable_mosaic.version = 11 : i64} {
  func.func @_fused_conv_matmul_kernel(%arg0: i32, %arg1: memref<32x288xbf16, #tpu.memory_space<vmem>>, %arg2: memref<288x128xbf16, #tpu.memory_space<vmem>>, %arg3: memref<1x128xf32, #tpu.memory_space<vmem>>, %arg4: memref<1x128xf32, #tpu.memory_space<vmem>>, %arg5: memref<32x128xbf16, #tpu.memory_space<vmem>>) attributes {dimension_semantics = [#tpu.dimension_semantics<parallel>], iteration_bounds = array<i64: 1>, scalar_prefetch = 0 : i64, scratch_operands = 0 : i64, tpu.core_type = #tpu.core_type<tc>, window_params = [{transform_indices = @transform_0, window_bounds = array<i64: 32, 288>}, {pipeline_mode = #tpu.pipeline_mode<synchronous>, transform_indices = @transform_1, window_bounds = array<i64: 288, 128>}, {pipeline_mode = #tpu.pipeline_mode<synchronous>, transform_indices = @transform_2, window_bounds = array<i64: 1, 128>}, {pipeline_mode = #tpu.pipeline_mode<synchronous>, transform_indices = @transform_3, window_bounds = array<i64: 1, 128>}, {transform_indices = @transform_4, window_bounds = array<i64: 32, 128>}]} {
    %c0 = arith.constant 0 : index
    %c0_0 = arith.constant 0 : index
    %0 = vector.load %arg1[%c0, %c0_0] : memref<32x288xbf16, #tpu.memory_space<vmem>>, vector<32x288xbf16>
    %c0_1 = arith.constant 0 : index
    %c0_2 = arith.constant 0 : index
    %1 = vector.load %arg2[%c0_1, %c0_2] : memref<288x128xbf16, #tpu.memory_space<vmem>>, vector<288x128xbf16>
    %cst = arith.constant dense<0.000000e+00> : vector<32x128xf32>
    %2 = tpu.matmul %0, %1, %cst {dimension_numbers = #tpu.dot_dimension_numbers<[1], [0], [0], [1], [0, 0, 1, 1], [], []>} : vector<32x288xbf16>, vector<288x128xbf16>, vector<32x128xf32> -> vector<32x128xf32>
    %c0_3 = arith.constant 0 : index
    %c0_4 = arith.constant 0 : index
    %3 = vector.load %arg3[%c0_3, %c0_4] : memref<1x128xf32, #tpu.memory_space<vmem>>, vector<1x128xf32>
    %4 = vector.broadcast %3 : vector<1x128xf32> to vector<32x128xf32>
    %5 = arith.mulf %2, %4 : vector<32x128xf32>
    %c0_5 = arith.constant 0 : index
    %c0_6 = arith.constant 0 : index
    %6 = vector.load %arg4[%c0_5, %c0_6] : memref<1x128xf32, #tpu.memory_space<vmem>>, vector<1x128xf32>
    %7 = vector.broadcast %6 : vector<1x128xf32> to vector<32x128xf32>
    %8 = arith.addf %5, %7 : vector<32x128xf32>
    %cst_7 = arith.constant 0.000000e+00 : f32
    %9 = vector.broadcast %cst_7 : f32 to vector<32x128xf32>
    %10 = arith.maximumf %8, %9 : vector<32x128xf32>
    %11 = arith.truncf %10 : vector<32x128xf32> to vector<32x128xbf16>
    %c0_8 = arith.constant 0 : index
    %c0_9 = arith.constant 0 : index
    %12 = vector.load %arg5[%c0_8, %c0_9] : memref<32x128xbf16, #tpu.memory_space<vmem>>, vector<32x128xbf16>
    tpu.vector_store %arg5[%c0_8, %c0_9], %11 {strides = array<i32>} : memref<32x128xbf16, #tpu.memory_space<vmem>>, vector<32x128xbf16>,
    return
  }
  func.func @transform_0(%arg0: i32) -> (i32, i32) {
    %c0_i32 = arith.constant 0 : i32
    %c0_i32_0 = arith.constant 0 : i32
    return %arg0, %c0_i32 : i32, i32
  }
  func.func @transform_1(%arg0: i32) -> (i32, i32) {
    %c0_i32 = arith.constant 0 : i32
    %c0_i32_0 = arith.constant 0 : i32
    %c0_i32_1 = arith.constant 0 : i32
    return %c0_i32, %c0_i32_0 : i32, i32
  }
  func.func @transform_2(%arg0: i32) -> (i32, i32) {
    %c0_i32 = arith.constant 0 : i32
    %c0_i32_0 = arith.constant 0 : i32
    %c0_i32_1 = arith.constant 0 : i32
    return %c0_i32, %c0_i32_0 : i32, i32
  }
  func.func @transform_3(%arg0: i32) -> (i32, i32) {
    %c0_i32 = arith.constant 0 : i32
    %c0_i32_0 = arith.constant 0 : i32
    %c0_i32_1 = arith.constant 0 : i32
    return %c0_i32, %c0_i32_0 : i32, i32
  }
  func.func @transform_4(%arg0: i32) -> (i32, i32) {
    %c0_i32 = arith.constant 0 : i32
    %c0_i32_0 = arith.constant 0 : i32
    return %arg0, %c0_i32 : i32, i32
  }
}

module attributes {stable_mosaic.version = 11 : i64} {
  func.func @_fused_conv_matmul_kernel(%arg0: i32, %arg1: memref<32x3136xbf16, #tpu.memory_space<vmem>>, %arg2: memref<3136x128xbf16, #tpu.memory_space<vmem>>, %arg3: memref<1x128xf32, #tpu.memory_space<vmem>>, %arg4: memref<1x128xf32, #tpu.memory_space<vmem>>, %arg5: memref<32x128xf32, #tpu.memory_space<vmem>>) attributes {dimension_semantics = [#tpu.dimension_semantics<parallel>], iteration_bounds = array<i64: 1>, scalar_prefetch = 0 : i64, scratch_operands = 0 : i64, tpu.core_type = #tpu.core_type<tc>, window_params = [{transform_indices = @transform_0, window_bounds = array<i64: 32, 3136>}, {pipeline_mode = #tpu.pipeline_mode<synchronous>, transform_indices = @transform_1, window_bounds = array<i64: 3136, 128>}, {pipeline_mode = #tpu.pipeline_mode<synchronous>, transform_indices = @transform_2, window_bounds = array<i64: 1, 128>}, {pipeline_mode = #tpu.pipeline_mode<synchronous>, transform_indices = @transform_3, window_bounds = array<i64: 1, 128>}, {transform_indices = @transform_4, window_bounds = array<i64: 32, 128>}]} {
    %c0 = arith.constant 0 : index
    %c0_0 = arith.constant 0 : index
    %0 = vector.load %arg1[%c0, %c0_0] : memref<32x3136xbf16, #tpu.memory_space<vmem>>, vector<32x3136xbf16>
    %c0_1 = arith.constant 0 : index
    %c0_2 = arith.constant 0 : index
    %1 = vector.load %arg2[%c0_1, %c0_2] : memref<3136x128xbf16, #tpu.memory_space<vmem>>, vector<3136x128xbf16>
    %cst = arith.constant dense<0.000000e+00> : vector<32x128xf32>
    %2 = tpu.matmul %0, %1, %cst {dimension_numbers = #tpu.dot_dimension_numbers<[1], [0], [0], [1], [0, 0, 1, 1], [], []>} : vector<32x3136xbf16>, vector<3136x128xbf16>, vector<32x128xf32> -> vector<32x128xf32>
    %c0_3 = arith.constant 0 : index
    %c0_4 = arith.constant 0 : index
    %3 = vector.load %arg3[%c0_3, %c0_4] : memref<1x128xf32, #tpu.memory_space<vmem>>, vector<1x128xf32>
    %4 = vector.broadcast %3 : vector<1x128xf32> to vector<32x128xf32>
    %5 = arith.mulf %2, %4 : vector<32x128xf32>
    %c0_5 = arith.constant 0 : index
    %c0_6 = arith.constant 0 : index
    %6 = vector.load %arg4[%c0_5, %c0_6] : memref<1x128xf32, #tpu.memory_space<vmem>>, vector<1x128xf32>
    %7 = vector.broadcast %6 : vector<1x128xf32> to vector<32x128xf32>
    %8 = arith.addf %5, %7 : vector<32x128xf32>
    %9 = math.tanh %8 : vector<32x128xf32>
    %c0_7 = arith.constant 0 : index
    %c0_8 = arith.constant 0 : index
    %10 = vector.load %arg5[%c0_7, %c0_8] : memref<32x128xf32, #tpu.memory_space<vmem>>, vector<32x128xf32>
    tpu.vector_store %arg5[%c0_7, %c0_8], %9 {strides = array<i32>} : memref<32x128xf32, #tpu.memory_space<vmem>>, vector<32x128xf32>,
    return
  }
  func.func @transform_0(%arg0: i32) -> (i32, i32) {
    %c0_i32 = arith.constant 0 : i32
    %c0_i32_0 = arith.constant 0 : i32
    return %arg0, %c0_i32 : i32, i32
  }
  func.func @transform_1(%arg0: i32) -> (i32, i32) {
    %c0_i32 = arith.constant 0 : i32
    %c0_i32_0 = arith.constant 0 : i32
    %c0_i32_1 = arith.constant 0 : i32
    return %c0_i32, %c0_i32_0 : i32, i32
  }
  func.func @transform_2(%arg0: i32) -> (i32, i32) {
    %c0_i32 = arith.constant 0 : i32
    %c0_i32_0 = arith.constant 0 : i32
    %c0_i32_1 = arith.constant 0 : i32
    return %c0_i32, %c0_i32_0 : i32, i32
  }
  func.func @transform_3(%arg0: i32) -> (i32, i32) {
    %c0_i32 = arith.constant 0 : i32
    %c0_i32_0 = arith.constant 0 : i32
    %c0_i32_1 = arith.constant 0 : i32
    return %c0_i32, %c0_i32_0 : i32, i32
  }
  func.func @transform_4(%arg0: i32) -> (i32, i32) {
    %c0_i32 = arith.constant 0 : i32
    %c0_i32_0 = arith.constant 0 : i32
    return %arg0, %c0_i32 : i32, i32
  }
}

</mosaic_0001>

<bundles_post_ra>
// kernel: _lambda_.5
= control target key start
LH: loop header
LB: loop body
LE: loop exit
PB: predicated region body
PF: predicated region fallthrough
CT: control target
= control target key end

     0   :  { %s3949_s15 = smov 0   ;;  %s4536_s0 = inlined_call_operand.vmem [shape: bf16[2048,147], index: 0, kind: input, shape index: {}]   ;;  %s4537_s1 = inlined_call_operand.vmem [shape: bf16[147,128], index: 1, kind: input, shape index: {}]   ;;  %s4538_s2 = inlined_call_operand.vmem [shape: f32[1,128], index: 2, kind: input, shape index: {}]   ;;  %s4539_s3 = inlined_call_operand.vmem [shape: f32[1,128], index: 3, kind: input, shape index: {}]   ;;  %s4540_s4 = inlined_call_operand.vmem [shape: bf16[2048,128], index: 4, kind: output, shape index: {}]  }
   0x1 LB: > { %s2824_s16 = sadd.s32 4294967295, %s3920_s15   ;;  %p2828_p0 = scmp.ge.s32.totalorder %s3920_s15, 1  ;;  %s3920_s15 = sphi %s3949_s15, %s14_s15  }
   0x2   : > { %p164_p1 = scmp.lt.s32.totalorder %s3920_s15, 3 }
   0x4   : > { %p165_p2 = pnand %p2828_p0, %p164_p1 }
   0x5   : > { %v3710_v0 = vld [vmem:[%s4537_s1] sm:$0xff] (!%p165_p2)   ;;  %v3922_v1 = vmov (!%p165_p2), 0   ;;  %v3711_v2 = vld [vmem:[%s4537_s1 + $0x8] sm:$0xff] (!%p165_p2)   ;;  %v3712_v3 = vld [vmem:[%s4537_s1 + $0x10] sm:$0xff] (!%p165_p2)   ;;  %s2829_s23 = sshll.u32 (!%p165_p2), %s2824_s16, 7  ;;  %vm985_vm0 = vcmask (!%p165_p2), 154624  }
   0x6   : > { %168 = sbr.rel (%p165_p2) target bundleno = 518 (0x206), region = 36  ;;  %1185 = vmatprep.subr.bf16.mxu0 (!%p165_p2), %v3922_v1  ;;  %3680 = vmatprep.subr.bf16.mxu1 (!%p165_p2), %v3922_v1  ;;  %p192_p3 = scmp.lt.s32.totalorder (!%p165_p2), %s2829_s23, 255  ;;  %v3713_v4 = vld [vmem:[%s4537_s1 + $0x18] sm:$0xff] (!%p165_p2)   ;;  %v3714_v5 = vld [vmem:[%s4537_s1 + $0x20] sm:$0xff] (!%p165_p2)   ;;  %v3715_v8 = vld [vmem:[%s4537_s1 + $0x28] sm:$0xff] (!%p165_p2)   ;;  %vm1178_vm1 = vcmask (!%p165_p2), 1040384  }
   0x7   : > { %1186 = vmatpush1.bf16.msra.mxu0 (!%p165_p2), %v3710_v0  ;;  %3690 = vmatpush1.bf16.msra.mxu1 (!%p165_p2), %v3710_v0  ;;  %v3716_v9 = vld [vmem:[%s4537_s1 + $0x30] sm:$0xff] (!%p165_p2)   ;;  %v3717_v10 = vld [vmem:[%s4537_s1 + $0x38] sm:$0xff] (!%p165_p2)   ;;  %vm1179_vm2 = vcmask (!%p165_p2), 1041408   ;;  %v3923_v11 = vmov (!%p165_p2), 65535   ;;  %v3718_v13 = vld [vmem:[%s4537_s1 + $0x40] sm:$0xff] (!%p165_p2)  }
   0x8   : > { %1187 = vmatprep.subr.bf16.mxu0 (!%p165_p2), %v3922_v1  ;;  %3681 = vmatprep.subr.bf16.mxu1 (!%p165_p2), %v3922_v1  ;;  %v1180_v12 = vsel (!%p165_p2), %vm1178_vm1, 4294967295, %v3923_v11  ;;  %v3719_v14 = vld [vmem:[%s4537_s1 + $0x48] ss:$0 sps:$4 sm:$0x33] (!%p165_p2)  }
   0x9   : > { %v1181_v15 = vsel (!%p165_p2), %vm1179_vm2, %v1180_v12, 0 }
   0xa   : > { %v1183_v16 = vand.u32 (!%p165_p2), %v3719_v14, %v1181_v15 }
   0xb   : > { %1188 = vmatpush1.bf16.msra.mxu0 (!%p165_p2), %v3711_v2  ;;  %3691 = vmatpush1.bf16.msra.mxu1 (!%p165_p2), %v3711_v2 }
   0xc   : > { %1189 = vmatprep.subr.bf16.mxu0 (!%p165_p2), %v3922_v1  ;;  %3682 = vmatprep.subr.bf16.mxu1 (!%p165_p2), %v3922_v1 }
   0xd   : > { %s4542_s23 = smov (!%p192_p3, %s2829_s23), 255 }
   0xe   : > { %s3168_s26 = sshll.u32 %s4542_s23, 3  ;;  %s2833_s21 = sshll.u32 %s4542_s23, 2 }
   0xf   : > { %1190 = vmatpush1.bf16.msra.mxu0 %v3712_v3  ;;  %3692 = vmatpush1.bf16.msra.mxu1 %v3712_v3  ;;  %s3975_s29 = scalar_lea.vmem %s4536_s0, %s3168_s26  ;;  %s4189_s24 = scalar_lea.vmem %s4540_s4, %s2833_s21 }
  0x10   : > { %1191 = vmatprep.subr.bf16.mxu0 %v3922_v1  ;;  %3683 = vmatprep.subr.bf16.mxu1 %v3922_v1  ;;  %v3722_v6 = vld [vmem:[%s3975_s29 + $0x4] ss:$8 sps:$4 sm:$0xff]   ;;  %v3720_v17 = vld [vmem:[%s3975_s29] ss:$8 sps:$4 sm:$0xff]   ;;  %v3726_v19 = vld [vmem:[%s3975_s29 + $0x14] ss:$8 sps:$4 sm:$0xff]  }
  0x11   : > { %v3725_v7 = vld [vmem:[%s3975_s29 + $0x204] ss:$8 sps:$4 sm:$0xff]   ;;  %2972 = vmatprep.mubr.msk.bf16.mxu0 %vm985_vm0, %v3722_v6  ;;  %v3723_v18 = vld [vmem:[%s3975_s29 + $0x200] ss:$8 sps:$4 sm:$0xff]   ;;  %v3728_v20 = vld [vmem:[%s3975_s29 + $0x214] ss:$8 sps:$4 sm:$0xff]  }
  0x12   : > { %3004 = vmatprep.mubr.msk.bf16.mxu1 %vm985_vm0, %v3725_v7  ;;  %v3730_v21 = vld [vmem:[%s3975_s29 + $0x10] ss:$8 sps:$4 sm:$0xff]   ;;  %v3732_v23 = vld [vmem:[%s3975_s29 + $0x24] ss:$8 sps:$4 sm:$0xff]   ;;  %v3736_v25 = vld [vmem:[%s3975_s29 + $0x20] ss:$8 sps:$4 sm:$0xff]  }
  0x13   : > { %1192 = vmatpush1.bf16.msra.mxu0 %v3713_v4  ;;  %3693 = vmatpush1.bf16.msra.mxu1 %v3713_v4  ;;  %v3731_v22 = vld [vmem:[%s3975_s29 + $0x210] ss:$8 sps:$4 sm:$0xff]   ;;  %v3734_v24 = vld [vmem:[%s3975_s29 + $0x224] ss:$8 sps:$4 sm:$0xff]   ;;  %v3737_v26 = vld [vmem:[%s3975_s29 + $0x220] ss:$8 sps:$4 sm:$0xff]  }
  0x14   : > { %1193 = vmatprep.subr.bf16.mxu0 %v3922_v1  ;;  %3684 = vmatprep.subr.bf16.mxu1 %v3922_v1  ;;  %v3738_v27 = vld [vmem:[%s3975_s29 + $0x34] ss:$8 sps:$4 sm:$0xff]   ;;  %v3742_v29 = vld [vmem:[%s3975_s29 + $0x30] ss:$8 sps:$4 sm:$0xff]   ;;  %v3744_v31 = vld [vmem:[%s3975_s29 + $0x44] ss:$8 sps:$4 sm:$0xff]  }
  0x15   : > { %v3740_v28 = vld [vmem:[%s3975_s29 + $0x234] ss:$8 sps:$4 sm:$0xff]   ;;  %v3743_v30 = vld [vmem:[%s3975_s29 + $0x230] ss:$8 sps:$4 sm:$0xff]   ;;  %v3746_v32 = vld [vmem:[%s3975_s29 + $0x244] ss:$8 sps:$4 sm:$0xff]  }
  0x16   : > { %v3748_v33 = vld [vmem:[%s3975_s29 + $0x40] ss:$8 sps:$4 sm:$0xff]   ;;  %v3750_v35 = vld [vmem:[%s3975_s29 + $0x54] ss:$8 sps:$4 sm:$0xff]   ;;  %v3754_v37 = vld [vmem:[%s3975_s29 + $0x50] ss:$8 sps:$4 sm:$0xff]  }
  0x17   : > { %1194 = vmatpush1.bf16.msra.mxu0 %v3714_v5  ;;  %3694 = vmatpush1.bf16.msra.mxu1 %v3714_v5  ;;  %v3749_v34 = vld [vmem:[%s3975_s29 + $0x240] ss:$8 sps:$4 sm:$0xff]   ;;  %v3752_v36 = vld [vmem:[%s3975_s29 + $0x254] ss:$8 sps:$4 sm:$0xff]   ;;  %v3755_v38 = vld [vmem:[%s3975_s29 + $0x250] ss:$8 sps:$4 sm:$0xff]  }
  0x18   : > { %1195 = vmatprep.subr.bf16.mxu0 %v3922_v1  ;;  %3685 = vmatprep.subr.bf16.mxu1 %v3922_v1  ;;  %v3756_v39 = vld [vmem:[%s3975_s29 + $0x64] ss:$8 sps:$4 sm:$0xff]   ;;  %v3760_v41 = vld [vmem:[%s3975_s29 + $0x60] ss:$8 sps:$4 sm:$0xff]   ;;  %v3762_v43 = vld [vmem:[%s3975_s29 + $0x74] ss:$8 sps:$4 sm:$0xff]  }
  0x19   : > { %v3758_v40 = vld [vmem:[%s3975_s29 + $0x264] ss:$8 sps:$4 sm:$0xff]   ;;  %v3761_v42 = vld [vmem:[%s3975_s29 + $0x260] ss:$8 sps:$4 sm:$0xff]   ;;  %v3764_v44 = vld [vmem:[%s3975_s29 + $0x274] ss:$8 sps:$4 sm:$0xff]  }
  0x1a   : > { %v3766_v45 = vld [vmem:[%s3975_s29 + $0x70] ss:$8 sps:$4 sm:$0xff]   ;;  %v3768_v47 = vld [vmem:[%s3975_s29 + $0x84] ss:$8 sps:$4 sm:$0xff]   ;;  %v3772_v49 = vld [vmem:[%s3975_s29 + $0x80] ss:$8 sps:$4 sm:$0xff]  }
  0x1b   : > { %1196 = vmatpush1.bf16.msra.mxu0 %v3715_v8  ;;  %3695 = vmatpush1.bf16.msra.mxu1 %v3715_v8  ;;  %v3767_v46 = vld [vmem:[%s3975_s29 + $0x270] ss:$8 sps:$4 sm:$0xff]   ;;  %v3770_v48 = vld [vmem:[%s3975_s29 + $0x284] ss:$8 sps:$4 sm:$0xff]   ;;  %v3773_v50 = vld [vmem:[%s3975_s29 + $0x280] ss:$8 sps:$4 sm:$0xff]  }
  0x1c   : > { %1197 = vmatprep.subr.bf16.mxu0 %v3922_v1  ;;  %3686 = vmatprep.subr.bf16.mxu1 %v3922_v1  ;;  %v3774_v51 = vld [vmem:[%s3975_s29 + $0x94] ss:$8 sps:$4 sm:$0xff]   ;;  %v3778_v53 = vld [vmem:[%s3975_s29 + $0x90] ss:$8 sps:$4 sm:$0xff]   ;;  %v3780_v55 = vld [vmem:[%s3975_s29 + $0xa4] ss:$8 sps:$4 sm:$0xff]  }
  0x1d   : > { %v3776_v52 = vld [vmem:[%s3975_s29 + $0x294] ss:$8 sps:$4 sm:$0xff]   ;;  %v3779_v54 = vld [vmem:[%s3975_s29 + $0x290] ss:$8 sps:$4 sm:$0xff]   ;;  %v3782_v56 = vld [vmem:[%s3975_s29 + $0x2a4] ss:$8 sps:$4 sm:$0xff]  }
  0x1e   : > { %v3784_v57 = vld [vmem:[%s3975_s29 + $0xa0] ss:$8 sps:$4 sm:$0xff]   ;;  %v3786_v59 = vld [vmem:[%s3975_s29 + $0xb4] ss:$8 sps:$4 sm:$0xff]   ;;  %v3790_v61 = vld [vmem:[%s3975_s29 + $0xb0] ss:$8 sps:$4 sm:$0xff]  }
  0x1f   : > { %1198 = vmatpush1.bf16.msra.mxu0 %v3716_v9  ;;  %3696 = vmatpush1.bf16.msra.mxu1 %v3716_v9  ;;  %v3785_v58 = vld [vmem:[%s3975_s29 + $0x2a0] ss:$8 sps:$4 sm:$0xff]   ;;  %v3788_v60 = vld [vmem:[%s3975_s29 + $0x2b4] ss:$8 sps:$4 sm:$0xff]   ;;  %v3791_v62 = vld [vmem:[%s3975_s29 + $0x2b0] ss:$8 sps:$4 sm:$0xff]  }
  0x20   : > { %1199 = vmatprep.subr.bf16.mxu0 %v3922_v1  ;;  %3687 = vmatprep.subr.bf16.mxu1 %v3922_v1  ;;  %v3792_v63 = vld [vmem:[%s3975_s29 + $0xc4] ss:$8 sps:$4 sm:$0xff]   ;;  %v3797_v2 = vld [vmem:[%s3975_s29 + $0x2c0] ss:$8 sps:$4 sm:$0xff]   ;;  %v3798_v3 = vld [vmem:[%s3975_s29 + $0xd4] ss:$8 sps:$4 sm:$0xff]  }
  0x21   : > { %v3794_v0 = vld [vmem:[%s3975_s29 + $0x2c4] ss:$8 sps:$4 sm:$0xff]   ;;  %v3800_v4 = vld [vmem:[%s3975_s29 + $0x2d4] ss:$8 sps:$4 sm:$0xff]   ;;  %v3802_v5 = vld [vmem:[%s3975_s29 + $0xd0] ss:$8 sps:$4 sm:$0xff]  }
  0x22   : > { %v3803_v6 = vld [vmem:[%s3975_s29 + $0x2d0] ss:$8 sps:$4 sm:$0xff]   ;;  %v3804_v7 = vld [vmem:[%s3975_s29 + $0xe4] ss:$8 sps:$4 sm:$0xff]   ;;  %v3808_v9 = vld [vmem:[%s3975_s29 + $0xe0] ss:$8 sps:$4 sm:$0xff]  }
  0x23   : > { %1200 = vmatpush1.bf16.msra.mxu0 %v3717_v10  ;;  %3697 = vmatpush1.bf16.msra.mxu1 %v3717_v10  ;;  %v3806_v8 = vld [vmem:[%s3975_s29 + $0x2e4] ss:$8 sps:$4 sm:$0xff]   ;;  %v3809_v10 = vld [vmem:[%s3975_s29 + $0x2e0] ss:$8 sps:$4 sm:$0xff]   ;;  %v3810_v11 = vld [vmem:[%s3975_s29 + $0xf4] ss:$8 sps:$4 sm:$0xff]  }
  0x24   : > { %1201 = vmatprep.subr.bf16.mxu0 %v3922_v1  ;;  %3688 = vmatprep.subr.bf16.mxu1 %v3922_v1  ;;  %v3812_v12 = vld [vmem:[%s3975_s29 + $0x2f4] ss:$8 sps:$4 sm:$0xff]   ;;  %v3815_v14 = vld [vmem:[%s3975_s29 + $0x2f0] ss:$8 sps:$4 sm:$0xff]   ;;  %v3816_v15 = vld [vmem:[%s3975_s29 + $0x104] ss:$8 sps:$4 sm:$0xff]  }
  0x27   : > { %1202 = vmatpush1.bf16.msra.mxu0 %v3718_v13  ;;  %3698 = vmatpush1.bf16.msra.mxu1 %v3718_v13  ;;  %v3814_v13 = vld [vmem:[%s3975_s29 + $0xf0] ss:$8 sps:$4 sm:$0xff]  }
  0x28   : > { %1203 = vmatprep.subr.bf16.mxu0 %v3922_v1  ;;  %3689 = vmatprep.subr.bf16.mxu1 %v3922_v1  ;;  %v3796_v1 = vld [vmem:[%s3975_s29 + $0xc0] ss:$8 sps:$4 sm:$0xff]  }
  0x2b   : > { %1204 = vmatpush1.bf16.msra.mxu0 %v1183_v16  ;;  %3699 = vmatpush1.bf16.msra.mxu1 %v1183_v16  ;;  %v3818_v16 = vld [vmem:[%s3975_s29 + $0x304] ss:$8 sps:$4 sm:$0xff]  }
  0x2e   : > { %1218 = vmatmul.mubr.bf16.vlgmr.msra.gmra.mrb[0].mxu0 %v3720_v17  ;;  %1474 = vmatmul.mubr.bf16.vlgmr.msra.gmra.mrb[0].mxu1 %v3723_v18  ;;  %v3820_v17 = vld [vmem:[%s3975_s29 + $0x100] ss:$8 sps:$4 sm:$0xff]  }
  0x2f   : > { %2973 = vmatprep.mubr.msk.bf16.mxu0 %vm985_vm0, %v3726_v19  ;;  %3005 = vmatprep.mubr.msk.bf16.mxu1 %vm985_vm0, %v3728_v20  ;;  %v3821_v18 = vld [vmem:[%s3975_s29 + $0x300] ss:$8 sps:$4 sm:$0xff]   ;;  %v3822_v19 = vld [vmem:[%s3975_s29 + $0x114] ss:$8 sps:$4 sm:$0xff]  }
  0x30   : > { %v3824_v20 = vld [vmem:[%s3975_s29 + $0x314] ss:$8 sps:$4 sm:$0xff]  }
  0x36   : > { %1226 = vmatmul.mubr.bf16.gmra.mrb[4].mxu0 %v3730_v21  ;;  %1482 = vmatmul.mubr.bf16.gmra.mrb[4].mxu1 %v3731_v22  ;;  %v3826_v21 = vld [vmem:[%s3975_s29 + $0x110] ss:$8 sps:$4 sm:$0xff]  }
  0x37   : > { %2974 = vmatprep.mubr.msk.bf16.mxu0 %vm985_vm0, %v3732_v23  ;;  %3006 = vmatprep.mubr.msk.bf16.mxu1 %vm985_vm0, %v3734_v24  ;;  %v3827_v22 = vld [vmem:[%s3975_s29 + $0x310] ss:$8 sps:$4 sm:$0xff]   ;;  %v3828_v23 = vld [vmem:[%s3975_s29 + $0x124] ss:$8 sps:$4 sm:$0xff]  }
  0x38   : > { %v3830_v24 = vld [vmem:[%s3975_s29 + $0x324] ss:$8 sps:$4 sm:$0xff]  }
  0x3e   : > { %1234 = vmatmul.mubr.bf16.gmra.mrb[8].mxu0 %v3736_v25  ;;  %1490 = vmatmul.mubr.bf16.gmra.mrb[8].mxu1 %v3737_v26  ;;  %v3832_v25 = vld [vmem:[%s3975_s29 + $0x120] ss:$8 sps:$4 sm:$0xff]  }
  0x3f   : > { %2975 = vmatprep.mubr.msk.bf16.mxu0 %vm985_vm0, %v3738_v27  ;;  %3007 = vmatprep.mubr.msk.bf16.mxu1 %vm985_vm0, %v3740_v28  ;;  %v3833_v26 = vld [vmem:[%s3975_s29 + $0x320] ss:$8 sps:$4 sm:$0xff]   ;;  %v3834_v27 = vld [vmem:[%s3975_s29 + $0x134] ss:$8 sps:$4 sm:$0xff]  }
  0x40   : > { %v3836_v28 = vld [vmem:[%s3975_s29 + $0x334] ss:$8 sps:$4 sm:$0xff]  }
  0x46   : > { %1242 = vmatmul.mubr.bf16.gmra.mrb[12].mxu0 %v3742_v29  ;;  %1498 = vmatmul.mubr.bf16.gmra.mrb[12].mxu1 %v3743_v30  ;;  %v3838_v29 = vld [vmem:[%s3975_s29 + $0x130] ss:$8 sps:$4 sm:$0xff]  }
  0x47   : > { %2976 = vmatprep.mubr.msk.bf16.mxu0 %vm985_vm0, %v3744_v31  ;;  %3008 = vmatprep.mubr.msk.bf16.mxu1 %vm985_vm0, %v3746_v32  ;;  %v3839_v30 = vld [vmem:[%s3975_s29 + $0x330] ss:$8 sps:$4 sm:$0xff]   ;;  %v3840_v31 = vld [vmem:[%s3975_s29 + $0x144] ss:$8 sps:$4 sm:$0xff]  }
  0x48   : > { %v3842_v32 = vld [vmem:[%s3975_s29 + $0x344] ss:$8 sps:$4 sm:$0xff]  }
  0x4e   : > { %1250 = vmatmul.mubr.bf16.gmra.mrb[16].mxu0 %v3748_v33  ;;  %1506 = vmatmul.mubr.bf16.gmra.mrb[16].mxu1 %v3749_v34  ;;  %v3844_v33 = vld [vmem:[%s3975_s29 + $0x140] ss:$8 sps:$4 sm:$0xff]  }
  0x4f   : > { %2977 = vmatprep.mubr.msk.bf16.mxu0 %vm985_vm0, %v3750_v35  ;;  %3009 = vmatprep.mubr.msk.bf16.mxu1 %vm985_vm0, %v3752_v36  ;;  %v3845_v34 = vld [vmem:[%s3975_s29 + $0x340] ss:$8 sps:$4 sm:$0xff]   ;;  %v3846_v35 = vld [vmem:[%s3975_s29 + $0x154] ss:$8 sps:$4 sm:$0xff]  }
  0x50   : > { %v3848_v36 = vld [vmem:[%s3975_s29 + $0x354] ss:$8 sps:$4 sm:$0xff]  }
  0x56   : > { %1258 = vmatmul.mubr.bf16.gmra.mrb[20].mxu0 %v3754_v37  ;;  %1514 = vmatmul.mubr.bf16.gmra.mrb[20].mxu1 %v3755_v38  ;;  %v3850_v37 = vld [vmem:[%s3975_s29 + $0x150] ss:$8 sps:$4 sm:$0xff]  }
  0x57   : > { %2978 = vmatprep.mubr.msk.bf16.mxu0 %vm985_vm0, %v3756_v39  ;;  %3010 = vmatprep.mubr.msk.bf16.mxu1 %vm985_vm0, %v3758_v40  ;;  %v3851_v38 = vld [vmem:[%s3975_s29 + $0x350] ss:$8 sps:$4 sm:$0xff]   ;;  %v3852_v39 = vld [vmem:[%s3975_s29 + $0x164] ss:$8 sps:$4 sm:$0xff]  }
  0x58   : > { %v3854_v40 = vld [vmem:[%s3975_s29 + $0x364] ss:$8 sps:$4 sm:$0xff]  }
  0x5e   : > { %1266 = vmatmul.mubr.bf16.gmra.mrb[24].mxu0 %v3760_v41  ;;  %1522 = vmatmul.mubr.bf16.gmra.mrb[24].mxu1 %v3761_v42  ;;  %v3856_v41 = vld [vmem:[%s3975_s29 + $0x160] ss:$8 sps:$4 sm:$0xff]  }
  0x5f   : > { %2979 = vmatprep.mubr.msk.bf16.mxu0 %vm985_vm0, %v3762_v43  ;;  %3011 = vmatprep.mubr.msk.bf16.mxu1 %vm985_vm0, %v3764_v44  ;;  %v3857_v42 = vld [vmem:[%s3975_s29 + $0x360] ss:$8 sps:$4 sm:$0xff]   ;;  %v3858_v43 = vld [vmem:[%s3975_s29 + $0x174] ss:$8 sps:$4 sm:$0xff]  }
  0x60   : > { %v3860_v44 = vld [vmem:[%s3975_s29 + $0x374] ss:$8 sps:$4 sm:$0xff]  }
  0x66   : > { %1274 = vmatmul.mubr.bf16.gmra.mrb[28].mxu0 %v3766_v45  ;;  %1530 = vmatmul.mubr.bf16.gmra.mrb[28].mxu1 %v3767_v46  ;;  %v3862_v45 = vld [vmem:[%s3975_s29 + $0x170] ss:$8 sps:$4 sm:$0xff]  }
  0x67   : > { %2980 = vmatprep.mubr.msk.bf16.mxu0 %vm985_vm0, %v3768_v47  ;;  %3012 = vmatprep.mubr.msk.bf16.mxu1 %vm985_vm0, %v3770_v48  ;;  %v3863_v46 = vld [vmem:[%s3975_s29 + $0x370] ss:$8 sps:$4 sm:$0xff]   ;;  %v3864_v47 = vld [vmem:[%s3975_s29 + $0x184] ss:$8 sps:$4 sm:$0xff]  }
  0x68   : > { %v3866_v48 = vld [vmem:[%s3975_s29 + $0x384] ss:$8 sps:$4 sm:$0xff]  }
  0x6e   : > { %1282 = vmatmul.mubr.bf16.gmra.mrb[32].mxu0 %v3772_v49  ;;  %1538 = vmatmul.mubr.bf16.gmra.mrb[32].mxu1 %v3773_v50  ;;  %v3868_v49 = vld [vmem:[%s3975_s29 + $0x180] ss:$8 sps:$4 sm:$0xff]  }
  0x6f   : > { %2981 = vmatprep.mubr.msk.bf16.mxu0 %vm985_vm0, %v3774_v51  ;;  %3013 = vmatprep.mubr.msk.bf16.mxu1 %vm985_vm0, %v3776_v52  ;;  %v3869_v50 = vld [vmem:[%s3975_s29 + $0x380] ss:$8 sps:$4 sm:$0xff]   ;;  %v3870_v51 = vld [vmem:[%s3975_s29 + $0x194] ss:$8 sps:$4 sm:$0xff]  }
  0x70   : > { %v3872_v52 = vld [vmem:[%s3975_s29 + $0x394] ss:$8 sps:$4 sm:$0xff]  }
  0x76   : > { %1290 = vmatmul.mubr.bf16.gmra.mrb[36].mxu0 %v3778_v53  ;;  %1546 = vmatmul.mubr.bf16.gmra.mrb[36].mxu1 %v3779_v54  ;;  %v3874_v53 = vld [vmem:[%s3975_s29 + $0x190] ss:$8 sps:$4 sm:$0xff]  }
  0x77   : > { %2982 = vmatprep.mubr.msk.bf16.mxu0 %vm985_vm0, %v3780_v55  ;;  %3014 = vmatprep.mubr.msk.bf16.mxu1 %vm985_vm0, %v3782_v56  ;;  %v3875_v54 = vld [vmem:[%s3975_s29 + $0x390] ss:$8 sps:$4 sm:$0xff]   ;;  %v3876_v55 = vld [vmem:[%s3975_s29 + $0x1a4] ss:$8 sps:$4 sm:$0xff]  }
  0x78   : > { %v3878_v56 = vld [vmem:[%s3975_s29 + $0x3a4] ss:$8 sps:$4 sm:$0xff]  }
  0x7e   : > { %1298 = vmatmul.mubr.bf16.gmra.mrb[40].mxu0 %v3784_v57  ;;  %1554 = vmatmul.mubr.bf16.gmra.mrb[40].mxu1 %v3785_v58  ;;  %v3880_v57 = vld [vmem:[%s3975_s29 + $0x1a0] ss:$8 sps:$4 sm:$0xff]  }
  0x7f   : > { %2983 = vmatprep.mubr.msk.bf16.mxu0 %vm985_vm0, %v3786_v59  ;;  %3015 = vmatprep.mubr.msk.bf16.mxu1 %vm985_vm0, %v3788_v60  ;;  %v3881_v58 = vld [vmem:[%s3975_s29 + $0x3a0] ss:$8 sps:$4 sm:$0xff]   ;;  %v3882_v59 = vld [vmem:[%s3975_s29 + $0x1b4] ss:$8 sps:$4 sm:$0xff]  }
  0x80   : > { %v3884_v60 = vld [vmem:[%s3975_s29 + $0x3b4] ss:$8 sps:$4 sm:$0xff]  }
  0x86   : > { %1306 = vmatmul.mubr.bf16.gmra.mrb[44].mxu0 %v3790_v61  ;;  %1562 = vmatmul.mubr.bf16.gmra.mrb[44].mxu1 %v3791_v62  ;;  %v4162_v61 = vld [vmem:[%s4538_s2] ss:$0 sm:$0xff] }
  0x87   : > { %2984 = vmatprep.mubr.msk.bf16.mxu0 %vm985_vm0, %v3792_v63  ;;  %3016 = vmatprep.mubr.msk.bf16.mxu1 %vm985_vm0, %v3794_v0  ;;  %v4169_v63 = vld [vmem:[%s4539_s3] ss:$0 sm:$0xff] }
  0x8e   : > { %1314 = vmatmul.mubr.bf16.gmra.mrb[48].mxu0 %v3796_v1  ;;  %1570 = vmatmul.mubr.bf16.gmra.mrb[48].mxu1 %v3797_v2 }
  0x8f   : > { %2985 = vmatprep.mubr.msk.bf16.mxu0 %vm985_vm0, %v3798_v3  ;;  %3017 = vmatprep.mubr.msk.bf16.mxu1 %vm985_vm0, %v3800_v4 }
  0x96   : > { %1322 = vmatmul.mubr.bf16.gmra.mrb[52].mxu0 %v3802_v5  ;;  %1578 = vmatmul.mubr.bf16.gmra.mrb[52].mxu1 %v3803_v6  ;;  %v3886_v5 = vld [vmem:[%s3975_s29 + $0x1b0] ss:$8 sps:$4 sm:$0xff]  }
  0x97   : > { %2986 = vmatprep.mubr.msk.bf16.mxu0 %vm985_vm0, %v3804_v7  ;;  %3018 = vmatprep.mubr.msk.bf16.mxu1 %vm985_vm0, %v3806_v8  ;;  %v3887_v6 = vld [vmem:[%s3975_s29 + $0x3b0] ss:$8 sps:$4 sm:$0xff]  }
  0x9e   : > { %1330 = vmatmul.mubr.bf16.gmra.mrb[56].mxu0 %v3808_v9  ;;  %1586 = vmatmul.mubr.bf16.gmra.mrb[56].mxu1 %v3809_v10  ;;  %v3888_v9 = vld [vmem:[%s3975_s29 + $0x1c4] ss:$8 sps:$4 sm:$0xff]  }
  0x9f   : > { %2987 = vmatprep.mubr.msk.bf16.mxu0 %vm985_vm0, %v3810_v11  ;;  %3019 = vmatprep.mubr.msk.bf16.mxu1 %vm985_vm0, %v3812_v12  ;;  %v3890_v10 = vld [vmem:[%s3975_s29 + $0x3c4] ss:$8 sps:$4 sm:$0xff]  }
  0xa6   : > { %1338 = vmatmul.mubr.bf16.gmra.mrb[60].mxu0 %v3814_v13  ;;  %1594 = vmatmul.mubr.bf16.gmra.mrb[60].mxu1 %v3815_v14 }
  0xa7   : > { %2988 = vmatprep.mubr.msk.bf16.mxu0 %vm985_vm0, %v3816_v15  ;;  %3020 = vmatprep.mubr.msk.bf16.mxu1 %vm985_vm0, %v3818_v16 }
  0xae   : > { %1346 = vmatmul.mubr.bf16.gmra.mrb[64].mxu0 %v3820_v17  ;;  %1602 = vmatmul.mubr.bf16.gmra.mrb[64].mxu1 %v3821_v18 }
  0xaf   : > { %2989 = vmatprep.mubr.msk.bf16.mxu0 %vm985_vm0, %v3822_v19  ;;  %3021 = vmatprep.mubr.msk.bf16.mxu1 %vm985_vm0, %v3824_v20 }
  0xb6   : > { %1354 = vmatmul.mubr.bf16.gmra.mrb[68].mxu0 %v3826_v21  ;;  %1610 = vmatmul.mubr.bf16.gmra.mrb[68].mxu1 %v3827_v22 }
  0xb7   : > { %2990 = vmatprep.mubr.msk.bf16.mxu0 %vm985_vm0, %v3828_v23  ;;  %3022 = vmatprep.mubr.msk.bf16.mxu1 %vm985_vm0, %v3830_v24 }
  0xbe   : > { %1362 = vmatmul.mubr.bf16.gmra.mrb[72].mxu0 %v3832_v25  ;;  %1618 = vmatmul.mubr.bf16.gmra.mrb[72].mxu1 %v3833_v26 }
  0xbf   : > { %2991 = vmatprep.mubr.msk.bf16.mxu0 %vm985_vm0, %v3834_v27  ;;  %3023 = vmatprep.mubr.msk.bf16.mxu1 %vm985_vm0, %v3836_v28 }
  0xc6   : > { %1370 = vmatmul.mubr.bf16.gmra.mrb[76].mxu0 %v3838_v29  ;;  %1626 = vmatmul.mubr.bf16.gmra.mrb[76].mxu1 %v3839_v30 }
  0xc7   : > { %2992 = vmatprep.mubr.msk.bf16.mxu0 %vm985_vm0, %v3840_v31  ;;  %3024 = vmatprep.mubr.msk.bf16.mxu1 %vm985_vm0, %v3842_v32  ;;  %v3892_v31 = vld [vmem:[%s3975_s29 + $0x1c0] ss:$8 sps:$4 sm:$0xff]  }
  0xc8   : > { %v3893_v32 = vld [vmem:[%s3975_s29 + $0x3c0] ss:$8 sps:$4 sm:$0xff]  }
  0xce   : > { %1378 = vmatmul.mubr.bf16.gmra.mrb[80].mxu0 %v3844_v33  ;;  %1634 = vmatmul.mubr.bf16.gmra.mrb[80].mxu1 %v3845_v34 }
  0xcf   : > { %2993 = vmatprep.mubr.msk.bf16.mxu0 %vm985_vm0, %v3846_v35  ;;  %3025 = vmatprep.mubr.msk.bf16.mxu1 %vm985_vm0, %v3848_v36  ;;  %v3894_v35 = vld [vmem:[%s3975_s29 + $0x1d4] ss:$8 sps:$4 sm:$0xff]  }
  0xd0   : > { %v3896_v36 = vld [vmem:[%s3975_s29 + $0x3d4] ss:$8 sps:$4 sm:$0xff]  }
  0xd6   : > { %1386 = vmatmul.mubr.bf16.gmra.mrb[84].mxu0 %v3850_v37  ;;  %1642 = vmatmul.mubr.bf16.gmra.mrb[84].mxu1 %v3851_v38 }
  0xd7   : > { %2994 = vmatprep.mubr.msk.bf16.mxu0 %vm985_vm0, %v3852_v39  ;;  %3026 = vmatprep.mubr.msk.bf16.mxu1 %vm985_vm0, %v3854_v40 }
  0xde   : > { %1394 = vmatmul.mubr.bf16.gmra.mrb[88].mxu0 %v3856_v41  ;;  %1650 = vmatmul.mubr.bf16.gmra.mrb[88].mxu1 %v3857_v42 }
  0xdf   : > { %2995 = vmatprep.mubr.msk.bf16.mxu0 %vm985_vm0, %v3858_v43  ;;  %3027 = vmatprep.mubr.msk.bf16.mxu1 %vm985_vm0, %v3860_v44 }
  0xe6   : > { %1402 = vmatmul.mubr.bf16.gmra.mrb[92].mxu0 %v3862_v45  ;;  %1658 = vmatmul.mubr.bf16.gmra.mrb[92].mxu1 %v3863_v46 }
  0xe7   : > { %2996 = vmatprep.mubr.msk.bf16.mxu0 %vm985_vm0, %v3864_v47  ;;  %3028 = vmatprep.mubr.msk.bf16.mxu1 %vm985_vm0, %v3866_v48 }
  0xee   : > { %1410 = vmatmul.mubr.bf16.gmra.mrb[96].mxu0 %v3868_v49  ;;  %1666 = vmatmul.mubr.bf16.gmra.mrb[96].mxu1 %v3869_v50 }
  0xef   : > { %2997 = vmatprep.mubr.msk.bf16.mxu0 %vm985_vm0, %v3870_v51  ;;  %3029 = vmatprep.mubr.msk.bf16.mxu1 %vm985_vm0, %v3872_v52 }
  0xf6   : > { %1418 = vmatmul.mubr.bf16.gmra.mrb[100].mxu0 %v3874_v53  ;;  %1674 = vmatmul.mubr.bf16.gmra.mrb[100].mxu1 %v3875_v54 }
  0xf7   : > { %2998 = vmatprep.mubr.msk.bf16.mxu0 %vm985_vm0, %v3876_v55  ;;  %3030 = vmatprep.mubr.msk.bf16.mxu1 %vm985_vm0, %v3878_v56 }
  0xfe   : > { %1426 = vmatmul.mubr.bf16.gmra.mrb[104].mxu0 %v3880_v57  ;;  %1682 = vmatmul.mubr.bf16.gmra.mrb[104].mxu1 %v3881_v58  ;;  %v3898_v57 = vld [vmem:[%s3975_s29 + $0x1d0] ss:$8 sps:$4 sm:$0xff]  }
  0xff   : > { %2999 = vmatprep.mubr.msk.bf16.mxu0 %vm985_vm0, %v3882_v59  ;;  %3031 = vmatprep.mubr.msk.bf16.mxu1 %vm985_vm0, %v3884_v60  ;;  %v3899_v58 = vld [vmem:[%s3975_s29 + $0x3d0] ss:$8 sps:$4 sm:$0xff]  }
 0x101   : > { %v1219_v62 = vpop.f32.mrb[0].mxu0  ;;  %v1475_v0 = vpop.f32.mrb[0].mxu1 }
 0x102   : > { %v1737_v1 = vmul.f32 %v4162_v61, %v1219_v62  ;;  %v1801_v2 = vmul.f32 %v4162_v61, %v1475_v0  ;;  %v1221_v3 = vpop.f32.mrb[1].mxu0  ;;  %v1477_v4 = vpop.f32.mrb[1].mxu1  ;;  %v3900_v62 = vld [vmem:[%s3975_s29 + $0x1e4] ss:$8 sps:$4 sm:$0xff]  }
 0x103   : > { %v1222_v7 = vpop.f32.mrb[2].mxu0  ;;  %v1478_v8 = vpop.f32.mrb[2].mxu1  ;;  %v3902_v0 = vld [vmem:[%s3975_s29 + $0x3e4] ss:$8 sps:$4 sm:$0xff]  }
 0x104   : > { %v1872_v11 = vadd.f32 %v4169_v63, %v1737_v1  ;;  %v1936_v12 = vadd.f32 %v4169_v63, %v1801_v2  ;;  %v1738_v13 = vmul.f32 %v4162_v61, %v1222_v7  ;;  %v1802_v14 = vmul.f32 %v4162_v61, %v1478_v8  ;;  %v1224_v15 = vpop.f32.mrb[3].mxu0  ;;  %v1480_v16 = vpop.f32.mrb[3].mxu1 }
 0x106   : > { %v1873_v17 = vadd.f32 %v4169_v63, %v1738_v13  ;;  %v1937_v18 = vadd.f32 %v4169_v63, %v1802_v14  ;;  %1434 = vmatmul.mubr.bf16.gmra.mrb[108].mxu0 %v3886_v5  ;;  %1690 = vmatmul.mubr.bf16.gmra.mrb[108].mxu1 %v3887_v6  ;;  %v2000_v19 = vmax.f32 %v1872_v11, 0.0  ;;  %v2064_v20 = vmax.f32 %v1936_v12, 0.0 }
 0x107   : > { %3000 = vmatprep.mubr.msk.bf16.mxu0 %vm985_vm0, %v3888_v9  ;;  %3032 = vmatprep.mubr.msk.bf16.mxu1 %vm985_vm0, %v3890_v10 }
 0x108   : > { %v2001_v21 = vmax.f32 %v1873_v17, 0.0  ;;  %v2065_v22 = vmax.f32 %v1937_v18, 0.0 }
 0x109   : > { %v1227_v23 = vpop.f32.mrb[4].mxu0  ;;  %v1483_v24 = vpop.f32.mrb[4].mxu1 }
 0x10a   : > { %v3300_v25 = vpack.c.bf16 %v2001_v21, %v2000_v19  ;;  %v3460_v26 = vpack.c.bf16 %v2065_v22, %v2064_v20  ;;  %v1739_v27 = vmul.f32 %v4162_v61, %v1227_v23  ;;  %v1803_v28 = vmul.f32 %v4162_v61, %v1483_v24  ;;  %v1229_v29 = vpop.f32.mrb[5].mxu0  ;;  %v1485_v30 = vpop.f32.mrb[5].mxu1  ;;  %v3904_v21 = vld [vmem:[%s3975_s29 + $0x1e0] ss:$8 sps:$4 sm:$0xff]  }
 0x10b   : > { %v1230_v33 = vpop.f32.mrb[6].mxu0  ;;  %v1486_v34 = vpop.f32.mrb[6].mxu1  ;;  %v3905_v22 = vld [vmem:[%s3975_s29 + $0x3e0] ss:$8 sps:$4 sm:$0xff]  }
 0x10c   : > { %3301 = vst [vmem:[%s4189_s24] sm:$0xff] %v3300_v25   ;;  %3648 = vst [vmem:[%s4189_s24 + $0x100] sm:$0xff] %v3460_v26   ;;  %v1874_v37 = vadd.f32 %v4169_v63, %v1739_v27  ;;  %v1938_v38 = vadd.f32 %v4169_v63, %v1803_v28  ;;  %v1740_v39 = vmul.f32 %v4162_v61, %v1230_v33  ;;  %v1232_v41 = vpop.f32.mrb[7].mxu0  ;;  %v1488_v42 = vpop.f32.mrb[7].mxu1  ;;  %v3906_v25 = vld [vmem:[%s3975_s29 + $0x1f4] ss:$8 sps:$4 sm:$0xff]  }
 0x10d   : > { %v1804_v40 = vmul.f32 %v4162_v61, %v1486_v34  ;;  %v3908_v26 = vld [vmem:[%s3975_s29 + $0x3f4] ss:$8 sps:$4 sm:$0xff]  }
 0x10e   : > { %v1875_v43 = vadd.f32 %v4169_v63, %v1740_v39  ;;  %1442 = vmatmul.mubr.bf16.gmra.mrb[112].mxu0 %v3892_v31  ;;  %1698 = vmatmul.mubr.bf16.gmra.mrb[112].mxu1 %v3893_v32  ;;  %v2002_v45 = vmax.f32 %v1874_v37, 0.0  ;;  %v2066_v46 = vmax.f32 %v1938_v38, 0.0 }
 0x10f   : > { %v1939_v44 = vadd.f32 %v4169_v63, %v1804_v40  ;;  %3001 = vmatprep.mubr.msk.bf16.mxu0 %vm985_vm0, %v3894_v35  ;;  %3033 = vmatprep.mubr.msk.bf16.mxu1 %vm985_vm0, %v3896_v36 }
 0x110   : > { %v2003_v47 = vmax.f32 %v1875_v43, 0.0 }
 0x111   : > { %v2067_v48 = vmax.f32 %v1939_v44, 0.0  ;;  %v1235_v49 = vpop.f32.mrb[8].mxu0  ;;  %v1491_v50 = vpop.f32.mrb[8].mxu1 }
 0x112   : > { %v3305_v51 = vpack.c.bf16 %v2003_v47, %v2002_v45  ;;  %v1741_v53 = vmul.f32 %v4162_v61, %v1235_v49  ;;  %v1805_v54 = vmul.f32 %v4162_v61, %v1491_v50  ;;  %v1237_v55 = vpop.f32.mrb[9].mxu0  ;;  %v1493_v56 = vpop.f32.mrb[9].mxu1  ;;  %v3910_v47 = vld [vmem:[%s3975_s29 + $0x1f0] ss:$8 sps:$4 sm:$0xff]  }
 0x113   : > { %v3465_v52 = vpack.c.bf16 %v2067_v48, %v2066_v46  ;;  %v1238_v59 = vpop.f32.mrb[10].mxu0  ;;  %v1494_v60 = vpop.f32.mrb[10].mxu1  ;;  %v3911_v48 = vld [vmem:[%s3975_s29 + $0x3f0] ss:$8 sps:$4 sm:$0xff]  }
 0x114   : > { %3617 = vst [vmem:[%s4189_s24 + $0x8] sm:$0xff] %v3305_v51   ;;  %v1876_v1 = vadd.f32 %v4169_v63, %v1741_v53  ;;  %v1940_v2 = vadd.f32 %v4169_v63, %v1805_v54  ;;  %v1742_v3 = vmul.f32 %v4162_v61, %v1238_v59  ;;  %v1806_v4 = vmul.f32 %v4162_v61, %v1494_v60  ;;  %v1240_v5 = vpop.f32.mrb[11].mxu0  ;;  %v1496_v6 = vpop.f32.mrb[11].mxu1 }
 0x115   : > { %3649 = vst [vmem:[%s4189_s24 + $0x108] sm:$0xff] %v3465_v52  }
 0x116   : > { %v1877_v7 = vadd.f32 %v4169_v63, %v1742_v3  ;;  %v1941_v8 = vadd.f32 %v4169_v63, %v1806_v4  ;;  %1450 = vmatmul.mubr.bf16.gmra.mrb[116].mxu0 %v3898_v57  ;;  %1706 = vmatmul.mubr.bf16.gmra.mrb[116].mxu1 %v3899_v58  ;;  %v2004_v9 = vmax.f32 %v1876_v1, 0.0  ;;  %v2068_v10 = vmax.f32 %v1940_v2, 0.0 }
 0x117   : > { %3002 = vmatprep.mubr.msk.bf16.mxu0 %vm985_vm0, %v3900_v62  ;;  %3034 = vmatprep.mubr.msk.bf16.mxu1 %vm985_vm0, %v3902_v0 }
 0x118   : > { %v2005_v11 = vmax.f32 %v1877_v7, 0.0  ;;  %v2069_v12 = vmax.f32 %v1941_v8, 0.0 }
 0x119   : > { %v1243_v13 = vpop.f32.mrb[12].mxu0  ;;  %v1499_v14 = vpop.f32.mrb[12].mxu1 }
 0x11a   : > { %v3310_v15 = vpack.c.bf16 %v2005_v11, %v2004_v9  ;;  %v3470_v16 = vpack.c.bf16 %v2069_v12, %v2068_v10  ;;  %v1743_v17 = vmul.f32 %v4162_v61, %v1243_v13  ;;  %v1807_v18 = vmul.f32 %v4162_v61, %v1499_v14  ;;  %v1245_v19 = vpop.f32.mrb[13].mxu0  ;;  %v1501_v20 = vpop.f32.mrb[13].mxu1 }
 0x11b   : > { %v1246_v23 = vpop.f32.mrb[14].mxu0  ;;  %v1502_v24 = vpop.f32.mrb[14].mxu1 }
 0x11c   : > { %3618 = vst [vmem:[%s4189_s24 + $0x10] sm:$0xff] %v3310_v15   ;;  %3650 = vst [vmem:[%s4189_s24 + $0x110] sm:$0xff] %v3470_v16   ;;  %v1878_v27 = vadd.f32 %v4169_v63, %v1743_v17  ;;  %v1942_v28 = vadd.f32 %v4169_v63, %v1807_v18  ;;  %v1744_v29 = vmul.f32 %v4162_v61, %v1246_v23  ;;  %v1248_v31 = vpop.f32.mrb[15].mxu0  ;;  %v1504_v32 = vpop.f32.mrb[15].mxu1 }
 0x11d   : > { %v1808_v30 = vmul.f32 %v4162_v61, %v1502_v24 }
 0x11e   : > { %v1879_v33 = vadd.f32 %v4169_v63, %v1744_v29  ;;  %1458 = vmatmul.mubr.bf16.gmra.mrb[120].mxu0 %v3904_v21  ;;  %1714 = vmatmul.mubr.bf16.gmra.mrb[120].mxu1 %v3905_v22  ;;  %v2006_v35 = vmax.f32 %v1878_v27, 0.0  ;;  %v2070_v36 = vmax.f32 %v1942_v28, 0.0 }
 0x11f   : > { %v1943_v34 = vadd.f32 %v4169_v63, %v1808_v30  ;;  %3003 = vmatprep.mubr.msk.bf16.mxu0 %vm985_vm0, %v3906_v25  ;;  %3035 = vmatprep.mubr.msk.bf16.mxu1 %vm985_vm0, %v3908_v26 }
 0x120   : > { %v2007_v37 = vmax.f32 %v1879_v33, 0.0 }
 0x121   : > { %v2071_v38 = vmax.f32 %v1943_v34, 0.0  ;;  %v1251_v39 = vpop.f32.mrb[16].mxu0  ;;  %v1507_v40 = vpop.f32.mrb[16].mxu1 }
 0x122   : > { %v3315_v41 = vpack.c.bf16 %v2007_v37, %v2006_v35  ;;  %v1745_v43 = vmul.f32 %v4162_v61, %v1251_v39  ;;  %v1809_v44 = vmul.f32 %v4162_v61, %v1507_v40  ;;  %v1253_v45 = vpop.f32.mrb[17].mxu0  ;;  %v1509_v46 = vpop.f32.mrb[17].mxu1 }
 0x123   : > { %v3475_v42 = vpack.c.bf16 %v2071_v38, %v2070_v36  ;;  %v1254_v49 = vpop.f32.mrb[18].mxu0  ;;  %v1510_v50 = vpop.f32.mrb[18].mxu1 }
 0x124   : > { %3619 = vst [vmem:[%s4189_s24 + $0x18] sm:$0xff] %v3315_v41   ;;  %v1880_v51 = vadd.f32 %v4169_v63, %v1745_v43  ;;  %v1944_v52 = vadd.f32 %v4169_v63, %v1809_v44  ;;  %v1746_v53 = vmul.f32 %v4162_v61, %v1254_v49  ;;  %v1810_v54 = vmul.f32 %v4162_v61, %v1510_v50  ;;  %v1256_v55 = vpop.f32.mrb[19].mxu0  ;;  %v1512_v56 = vpop.f32.mrb[19].mxu1 }
 0x125   : > { %3651 = vst [vmem:[%s4189_s24 + $0x118] sm:$0xff] %v3475_v42  }
 0x126   : > { %v1881_v57 = vadd.f32 %v4169_v63, %v1746_v53  ;;  %v1945_v58 = vadd.f32 %v4169_v63, %v1810_v54  ;;  %1466 = vmatmul.mubr.bf16.gmra.mrb[124].mxu0 %v3910_v47  ;;  %1722 = vmatmul.mubr.bf16.gmra.mrb[124].mxu1 %v3911_v48  ;;  %v2008_v59 = vmax.f32 %v1880_v51, 0.0  ;;  %v2072_v60 = vmax.f32 %v1944_v52, 0.0 }
 0x128   : > { %v2009_v62 = vmax.f32 %v1881_v57, 0.0  ;;  %v2073_v0 = vmax.f32 %v1945_v58, 0.0 }
 0x129   : > { %v1259_v1 = vpop.f32.mrb[20].mxu0  ;;  %v1515_v2 = vpop.f32.mrb[20].mxu1 }
 0x12a   : > { %v3320_v3 = vpack.c.bf16 %v2009_v62, %v2008_v59  ;;  %v3480_v4 = vpack.c.bf16 %v2073_v0, %v2072_v60  ;;  %v1747_v5 = vmul.f32 %v4162_v61, %v1259_v1  ;;  %v1811_v6 = vmul.f32 %v4162_v61, %v1515_v2  ;;  %v1261_v7 = vpop.f32.mrb[21].mxu0  ;;  %v1517_v8 = vpop.f32.mrb[21].mxu1 }
 0x12b   : > { %v1262_v9 = vpop.f32.mrb[22].mxu0  ;;  %v1518_v10 = vpop.f32.mrb[22].mxu1 }
 0x12c   : > { %3620 = vst [vmem:[%s4189_s24 + $0x20] sm:$0xff] %v3320_v3   ;;  %3652 = vst [vmem:[%s4189_s24 + $0x120] sm:$0xff] %v3480_v4   ;;  %v1882_v11 = vadd.f32 %v4169_v63, %v1747_v5  ;;  %v1946_v12 = vadd.f32 %v4169_v63, %v1811_v6  ;;  %v1748_v13 = vmul.f32 %v4162_v61, %v1262_v9  ;;  %v1264_v15 = vpop.f32.mrb[23].mxu0  ;;  %v1520_v16 = vpop.f32.mrb[23].mxu1 }
 0x12d   : > { %v1812_v14 = vmul.f32 %v4162_v61, %v1518_v10 }
 0x12e   : > { %v1883_v17 = vadd.f32 %v4169_v63, %v1748_v13  ;;  %v2010_v19 = vmax.f32 %v1882_v11, 0.0  ;;  %v2074_v20 = vmax.f32 %v1946_v12, 0.0 }
 0x12f   : > { %v1947_v18 = vadd.f32 %v4169_v63, %v1812_v14 }
 0x130   : > { %v2011_v21 = vmax.f32 %v1883_v17, 0.0 }
 0x131   : > { %v2075_v22 = vmax.f32 %v1947_v18, 0.0  ;;  %v1267_v23 = vpop.f32.mrb[24].mxu0  ;;  %v1523_v24 = vpop.f32.mrb[24].mxu1 }
 0x132   : > { %v3325_v25 = vpack.c.bf16 %v2011_v21, %v2010_v19  ;;  %v1749_v27 = vmul.f32 %v4162_v61, %v1267_v23  ;;  %v1813_v28 = vmul.f32 %v4162_v61, %v1523_v24  ;;  %v1269_v29 = vpop.f32.mrb[25].mxu0  ;;  %v1525_v30 = vpop.f32.mrb[25].mxu1 }
 0x133   : > { %v3485_v26 = vpack.c.bf16 %v2075_v22, %v2074_v20  ;;  %v1270_v31 = vpop.f32.mrb[26].mxu0  ;;  %v1526_v32 = vpop.f32.mrb[26].mxu1 }
 0x134   : > { %3621 = vst [vmem:[%s4189_s24 + $0x28] sm:$0xff] %v3325_v25   ;;  %v1884_v33 = vadd.f32 %v4169_v63, %v1749_v27  ;;  %v1948_v34 = vadd.f32 %v4169_v63, %v1813_v28  ;;  %v1750_v35 = vmul.f32 %v4162_v61, %v1270_v31  ;;  %v1814_v36 = vmul.f32 %v4162_v61, %v1526_v32  ;;  %v1272_v37 = vpop.f32.mrb[27].mxu0  ;;  %v1528_v38 = vpop.f32.mrb[27].mxu1 }
 0x135   : > { %3653 = vst [vmem:[%s4189_s24 + $0x128] sm:$0xff] %v3485_v26  }
 0x136   : > { %v1885_v39 = vadd.f32 %v4169_v63, %v1750_v35  ;;  %v1949_v40 = vadd.f32 %v4169_v63, %v1814_v36  ;;  %v2012_v41 = vmax.f32 %v1884_v33, 0.0  ;;  %v2076_v42 = vmax.f32 %v1948_v34, 0.0 }
 0x138   : > { %v2013_v43 = vmax.f32 %v1885_v39, 0.0  ;;  %v2077_v44 = vmax.f32 %v1949_v40, 0.0 }
 0x139   : > { %v1275_v45 = vpop.f32.mrb[28].mxu0  ;;  %v1531_v46 = vpop.f32.mrb[28].mxu1 }
 0x13a   : > { %v3330_v47 = vpack.c.bf16 %v2013_v43, %v2012_v41  ;;  %v3490_v48 = vpack.c.bf16 %v2077_v44, %v2076_v42  ;;  %v1751_v49 = vmul.f32 %v4162_v61, %v1275_v45  ;;  %v1815_v50 = vmul.f32 %v4162_v61, %v1531_v46  ;;  %v1277_v51 = vpop.f32.mrb[29].mxu0  ;;  %v1533_v52 = vpop.f32.mrb[29].mxu1 }
 0x13b   : > { %v1278_v53 = vpop.f32.mrb[30].mxu0  ;;  %v1534_v54 = vpop.f32.mrb[30].mxu1 }
 0x13c   : > { %3622 = vst [vmem:[%s4189_s24 + $0x30] sm:$0xff] %v3330_v47   ;;  %3654 = vst [vmem:[%s4189_s24 + $0x130] sm:$0xff] %v3490_v48   ;;  %v1886_v55 = vadd.f32 %v4169_v63, %v1751_v49  ;;  %v1950_v56 = vadd.f32 %v4169_v63, %v1815_v50  ;;  %v1752_v57 = vmul.f32 %v4162_v61, %v1278_v53  ;;  %v1280_v59 = vpop.f32.mrb[31].mxu0  ;;  %v1536_v60 = vpop.f32.mrb[31].mxu1 }
 0x13d   : > { %v1816_v58 = vmul.f32 %v4162_v61, %v1534_v54 }
 0x13e   : > { %v1887_v62 = vadd.f32 %v4169_v63, %v1752_v57  ;;  %v2014_v1 = vmax.f32 %v1886_v55, 0.0  ;;  %v2078_v2 = vmax.f32 %v1950_v56, 0.0 }
 0x13f   : > { %v1951_v0 = vadd.f32 %v4169_v63, %v1816_v58 }
 0x140   : > { %v2015_v3 = vmax.f32 %v1887_v62, 0.0 }
 0x141   : > { %v2079_v4 = vmax.f32 %v1951_v0, 0.0  ;;  %v1283_v5 = vpop.f32.mrb[32].mxu0  ;;  %v1539_v6 = vpop.f32.mrb[32].mxu1 }
 0x142   : > { %v3335_v7 = vpack.c.bf16 %v2015_v3, %v2014_v1  ;;  %v1753_v9 = vmul.f32 %v4162_v61, %v1283_v5  ;;  %v1817_v10 = vmul.f32 %v4162_v61, %v1539_v6  ;;  %v1285_v11 = vpop.f32.mrb[33].mxu0  ;;  %v1541_v12 = vpop.f32.mrb[33].mxu1 }
 0x143   : > { %v3495_v8 = vpack.c.bf16 %v2079_v4, %v2078_v2  ;;  %v1286_v13 = vpop.f32.mrb[34].mxu0  ;;  %v1542_v14 = vpop.f32.mrb[34].mxu1 }
 0x144   : > { %3623 = vst [vmem:[%s4189_s24 + $0x38] sm:$0xff] %v3335_v7   ;;  %v1888_v15 = vadd.f32 %v4169_v63, %v1753_v9  ;;  %v1952_v16 = vadd.f32 %v4169_v63, %v1817_v10  ;;  %v1754_v17 = vmul.f32 %v4162_v61, %v1286_v13  ;;  %v1818_v18 = vmul.f32 %v4162_v61, %v1542_v14  ;;  %v1288_v19 = vpop.f32.mrb[35].mxu0  ;;  %v1544_v20 = vpop.f32.mrb[35].mxu1 }
 0x145   : > { %3655 = vst [vmem:[%s4189_s24 + $0x138] sm:$0xff] %v3495_v8  }
 0x146   : > { %v1889_v21 = vadd.f32 %v4169_v63, %v1754_v17  ;;  %v1953_v22 = vadd.f32 %v4169_v63, %v1818_v18  ;;  %v2016_v23 = vmax.f32 %v1888_v15, 0.0  ;;  %v2080_v24 = vmax.f32 %v1952_v16, 0.0 }
 0x148   : > { %v2017_v25 = vmax.f32 %v1889_v21, 0.0  ;;  %v2081_v26 = vmax.f32 %v1953_v22, 0.0 }
 0x149   : > { %v1291_v27 = vpop.f32.mrb[36].mxu0  ;;  %v1547_v28 = vpop.f32.mrb[36].mxu1 }
 0x14a   : > { %v3340_v29 = vpack.c.bf16 %v2017_v25, %v2016_v23  ;;  %v3500_v30 = vpack.c.bf16 %v2081_v26, %v2080_v24  ;;  %v1755_v31 = vmul.f32 %v4162_v61, %v1291_v27  ;;  %v1819_v32 = vmul.f32 %v4162_v61, %v1547_v28  ;;  %v1293_v33 = vpop.f32.mrb[37].mxu0  ;;  %v1549_v34 = vpop.f32.mrb[37].mxu1 }
 0x14b   : > { %v1294_v35 = vpop.f32.mrb[38].mxu0  ;;  %v1550_v36 = vpop.f32.mrb[38].mxu1 }
 0x14c   : > { %3624 = vst [vmem:[%s4189_s24 + $0x40] sm:$0xff] %v3340_v29   ;;  %3656 = vst [vmem:[%s4189_s24 + $0x140] sm:$0xff] %v3500_v30   ;;  %v1890_v37 = vadd.f32 %v4169_v63, %v1755_v31  ;;  %v1954_v38 = vadd.f32 %v4169_v63, %v1819_v32  ;;  %v1756_v39 = vmul.f32 %v4162_v61, %v1294_v35  ;;  %v1296_v41 = vpop.f32.mrb[39].mxu0  ;;  %v1552_v42 = vpop.f32.mrb[39].mxu1 }
 0x14d   : > { %v1820_v40 = vmul.f32 %v4162_v61, %v1550_v36 }
 0x14e   : > { %v1891_v43 = vadd.f32 %v4169_v63, %v1756_v39  ;;  %v2018_v45 = vmax.f32 %v1890_v37, 0.0  ;;  %v2082_v46 = vmax.f32 %v1954_v38, 0.0 }
 0x14f   : > { %v1955_v44 = vadd.f32 %v4169_v63, %v1820_v40 }
 0x150   : > { %v2019_v47 = vmax.f32 %v1891_v43, 0.0 }
 0x151   : > { %v2083_v48 = vmax.f32 %v1955_v44, 0.0  ;;  %v1299_v49 = vpop.f32.mrb[40].mxu0  ;;  %v1555_v50 = vpop.f32.mrb[40].mxu1 }
 0x152   : > { %v3345_v51 = vpack.c.bf16 %v2019_v47, %v2018_v45  ;;  %v1757_v53 = vmul.f32 %v4162_v61, %v1299_v49  ;;  %v1821_v54 = vmul.f32 %v4162_v61, %v1555_v50  ;;  %v1301_v55 = vpop.f32.mrb[41].mxu0  ;;  %v1557_v56 = vpop.f32.mrb[41].mxu1 }
 0x153   : > { %v3505_v52 = vpack.c.bf16 %v2083_v48, %v2082_v46  ;;  %v1302_v57 = vpop.f32.mrb[42].mxu0  ;;  %v1558_v58 = vpop.f32.mrb[42].mxu1 }
 0x154   : > { %3625 = vst [vmem:[%s4189_s24 + $0x48] sm:$0xff] %v3345_v51   ;;  %v1892_v59 = vadd.f32 %v4169_v63, %v1757_v53  ;;  %v1956_v60 = vadd.f32 %v4169_v63, %v1821_v54  ;;  %v1758_v62 = vmul.f32 %v4162_v61, %v1302_v57  ;;  %v1822_v0 = vmul.f32 %v4162_v61, %v1558_v58  ;;  %v1304_v1 = vpop.f32.mrb[43].mxu0  ;;  %v1560_v2 = vpop.f32.mrb[43].mxu1 }
 0x155   : > { %3657 = vst [vmem:[%s4189_s24 + $0x148] sm:$0xff] %v3505_v52  }
 0x156   : > { %v1893_v3 = vadd.f32 %v4169_v63, %v1758_v62  ;;  %v1957_v4 = vadd.f32 %v4169_v63, %v1822_v0  ;;  %v2020_v5 = vmax.f32 %v1892_v59, 0.0  ;;  %v2084_v6 = vmax.f32 %v1956_v60, 0.0 }
 0x158   : > { %v2021_v7 = vmax.f32 %v1893_v3, 0.0  ;;  %v2085_v8 = vmax.f32 %v1957_v4, 0.0 }
 0x159   : > { %v1307_v9 = vpop.f32.mrb[44].mxu0  ;;  %v1563_v10 = vpop.f32.mrb[44].mxu1 }
 0x15a   : > { %v3350_v11 = vpack.c.bf16 %v2021_v7, %v2020_v5  ;;  %v3510_v12 = vpack.c.bf16 %v2085_v8, %v2084_v6  ;;  %v1759_v13 = vmul.f32 %v4162_v61, %v1307_v9  ;;  %v1823_v14 = vmul.f32 %v4162_v61, %v1563_v10  ;;  %v1309_v15 = vpop.f32.mrb[45].mxu0  ;;  %v1565_v16 = vpop.f32.mrb[45].mxu1 }
 0x15b   : > { %v1310_v17 = vpop.f32.mrb[46].mxu0  ;;  %v1566_v18 = vpop.f32.mrb[46].mxu1 }
 0x15c   : > { %3626 = vst [vmem:[%s4189_s24 + $0x50] sm:$0xff] %v3350_v11   ;;  %3658 = vst [vmem:[%s4189_s24 + $0x150] sm:$0xff] %v3510_v12   ;;  %v1894_v19 = vadd.f32 %v4169_v63, %v1759_v13  ;;  %v1958_v20 = vadd.f32 %v4169_v63, %v1823_v14  ;;  %v1760_v21 = vmul.f32 %v4162_v61, %v1310_v17  ;;  %v1312_v23 = vpop.f32.mrb[47].mxu0  ;;  %v1568_v24 = vpop.f32.mrb[47].mxu1 }
 0x15d   : > { %v1824_v22 = vmul.f32 %v4162_v61, %v1566_v18 }
 0x15e   : > { %v1895_v25 = vadd.f32 %v4169_v63, %v1760_v21  ;;  %v2022_v27 = vmax.f32 %v1894_v19, 0.0  ;;  %v2086_v28 = vmax.f32 %v1958_v20, 0.0 }
 0x15f   : > { %v1959_v26 = vadd.f32 %v4169_v63, %v1824_v22 }
 0x160   : > { %v2023_v29 = vmax.f32 %v1895_v25, 0.0 }
 0x161   : > { %v2087_v30 = vmax.f32 %v1959_v26, 0.0  ;;  %v1315_v31 = vpop.f32.mrb[48].mxu0  ;;  %v1571_v32 = vpop.f32.mrb[48].mxu1 }
 0x162   : > { %v3355_v33 = vpack.c.bf16 %v2023_v29, %v2022_v27  ;;  %v1761_v35 = vmul.f32 %v4162_v61, %v1315_v31  ;;  %v1825_v36 = vmul.f32 %v4162_v61, %v1571_v32  ;;  %v1317_v37 = vpop.f32.mrb[49].mxu0  ;;  %v1573_v38 = vpop.f32.mrb[49].mxu1 }
 0x163   : > { %v3515_v34 = vpack.c.bf16 %v2087_v30, %v2086_v28  ;;  %v1318_v39 = vpop.f32.mrb[50].mxu0  ;;  %v1574_v40 = vpop.f32.mrb[50].mxu1 }
 0x164   : > { %3627 = vst [vmem:[%s4189_s24 + $0x58] sm:$0xff] %v3355_v33   ;;  %v1896_v41 = vadd.f32 %v4169_v63, %v1761_v35  ;;  %v1960_v42 = vadd.f32 %v4169_v63, %v1825_v36  ;;  %v1762_v43 = vmul.f32 %v4162_v61, %v1318_v39  ;;  %v1826_v44 = vmul.f32 %v4162_v61, %v1574_v40  ;;  %v1320_v45 = vpop.f32.mrb[51].mxu0  ;;  %v1576_v46 = vpop.f32.mrb[51].mxu1 }
 0x165   : > { %3659 = vst [vmem:[%s4189_s24 + $0x158] sm:$0xff] %v3515_v34  }
 0x166   : > { %v1897_v47 = vadd.f32 %v4169_v63, %v1762_v43  ;;  %v1961_v48 = vadd.f32 %v4169_v63, %v1826_v44  ;;  %v2024_v49 = vmax.f32 %v1896_v41, 0.0  ;;  %v2088_v50 = vmax.f32 %v1960_v42, 0.0 }
 0x168   : > { %v2025_v51 = vmax.f32 %v1897_v47, 0.0  ;;  %v2089_v52 = vmax.f32 %v1961_v48, 0.0 }
 0x169   : > { %v1323_v53 = vpop.f32.mrb[52].mxu0  ;;  %v1579_v54 = vpop.f32.mrb[52].mxu1 }
 0x16a   : > { %v3360_v55 = vpack.c.bf16 %v2025_v51, %v2024_v49  ;;  %v3520_v56 = vpack.c.bf16 %v2089_v52, %v2088_v50  ;;  %v1763_v57 = vmul.f32 %v4162_v61, %v1323_v53  ;;  %v1827_v58 = vmul.f32 %v4162_v61, %v1579_v54  ;;  %v1325_v59 = vpop.f32.mrb[53].mxu0  ;;  %v1581_v60 = vpop.f32.mrb[53].mxu1 }
 0x16b   : > { %v1326_v62 = vpop.f32.mrb[54].mxu0  ;;  %v1582_v0 = vpop.f32.mrb[54].mxu1 }
 0x16c   : > { %3628 = vst [vmem:[%s4189_s24 + $0x60] sm:$0xff] %v3360_v55   ;;  %3660 = vst [vmem:[%s4189_s24 + $0x160] sm:$0xff] %v3520_v56   ;;  %v1898_v1 = vadd.f32 %v4169_v63, %v1763_v57  ;;  %v1962_v2 = vadd.f32 %v4169_v63, %v1827_v58  ;;  %v1764_v3 = vmul.f32 %v4162_v61, %v1326_v62  ;;  %v1328_v5 = vpop.f32.mrb[55].mxu0  ;;  %v1584_v6 = vpop.f32.mrb[55].mxu1 }
 0x16d   : > { %v1828_v4 = vmul.f32 %v4162_v61, %v1582_v0 }
 0x16e   : > { %v1899_v7 = vadd.f32 %v4169_v63, %v1764_v3  ;;  %v2026_v9 = vmax.f32 %v1898_v1, 0.0  ;;  %v2090_v10 = vmax.f32 %v1962_v2, 0.0 }
 0x16f   : > { %v1963_v8 = vadd.f32 %v4169_v63, %v1828_v4 }
 0x170   : > { %v2027_v11 = vmax.f32 %v1899_v7, 0.0 }
 0x171   : > { %v2091_v12 = vmax.f32 %v1963_v8, 0.0  ;;  %v1331_v13 = vpop.f32.mrb[56].mxu0  ;;  %v1587_v14 = vpop.f32.mrb[56].mxu1 }
 0x172   : > { %v3365_v15 = vpack.c.bf16 %v2027_v11, %v2026_v9  ;;  %v1765_v17 = vmul.f32 %v4162_v61, %v1331_v13  ;;  %v1829_v18 = vmul.f32 %v4162_v61, %v1587_v14  ;;  %v1333_v19 = vpop.f32.mrb[57].mxu0  ;;  %v1589_v20 = vpop.f32.mrb[57].mxu1 }
 0x173   : > { %v3525_v16 = vpack.c.bf16 %v2091_v12, %v2090_v10  ;;  %v1334_v21 = vpop.f32.mrb[58].mxu0  ;;  %v1590_v22 = vpop.f32.mrb[58].mxu1 }
 0x174   : > { %3629 = vst [vmem:[%s4189_s24 + $0x68] sm:$0xff] %v3365_v15   ;;  %v1900_v23 = vadd.f32 %v4169_v63, %v1765_v17  ;;  %v1964_v24 = vadd.f32 %v4169_v63, %v1829_v18  ;;  %v1766_v25 = vmul.f32 %v4162_v61, %v1334_v21  ;;  %v1830_v26 = vmul.f32 %v4162_v61, %v1590_v22  ;;  %v1336_v27 = vpop.f32.mrb[59].mxu0  ;;  %v1592_v28 = vpop.f32.mrb[59].mxu1 }
 0x175   : > { %3661 = vst [vmem:[%s4189_s24 + $0x168] sm:$0xff] %v3525_v16  }
 0x176   : > { %v1901_v29 = vadd.f32 %v4169_v63, %v1766_v25  ;;  %v1965_v30 = vadd.f32 %v4169_v63, %v1830_v26  ;;  %v2028_v31 = vmax.f32 %v1900_v23, 0.0  ;;  %v2092_v32 = vmax.f32 %v1964_v24, 0.0 }
 0x178   : > { %v2029_v33 = vmax.f32 %v1901_v29, 0.0  ;;  %v2093_v34 = vmax.f32 %v1965_v30, 0.0 }
 0x179   : > { %v1339_v35 = vpop.f32.mrb[60].mxu0  ;;  %v1595_v36 = vpop.f32.mrb[60].mxu1 }
 0x17a   : > { %v3370_v37 = vpack.c.bf16 %v2029_v33, %v2028_v31  ;;  %v3530_v38 = vpack.c.bf16 %v2093_v34, %v2092_v32  ;;  %v1767_v39 = vmul.f32 %v4162_v61, %v1339_v35  ;;  %v1831_v40 = vmul.f32 %v4162_v61, %v1595_v36  ;;  %v1341_v41 = vpop.f32.mrb[61].mxu0  ;;  %v1597_v42 = vpop.f32.mrb[61].mxu1 }
 0x17b   : > { %v1342_v43 = vpop.f32.mrb[62].mxu0  ;;  %v1598_v44 = vpop.f32.mrb[62].mxu1 }
 0x17c   : > { %3630 = vst [vmem:[%s4189_s24 + $0x70] sm:$0xff] %v3370_v37   ;;  %3662 = vst [vmem:[%s4189_s24 + $0x170] sm:$0xff] %v3530_v38   ;;  %v1902_v45 = vadd.f32 %v4169_v63, %v1767_v39  ;;  %v1966_v46 = vadd.f32 %v4169_v63, %v1831_v40  ;;  %v1768_v47 = vmul.f32 %v4162_v61, %v1342_v43  ;;  %v1344_v49 = vpop.f32.mrb[63].mxu0  ;;  %v1600_v50 = vpop.f32.mrb[63].mxu1 }
 0x17d   : > { %v1832_v48 = vmul.f32 %v4162_v61, %v1598_v44 }
 0x17e   : > { %v1903_v51 = vadd.f32 %v4169_v63, %v1768_v47  ;;  %v2030_v53 = vmax.f32 %v1902_v45, 0.0  ;;  %v2094_v54 = vmax.f32 %v1966_v46, 0.0 }
 0x17f   : > { %v1967_v52 = vadd.f32 %v4169_v63, %v1832_v48 }
 0x180   : > { %v2031_v55 = vmax.f32 %v1903_v51, 0.0 }
 0x181   : > { %v2095_v56 = vmax.f32 %v1967_v52, 0.0  ;;  %v1347_v57 = vpop.f32.mrb[64].mxu0  ;;  %v1603_v58 = vpop.f32.mrb[64].mxu1 }
 0x182   : > { %v3375_v59 = vpack.c.bf16 %v2031_v55, %v2030_v53  ;;  %v1769_v62 = vmul.f32 %v4162_v61, %v1347_v57  ;;  %v1833_v0 = vmul.f32 %v4162_v61, %v1603_v58  ;;  %v1349_v1 = vpop.f32.mrb[65].mxu0  ;;  %v1605_v2 = vpop.f32.mrb[65].mxu1 }
 0x183   : > { %v3535_v60 = vpack.c.bf16 %v2095_v56, %v2094_v54  ;;  %v1350_v3 = vpop.f32.mrb[66].mxu0  ;;  %v1606_v4 = vpop.f32.mrb[66].mxu1 }
 0x184   : > { %3631 = vst [vmem:[%s4189_s24 + $0x78] sm:$0xff] %v3375_v59   ;;  %v1904_v5 = vadd.f32 %v4169_v63, %v1769_v62  ;;  %v1968_v6 = vadd.f32 %v4169_v63, %v1833_v0  ;;  %v1770_v7 = vmul.f32 %v4162_v61, %v1350_v3  ;;  %v1834_v8 = vmul.f32 %v4162_v61, %v1606_v4  ;;  %v1352_v9 = vpop.f32.mrb[67].mxu0  ;;  %v1608_v10 = vpop.f32.mrb[67].mxu1 }
 0x185   : > { %3663 = vst [vmem:[%s4189_s24 + $0x178] sm:$0xff] %v3535_v60  }
 0x186   : > { %v1905_v11 = vadd.f32 %v4169_v63, %v1770_v7  ;;  %v1969_v12 = vadd.f32 %v4169_v63, %v1834_v8  ;;  %v2032_v13 = vmax.f32 %v1904_v5, 0.0  ;;  %v2096_v14 = vmax.f32 %v1968_v6, 0.0 }
 0x188   : > { %v2033_v15 = vmax.f32 %v1905_v11, 0.0  ;;  %v2097_v16 = vmax.f32 %v1969_v12, 0.0 }
 0x189   : > { %v1355_v17 = vpop.f32.mrb[68].mxu0  ;;  %v1611_v18 = vpop.f32.mrb[68].mxu1 }
 0x18a   : > { %v3380_v19 = vpack.c.bf16 %v2033_v15, %v2032_v13  ;;  %v3540_v20 = vpack.c.bf16 %v2097_v16, %v2096_v14  ;;  %v1771_v21 = vmul.f32 %v4162_v61, %v1355_v17  ;;  %v1835_v22 = vmul.f32 %v4162_v61, %v1611_v18  ;;  %v1357_v23 = vpop.f32.mrb[69].mxu0  ;;  %v1613_v24 = vpop.f32.mrb[69].mxu1 }
 0x18b   : > { %v1358_v25 = vpop.f32.mrb[70].mxu0  ;;  %v1614_v26 = vpop.f32.mrb[70].mxu1 }
 0x18c   : > { %3632 = vst [vmem:[%s4189_s24 + $0x80] sm:$0xff] %v3380_v19   ;;  %3664 = vst [vmem:[%s4189_s24 + $0x180] sm:$0xff] %v3540_v20   ;;  %v1906_v27 = vadd.f32 %v4169_v63, %v1771_v21  ;;  %v1970_v28 = vadd.f32 %v4169_v63, %v1835_v22  ;;  %v1772_v29 = vmul.f32 %v4162_v61, %v1358_v25  ;;  %v1360_v31 = vpop.f32.mrb[71].mxu0  ;;  %v1616_v32 = vpop.f32.mrb[71].mxu1 }
 0x18d   : > { %v1836_v30 = vmul.f32 %v4162_v61, %v1614_v26 }
 0x18e   : > { %v1907_v33 = vadd.f32 %v4169_v63, %v1772_v29  ;;  %v2034_v35 = vmax.f32 %v1906_v27, 0.0  ;;  %v2098_v36 = vmax.f32 %v1970_v28, 0.0 }
 0x18f   : > { %v1971_v34 = vadd.f32 %v4169_v63, %v1836_v30  ;;  %v4413_v30 = vld [vmem:[%s4539_s3] ss:$0 sm:$0xff] }
 0x190   : > { %v2035_v37 = vmax.f32 %v1907_v33, 0.0 }
 0x191   : > { %v2099_v38 = vmax.f32 %v1971_v34, 0.0  ;;  %v1363_v39 = vpop.f32.mrb[72].mxu0  ;;  %v1619_v40 = vpop.f32.mrb[72].mxu1 }
 0x192   : > { %v3385_v41 = vpack.c.bf16 %v2035_v37, %v2034_v35  ;;  %v1773_v43 = vmul.f32 %v4162_v61, %v1363_v39  ;;  %v1837_v44 = vmul.f32 %v4162_v61, %v1619_v40  ;;  %v1365_v45 = vpop.f32.mrb[73].mxu0  ;;  %v1621_v46 = vpop.f32.mrb[73].mxu1 }
 0x193   : > { %v3545_v42 = vpack.c.bf16 %v2099_v38, %v2098_v36  ;;  %v1366_v47 = vpop.f32.mrb[74].mxu0  ;;  %v1622_v48 = vpop.f32.mrb[74].mxu1 }
 0x194   : > { %3633 = vst [vmem:[%s4189_s24 + $0x88] sm:$0xff] %v3385_v41   ;;  %v1908_v49 = vadd.f32 %v4169_v63, %v1773_v43  ;;  %v1972_v50 = vadd.f32 %v4169_v63, %v1837_v44  ;;  %v1774_v51 = vmul.f32 %v4162_v61, %v1366_v47  ;;  %v1838_v52 = vmul.f32 %v4162_v61, %v1622_v48  ;;  %v1368_v53 = vpop.f32.mrb[75].mxu0  ;;  %v1624_v54 = vpop.f32.mrb[75].mxu1 }
 0x195   : > { %3665 = vst [vmem:[%s4189_s24 + $0x188] sm:$0xff] %v3545_v42  }
 0x196   : > { %v1909_v55 = vadd.f32 %v4169_v63, %v1774_v51  ;;  %v1973_v56 = vadd.f32 %v4169_v63, %v1838_v52  ;;  %v2036_v57 = vmax.f32 %v1908_v49, 0.0  ;;  %v2100_v58 = vmax.f32 %v1972_v50, 0.0 }
 0x198   : > { %v2037_v59 = vmax.f32 %v1909_v55, 0.0  ;;  %v2101_v60 = vmax.f32 %v1973_v56, 0.0 }
 0x199   : > { %v1371_v62 = vpop.f32.mrb[76].mxu0  ;;  %v1627_v0 = vpop.f32.mrb[76].mxu1 }
 0x19a   : > { %v3390_v1 = vpack.c.bf16 %v2037_v59, %v2036_v57  ;;  %v3550_v2 = vpack.c.bf16 %v2101_v60, %v2100_v58  ;;  %v1775_v3 = vmul.f32 %v4162_v61, %v1371_v62  ;;  %v1839_v4 = vmul.f32 %v4162_v61, %v1627_v0  ;;  %v1373_v5 = vpop.f32.mrb[77].mxu0  ;;  %v1629_v6 = vpop.f32.mrb[77].mxu1 }
 0x19b   : > { %v1374_v7 = vpop.f32.mrb[78].mxu0  ;;  %v1630_v8 = vpop.f32.mrb[78].mxu1 }
 0x19c   : > { %3634 = vst [vmem:[%s4189_s24 + $0x90] sm:$0xff] %v3390_v1   ;;  %3666 = vst [vmem:[%s4189_s24 + $0x190] sm:$0xff] %v3550_v2   ;;  %v1910_v9 = vadd.f32 %v4169_v63, %v1775_v3  ;;  %v1974_v10 = vadd.f32 %v4169_v63, %v1839_v4  ;;  %v1776_v11 = vmul.f32 %v4162_v61, %v1374_v7  ;;  %v1376_v13 = vpop.f32.mrb[79].mxu0  ;;  %v1632_v14 = vpop.f32.mrb[79].mxu1 }
 0x19d   : > { %v1840_v12 = vmul.f32 %v4162_v61, %v1630_v8  ;;  %v4404_v61 = vld [vmem:[%s4538_s2] ss:$0 sm:$0xff] }
 0x19e   : > { %v1911_v15 = vadd.f32 %v4169_v63, %v1776_v11  ;;  %v2038_v17 = vmax.f32 %v1910_v9, 0.0  ;;  %v2102_v18 = vmax.f32 %v1974_v10, 0.0 }
 0x19f   : > { %v1975_v16 = vadd.f32 %v4169_v63, %v1840_v12 }
 0x1a0   : > { %v2039_v19 = vmax.f32 %v1911_v15, 0.0 }
 0x1a1   : > { %v2103_v20 = vmax.f32 %v1975_v16, 0.0  ;;  %v1379_v21 = vpop.f32.mrb[80].mxu0  ;;  %v1635_v22 = vpop.f32.mrb[80].mxu1 }
 0x1a2   : > { %v3395_v23 = vpack.c.bf16 %v2039_v19, %v2038_v17  ;;  %v1777_v25 = vmul.f32 %v4404_v61, %v1379_v21  ;;  %v1841_v26 = vmul.f32 %v4404_v61, %v1635_v22  ;;  %v1381_v63 = vpop.f32.mrb[81].mxu0  ;;  %v1637_v27 = vpop.f32.mrb[81].mxu1 }
 0x1a3   : > { %v3555_v24 = vpack.c.bf16 %v2103_v20, %v2102_v18  ;;  %v1382_v28 = vpop.f32.mrb[82].mxu0  ;;  %v1638_v29 = vpop.f32.mrb[82].mxu1 }
 0x1a4   : > { %3635 = vst [vmem:[%s4189_s24 + $0x98] sm:$0xff] %v3395_v23   ;;  %v1912_v31 = vadd.f32 %v4413_v30, %v1777_v25  ;;  %v1976_v32 = vadd.f32 %v4413_v30, %v1841_v26  ;;  %v1778_v33 = vmul.f32 %v4404_v61, %v1382_v28  ;;  %v1842_v34 = vmul.f32 %v4404_v61, %v1638_v29  ;;  %v1384_v35 = vpop.f32.mrb[83].mxu0  ;;  %v1640_v36 = vpop.f32.mrb[83].mxu1 }
 0x1a5   : > { %3667 = vst [vmem:[%s4189_s24 + $0x198] sm:$0xff] %v3555_v24  }
 0x1a6   : > { %v1913_v37 = vadd.f32 %v4413_v30, %v1778_v33  ;;  %v1977_v38 = vadd.f32 %v4413_v30, %v1842_v34  ;;  %v2040_v39 = vmax.f32 %v1912_v31, 0.0  ;;  %v2104_v40 = vmax.f32 %v1976_v32, 0.0 }
 0x1a8   : > { %v2041_v41 = vmax.f32 %v1913_v37, 0.0  ;;  %v2105_v42 = vmax.f32 %v1977_v38, 0.0 }
 0x1a9   : > { %v1387_v43 = vpop.f32.mrb[84].mxu0  ;;  %v1643_v44 = vpop.f32.mrb[84].mxu1 }
 0x1aa   : > { %v3400_v45 = vpack.c.bf16 %v2041_v41, %v2040_v39  ;;  %v3560_v46 = vpack.c.bf16 %v2105_v42, %v2104_v40  ;;  %v1779_v47 = vmul.f32 %v4404_v61, %v1387_v43  ;;  %v1843_v48 = vmul.f32 %v4404_v61, %v1643_v44  ;;  %v1389_v49 = vpop.f32.mrb[85].mxu0  ;;  %v1645_v50 = vpop.f32.mrb[85].mxu1 }
 0x1ab   : > { %v1390_v51 = vpop.f32.mrb[86].mxu0  ;;  %v1646_v52 = vpop.f32.mrb[86].mxu1 }
 0x1ac   : > { %3636 = vst [vmem:[%s4189_s24 + $0xa0] sm:$0xff] %v3400_v45   ;;  %3668 = vst [vmem:[%s4189_s24 + $0x1a0] sm:$0xff] %v3560_v46   ;;  %v1914_v53 = vadd.f32 %v4413_v30, %v1779_v47  ;;  %v1978_v54 = vadd.f32 %v4413_v30, %v1843_v48  ;;  %v1780_v55 = vmul.f32 %v4404_v61, %v1390_v51  ;;  %v1392_v57 = vpop.f32.mrb[87].mxu0  ;;  %v1648_v58 = vpop.f32.mrb[87].mxu1 }
 0x1ad   : > { %v1844_v56 = vmul.f32 %v4404_v61, %v1646_v52 }
 0x1ae   : > { %v1915_v59 = vadd.f32 %v4413_v30, %v1780_v55  ;;  %v2042_v62 = vmax.f32 %v1914_v53, 0.0  ;;  %v2106_v0 = vmax.f32 %v1978_v54, 0.0 }
 0x1af   : > { %v1979_v60 = vadd.f32 %v4413_v30, %v1844_v56 }
 0x1b0   : > { %v2043_v1 = vmax.f32 %v1915_v59, 0.0 }
 0x1b1   : > { %v2107_v2 = vmax.f32 %v1979_v60, 0.0  ;;  %v1395_v3 = vpop.f32.mrb[88].mxu0  ;;  %v1651_v4 = vpop.f32.mrb[88].mxu1 }
 0x1b2   : > { %v3405_v5 = vpack.c.bf16 %v2043_v1, %v2042_v62  ;;  %v1781_v7 = vmul.f32 %v4404_v61, %v1395_v3  ;;  %v1845_v8 = vmul.f32 %v4404_v61, %v1651_v4  ;;  %v1397_v9 = vpop.f32.mrb[89].mxu0  ;;  %v1653_v10 = vpop.f32.mrb[89].mxu1 }
 0x1b3   : > { %v3565_v6 = vpack.c.bf16 %v2107_v2, %v2106_v0  ;;  %v1398_v11 = vpop.f32.mrb[90].mxu0  ;;  %v1654_v12 = vpop.f32.mrb[90].mxu1 }
 0x1b4   : > { %3637 = vst [vmem:[%s4189_s24 + $0xa8] sm:$0xff] %v3405_v5   ;;  %v1916_v13 = vadd.f32 %v4413_v30, %v1781_v7  ;;  %v1980_v14 = vadd.f32 %v4413_v30, %v1845_v8  ;;  %v1782_v15 = vmul.f32 %v4404_v61, %v1398_v11  ;;  %v1846_v16 = vmul.f32 %v4404_v61, %v1654_v12  ;;  %v1400_v17 = vpop.f32.mrb[91].mxu0  ;;  %v1656_v18 = vpop.f32.mrb[91].mxu1 }
 0x1b5   : > { %3669 = vst [vmem:[%s4189_s24 + $0x1a8] sm:$0xff] %v3565_v6  }
 0x1b6   : > { %v1917_v19 = vadd.f32 %v4413_v30, %v1782_v15  ;;  %v1981_v20 = vadd.f32 %v4413_v30, %v1846_v16  ;;  %v2044_v21 = vmax.f32 %v1916_v13, 0.0  ;;  %v2108_v22 = vmax.f32 %v1980_v14, 0.0 }
 0x1b8   : > { %v2045_v23 = vmax.f32 %v1917_v19, 0.0  ;;  %v2109_v24 = vmax.f32 %v1981_v20, 0.0 }
 0x1b9   : > { %v1403_v25 = vpop.f32.mrb[92].mxu0  ;;  %v1659_v26 = vpop.f32.mrb[92].mxu1 }
 0x1ba   : > { %v3410_v63 = vpack.c.bf16 %v2045_v23, %v2044_v21  ;;  %v3570_v27 = vpack.c.bf16 %v2109_v24, %v2108_v22  ;;  %v1783_v28 = vmul.f32 %v4404_v61, %v1403_v25  ;;  %v1847_v29 = vmul.f32 %v4404_v61, %v1659_v26  ;;  %v1405_v31 = vpop.f32.mrb[93].mxu0  ;;  %v1661_v32 = vpop.f32.mrb[93].mxu1 }
 0x1bb   : > { %v1406_v33 = vpop.f32.mrb[94].mxu0  ;;  %v1662_v34 = vpop.f32.mrb[94].mxu1 }
 0x1bc   : > { %3638 = vst [vmem:[%s4189_s24 + $0xb0] sm:$0xff] %v3410_v63   ;;  %3670 = vst [vmem:[%s4189_s24 + $0x1b0] sm:$0xff] %v3570_v27   ;;  %v1918_v35 = vadd.f32 %v4413_v30, %v1783_v28  ;;  %v1982_v36 = vadd.f32 %v4413_v30, %v1847_v29  ;;  %v1784_v37 = vmul.f32 %v4404_v61, %v1406_v33  ;;  %v1408_v39 = vpop.f32.mrb[95].mxu0  ;;  %v1664_v40 = vpop.f32.mrb[95].mxu1 }
 0x1bd   : > { %v1848_v38 = vmul.f32 %v4404_v61, %v1662_v34 }
 0x1be   : > { %v1919_v41 = vadd.f32 %v4413_v30, %v1784_v37  ;;  %v2046_v43 = vmax.f32 %v1918_v35, 0.0  ;;  %v2110_v44 = vmax.f32 %v1982_v36, 0.0 }
 0x1bf   : > { %v1983_v42 = vadd.f32 %v4413_v30, %v1848_v38 }
 0x1c0   : > { %v2047_v45 = vmax.f32 %v1919_v41, 0.0 }
 0x1c1   : > { %v2111_v46 = vmax.f32 %v1983_v42, 0.0  ;;  %v1411_v47 = vpop.f32.mrb[96].mxu0  ;;  %v1667_v48 = vpop.f32.mrb[96].mxu1 }
 0x1c2   : > { %v3415_v49 = vpack.c.bf16 %v2047_v45, %v2046_v43  ;;  %v1785_v51 = vmul.f32 %v4404_v61, %v1411_v47  ;;  %v1849_v52 = vmul.f32 %v4404_v61, %v1667_v48  ;;  %v1413_v53 = vpop.f32.mrb[97].mxu0  ;;  %v1669_v54 = vpop.f32.mrb[97].mxu1 }
 0x1c3   : > { %v3575_v50 = vpack.c.bf16 %v2111_v46, %v2110_v44  ;;  %v1414_v55 = vpop.f32.mrb[98].mxu0  ;;  %v1670_v56 = vpop.f32.mrb[98].mxu1 }
 0x1c4   : > { %3639 = vst [vmem:[%s4189_s24 + $0xb8] sm:$0xff] %v3415_v49   ;;  %v1920_v57 = vadd.f32 %v4413_v30, %v1785_v51  ;;  %v1984_v58 = vadd.f32 %v4413_v30, %v1849_v52  ;;  %v1786_v59 = vmul.f32 %v4404_v61, %v1414_v55  ;;  %v1850_v60 = vmul.f32 %v4404_v61, %v1670_v56  ;;  %v1416_v62 = vpop.f32.mrb[99].mxu0  ;;  %v1672_v0 = vpop.f32.mrb[99].mxu1 }
 0x1c5   : > { %3671 = vst [vmem:[%s4189_s24 + $0x1b8] sm:$0xff] %v3575_v50  }
 0x1c6   : > { %v1921_v1 = vadd.f32 %v4413_v30, %v1786_v59  ;;  %v1985_v2 = vadd.f32 %v4413_v30, %v1850_v60  ;;  %v2048_v3 = vmax.f32 %v1920_v57, 0.0  ;;  %v2112_v4 = vmax.f32 %v1984_v58, 0.0 }
 0x1c8   : > { %v2049_v5 = vmax.f32 %v1921_v1, 0.0  ;;  %v2113_v6 = vmax.f32 %v1985_v2, 0.0 }
 0x1c9   : > { %v1419_v7 = vpop.f32.mrb[100].mxu0  ;;  %v1675_v8 = vpop.f32.mrb[100].mxu1 }
 0x1ca   : > { %v3420_v9 = vpack.c.bf16 %v2049_v5, %v2048_v3  ;;  %v3580_v10 = vpack.c.bf16 %v2113_v6, %v2112_v4  ;;  %v1787_v11 = vmul.f32 %v4404_v61, %v1419_v7  ;;  %v1851_v12 = vmul.f32 %v4404_v61, %v1675_v8  ;;  %v1421_v13 = vpop.f32.mrb[101].mxu0  ;;  %v1677_v14 = vpop.f32.mrb[101].mxu1 }
 0x1cb   : > { %v1422_v15 = vpop.f32.mrb[102].mxu0  ;;  %v1678_v16 = vpop.f32.mrb[102].mxu1 }
 0x1cc   : > { %3640 = vst [vmem:[%s4189_s24 + $0xc0] sm:$0xff] %v3420_v9   ;;  %3672 = vst [vmem:[%s4189_s24 + $0x1c0] sm:$0xff] %v3580_v10   ;;  %v1922_v17 = vadd.f32 %v4413_v30, %v1787_v11  ;;  %v1986_v18 = vadd.f32 %v4413_v30, %v1851_v12  ;;  %v1788_v19 = vmul.f32 %v4404_v61, %v1422_v15  ;;  %v1424_v21 = vpop.f32.mrb[103].mxu0  ;;  %v1680_v22 = vpop.f32.mrb[103].mxu1 }
 0x1cd   : > { %v1852_v20 = vmul.f32 %v4404_v61, %v1678_v16 }
 0x1ce   : > { %v1923_v23 = vadd.f32 %v4413_v30, %v1788_v19  ;;  %v2050_v25 = vmax.f32 %v1922_v17, 0.0  ;;  %v2114_v26 = vmax.f32 %v1986_v18, 0.0 }
 0x1cf   : > { %v1987_v24 = vadd.f32 %v4413_v30, %v1852_v20 }
 0x1d0   : > { %v2051_v63 = vmax.f32 %v1923_v23, 0.0 }
 0x1d1   : > { %v2115_v27 = vmax.f32 %v1987_v24, 0.0  ;;  %v1427_v28 = vpop.f32.mrb[104].mxu0  ;;  %v1683_v29 = vpop.f32.mrb[104].mxu1 }
 0x1d2   : > { %v3425_v31 = vpack.c.bf16 %v2051_v63, %v2050_v25  ;;  %v1789_v33 = vmul.f32 %v4404_v61, %v1427_v28  ;;  %v1853_v34 = vmul.f32 %v4404_v61, %v1683_v29  ;;  %v1429_v35 = vpop.f32.mrb[105].mxu0  ;;  %v1685_v36 = vpop.f32.mrb[105].mxu1 }
 0x1d3   : > { %v3585_v32 = vpack.c.bf16 %v2115_v27, %v2114_v26  ;;  %v1430_v37 = vpop.f32.mrb[106].mxu0  ;;  %v1686_v38 = vpop.f32.mrb[106].mxu1 }
 0x1d4   : > { %3641 = vst [vmem:[%s4189_s24 + $0xc8] sm:$0xff] %v3425_v31   ;;  %v1924_v39 = vadd.f32 %v4413_v30, %v1789_v33  ;;  %v1988_v40 = vadd.f32 %v4413_v30, %v1853_v34  ;;  %v1790_v41 = vmul.f32 %v4404_v61, %v1430_v37  ;;  %v1854_v42 = vmul.f32 %v4404_v61, %v1686_v38  ;;  %v1432_v43 = vpop.f32.mrb[107].mxu0  ;;  %v1688_v44 = vpop.f32.mrb[107].mxu1 }
 0x1d5   : > { %3673 = vst [vmem:[%s4189_s24 + $0x1c8] sm:$0xff] %v3585_v32  }
 0x1d6   : > { %v1925_v45 = vadd.f32 %v4413_v30, %v1790_v41  ;;  %v1989_v46 = vadd.f32 %v4413_v30, %v1854_v42  ;;  %v2052_v47 = vmax.f32 %v1924_v39, 0.0  ;;  %v2116_v48 = vmax.f32 %v1988_v40, 0.0 }
 0x1d8   : > { %v2053_v49 = vmax.f32 %v1925_v45, 0.0  ;;  %v2117_v50 = vmax.f32 %v1989_v46, 0.0 }
 0x1d9   : > { %v1435_v51 = vpop.f32.mrb[108].mxu0  ;;  %v1691_v52 = vpop.f32.mrb[108].mxu1 }
 0x1da   : > { %v3430_v53 = vpack.c.bf16 %v2053_v49, %v2052_v47  ;;  %v3590_v54 = vpack.c.bf16 %v2117_v50, %v2116_v48  ;;  %v1791_v55 = vmul.f32 %v4404_v61, %v1435_v51  ;;  %v1855_v56 = vmul.f32 %v4404_v61, %v1691_v52  ;;  %v1437_v57 = vpop.f32.mrb[109].mxu0  ;;  %v1693_v58 = vpop.f32.mrb[109].mxu1 }
 0x1db   : > { %v1438_v59 = vpop.f32.mrb[110].mxu0  ;;  %v1694_v60 = vpop.f32.mrb[110].mxu1 }
 0x1dc   : > { %3642 = vst [vmem:[%s4189_s24 + $0xd0] sm:$0xff] %v3430_v53   ;;  %3674 = vst [vmem:[%s4189_s24 + $0x1d0] sm:$0xff] %v3590_v54   ;;  %v1926_v62 = vadd.f32 %v4413_v30, %v1791_v55  ;;  %v1990_v0 = vadd.f32 %v4413_v30, %v1855_v56  ;;  %v1792_v1 = vmul.f32 %v4404_v61, %v1438_v59  ;;  %v1440_v3 = vpop.f32.mrb[111].mxu0  ;;  %v1696_v4 = vpop.f32.mrb[111].mxu1 }
 0x1dd   : > { %v1856_v2 = vmul.f32 %v4404_v61, %v1694_v60 }
 0x1de   : > { %v1927_v5 = vadd.f32 %v4413_v30, %v1792_v1  ;;  %v2054_v7 = vmax.f32 %v1926_v62, 0.0  ;;  %v2118_v8 = vmax.f32 %v1990_v0, 0.0 }
 0x1df   : > { %v1991_v6 = vadd.f32 %v4413_v30, %v1856_v2 }
 0x1e0   : > { %v2055_v9 = vmax.f32 %v1927_v5, 0.0 }
 0x1e1   : > { %v2119_v10 = vmax.f32 %v1991_v6, 0.0  ;;  %v1443_v11 = vpop.f32.mrb[112].mxu0  ;;  %v1699_v12 = vpop.f32.mrb[112].mxu1 }
 0x1e2   : > { %v3435_v13 = vpack.c.bf16 %v2055_v9, %v2054_v7  ;;  %v1793_v15 = vmul.f32 %v4404_v61, %v1443_v11  ;;  %v1857_v16 = vmul.f32 %v4404_v61, %v1699_v12  ;;  %v1445_v17 = vpop.f32.mrb[113].mxu0  ;;  %v1701_v18 = vpop.f32.mrb[113].mxu1 }
 0x1e3   : > { %v3595_v14 = vpack.c.bf16 %v2119_v10, %v2118_v8  ;;  %v1446_v19 = vpop.f32.mrb[114].mxu0  ;;  %v1702_v20 = vpop.f32.mrb[114].mxu1 }
 0x1e4   : > { %3643 = vst [vmem:[%s4189_s24 + $0xd8] sm:$0xff] %v3435_v13   ;;  %v1928_v21 = vadd.f32 %v4413_v30, %v1793_v15  ;;  %v1992_v22 = vadd.f32 %v4413_v30, %v1857_v16  ;;  %v1794_v23 = vmul.f32 %v4404_v61, %v1446_v19  ;;  %v1858_v24 = vmul.f32 %v4404_v61, %v1702_v20  ;;  %v1448_v25 = vpop.f32.mrb[115].mxu0  ;;  %v1704_v26 = vpop.f32.mrb[115].mxu1 }
 0x1e5   : > { %3675 = vst [vmem:[%s4189_s24 + $0x1d8] sm:$0xff] %v3595_v14  }
 0x1e6   : > { %v1929_v63 = vadd.f32 %v4413_v30, %v1794_v23  ;;  %v1993_v27 = vadd.f32 %v4413_v30, %v1858_v24  ;;  %v2056_v28 = vmax.f32 %v1928_v21, 0.0  ;;  %v2120_v29 = vmax.f32 %v1992_v22, 0.0 }
 0x1e8   : > { %v2057_v31 = vmax.f32 %v1929_v63, 0.0  ;;  %v2121_v32 = vmax.f32 %v1993_v27, 0.0 }
 0x1e9   : > { %v1451_v33 = vpop.f32.mrb[116].mxu0  ;;  %v1707_v34 = vpop.f32.mrb[116].mxu1 }
 0x1ea   : > { %v3440_v35 = vpack.c.bf16 %v2057_v31, %v2056_v28  ;;  %v3600_v36 = vpack.c.bf16 %v2121_v32, %v2120_v29  ;;  %v1795_v37 = vmul.f32 %v4404_v61, %v1451_v33  ;;  %v1859_v38 = vmul.f32 %v4404_v61, %v1707_v34  ;;  %v1453_v39 = vpop.f32.mrb[117].mxu0  ;;  %v1709_v40 = vpop.f32.mrb[117].mxu1 }
 0x1eb   : > { %v1454_v41 = vpop.f32.mrb[118].mxu0  ;;  %v1710_v42 = vpop.f32.mrb[118].mxu1 }
 0x1ec   : > { %3644 = vst [vmem:[%s4189_s24 + $0xe0] sm:$0xff] %v3440_v35   ;;  %3676 = vst [vmem:[%s4189_s24 + $0x1e0] sm:$0xff] %v3600_v36   ;;  %v1930_v43 = vadd.f32 %v4413_v30, %v1795_v37  ;;  %v1994_v44 = vadd.f32 %v4413_v30, %v1859_v38  ;;  %v1796_v45 = vmul.f32 %v4404_v61, %v1454_v41  ;;  %v1456_v47 = vpop.f32.mrb[119].mxu0  ;;  %v1712_v48 = vpop.f32.mrb[119].mxu1 }
 0x1ed   : > { %v1860_v46 = vmul.f32 %v4404_v61, %v1710_v42 }
 0x1ee   : > { %v1931_v49 = vadd.f32 %v4413_v30, %v1796_v45  ;;  %v2058_v51 = vmax.f32 %v1930_v43, 0.0  ;;  %v2122_v52 = vmax.f32 %v1994_v44, 0.0 }
 0x1ef   : > { %v1995_v50 = vadd.f32 %v4413_v30, %v1860_v46 }
 0x1f0   : > { %v2059_v53 = vmax.f32 %v1931_v49, 0.0 }
 0x1f1   : > { %v2123_v54 = vmax.f32 %v1995_v50, 0.0  ;;  %v1459_v55 = vpop.f32.mrb[120].mxu0  ;;  %v1715_v56 = vpop.f32.mrb[120].mxu1 }
 0x1f2   : > { %v3445_v57 = vpack.c.bf16 %v2059_v53, %v2058_v51  ;;  %v1797_v59 = vmul.f32 %v4404_v61, %v1459_v55  ;;  %v1861_v60 = vmul.f32 %v4404_v61, %v1715_v56  ;;  %v1461_v62 = vpop.f32.mrb[121].mxu0  ;;  %v1717_v0 = vpop.f32.mrb[121].mxu1 }
 0x1f3   : > { %v3605_v58 = vpack.c.bf16 %v2123_v54, %v2122_v52  ;;  %v1462_v1 = vpop.f32.mrb[122].mxu0  ;;  %v1718_v2 = vpop.f32.mrb[122].mxu1 }
 0x1f4   : > { %3645 = vst [vmem:[%s4189_s24 + $0xe8] sm:$0xff] %v3445_v57   ;;  %v1932_v3 = vadd.f32 %v4413_v30, %v1797_v59  ;;  %v1996_v4 = vadd.f32 %v4413_v30, %v1861_v60  ;;  %v1798_v5 = vmul.f32 %v4404_v61, %v1462_v1  ;;  %v1862_v6 = vmul.f32 %v4404_v61, %v1718_v2  ;;  %v1464_v7 = vpop.f32.mrb[123].mxu0  ;;  %v1720_v8 = vpop.f32.mrb[123].mxu1 }
 0x1f5   : > { %3677 = vst [vmem:[%s4189_s24 + $0x1e8] sm:$0xff] %v3605_v58  }
 0x1f6   : > { %v1933_v9 = vadd.f32 %v4413_v30, %v1798_v5  ;;  %v1997_v10 = vadd.f32 %v4413_v30, %v1862_v6  ;;  %v2060_v11 = vmax.f32 %v1932_v3, 0.0  ;;  %v2124_v12 = vmax.f32 %v1996_v4, 0.0 }
 0x1f8   : > { %v2061_v13 = vmax.f32 %v1933_v9, 0.0  ;;  %v2125_v14 = vmax.f32 %v1997_v10, 0.0 }
 0x1f9   : > { %v1467_v15 = vpop.f32.mrb[124].mxu0  ;;  %v1723_v16 = vpop.f32.mrb[124].mxu1 }
 0x1fa   : > { %v3450_v17 = vpack.c.bf16 %v2061_v13, %v2060_v11  ;;  %v3610_v18 = vpack.c.bf16 %v2125_v14, %v2124_v12  ;;  %v1799_v19 = vmul.f32 %v4404_v61, %v1467_v15  ;;  %v1863_v20 = vmul.f32 %v4404_v61, %v1723_v16  ;;  %v1469_v21 = vpop.f32.mrb[125].mxu0  ;;  %v1725_v22 = vpop.f32.mrb[125].mxu1 }
 0x1fb   : > { %v1470_v23 = vpop.f32.mrb[126].mxu0  ;;  %v1726_v24 = vpop.f32.mrb[126].mxu1 }
 0x1fc   : > { %3646 = vst [vmem:[%s4189_s24 + $0xf0] sm:$0xff] %v3450_v17   ;;  %3678 = vst [vmem:[%s4189_s24 + $0x1f0] sm:$0xff] %v3610_v18   ;;  %v1934_v25 = vadd.f32 %v4413_v30, %v1799_v19  ;;  %v1998_v26 = vadd.f32 %v4413_v30, %v1863_v20  ;;  %v1800_v63 = vmul.f32 %v4404_v61, %v1470_v23  ;;  %v1472_v28 = vpop.f32.mrb[127].mxu0  ;;  %v1728_v29 = vpop.f32.mrb[127].mxu1 }
 0x1fd   : > { %v1864_v27 = vmul.f32 %v4404_v61, %v1726_v24 }
 0x1fe   : > { %v1935_v31 = vadd.f32 %v4413_v30, %v1800_v63  ;;  %v2062_v33 = vmax.f32 %v1934_v25, 0.0  ;;  %v2126_v34 = vmax.f32 %v1998_v26, 0.0 }
 0x1ff   : > { %v1999_v32 = vadd.f32 %v4413_v30, %v1864_v27 }
 0x200   : > { %v2063_v35 = vmax.f32 %v1935_v31, 0.0 }
 0x201   : > { %v2127_v36 = vmax.f32 %v1999_v32, 0.0 }
 0x202   : > { %v3455_v37 = vpack.c.bf16 %v2063_v35, %v2062_v33 }
 0x203   : > { %v3615_v38 = vpack.c.bf16 %v2127_v36, %v2126_v34 }
 0x204   : > { %3647 = vst [vmem:[%s4189_s24 + $0xf8] sm:$0xff] %v3455_v37  }
 0x205   : > { %3679 = vst [vmem:[%s4189_s24 + $0x1f8] sm:$0xff] %v3615_v38  }
 0x206 PF: > { %s14_s15 = sadd.s32 1, %s3920_s15  }
 0x207   : > { %p11_p4 = scmp.ge.s32.totalorder %s14_s15, 4  }
 0x209   :  { %13 = sbr.rel (!%p11_p4) target bundleno = 1 (0x1), region = 66 }

// kernel: _lambda_.6
= control target key start
LH: loop header
LB: loop body
LE: loop exit
PB: predicated region body
PF: predicated region fallthrough
CT: control target
= control target key end

     0   :  { %s1236_s15 = smov 0   ;;  %s1401_s0 = inlined_call_operand.vmem [shape: bf16[512,72], index: 0, kind: input, shape index: {}]   ;;  %s1402_s1 = inlined_call_operand.vmem [shape: bf16[72,128], index: 1, kind: input, shape index: {}]   ;;  %s1403_s2 = inlined_call_operand.vmem [shape: f32[1,128], index: 2, kind: input, shape index: {}]   ;;  %s1404_s3 = inlined_call_operand.vmem [shape: f32[1,128], index: 3, kind: input, shape index: {}]   ;;  %s1405_s4 = inlined_call_operand.vmem [shape: bf16[512,128], index: 4, kind: output, shape index: {}]  }
   0x1 LB: > { %s890_s16 = sadd.s32 4294967295, %s1209_s15   ;;  %p894_p0 = scmp.ge.s32.totalorder %s1209_s15, 1  ;;  %s1209_s15 = sphi %s1236_s15, %s14_s15  }
   0x2   : > { %p163_p1 = scmp.lt.s32.totalorder %s1209_s15, 3 }
   0x4   : > { %p164_p2 = pnand %p894_p0, %p163_p1 }
   0x5   : > { %v1182_v0 = vld [vmem:[%s1402_s1] sm:$0xff] (!%p164_p2)   ;;  %v1183_v1 = vld [vmem:[%s1402_s1 + $0x8] sm:$0xff] (!%p164_p2)   ;;  %s895_s21 = sshll.u32 (!%p164_p2), %s890_s16, 5  ;;  %v1184_v2 = vld [vmem:[%s1402_s1 + $0x10] sm:$0xff] (!%p164_p2)   ;;  %vm350_vm0 = vcmask (!%p164_p2), 588800   ;;  %vm399_vm1 = vcmask (!%p164_p2), 1043456  }
   0x6   : > { %167 = sbr.rel (%p164_p2) target bundleno = 275 (0x113), region = 36  ;;  %1120 = vmatprep.subr.bf16.mxu0 (!%p164_p2), %v1182_v0  ;;  %1162 = vmatprep.subr.bf16.mxu1 (!%p164_p2), %v1182_v0  ;;  %p190_p3 = scmp.lt.s32.totalorder (!%p164_p2), %s895_s21, 63  ;;  %v1185_v3 = vld [vmem:[%s1402_s1 + $0x18] sm:$0xff] (!%p164_p2)   ;;  %v1186_v6 = vld [vmem:[%s1402_s1 + $0x20] ss:$0 sps:$4 sm:$0xff] (!%p164_p2)  }
   0x7   : > { %1121 = vmatpush3.bf16.msra.mxu0 (!%p164_p2), %v1182_v0  ;;  %1167 = vmatpush3.bf16.msra.mxu1 (!%p164_p2), %v1182_v0  ;;  %v401_v7 = vsel (!%p164_p2), %vm399_vm1, %v1186_v6, 0  ;;  %v1304_v22 = vld [vmem:[%s1403_s2] ss:$0 sm:$0xff] (!%p164_p2) }
   0x8   : > { %1122 = vmatprep.subr.bf16.mxu0 (!%p164_p2), %v1183_v1  ;;  %1163 = vmatprep.subr.bf16.mxu1 (!%p164_p2), %v1183_v1  ;;  %v1309_v24 = vld [vmem:[%s1404_s3] ss:$0 sm:$0xff] (!%p164_p2) }
   0xb   : > { %1123 = vmatpush3.bf16.msra.mxu0 (!%p164_p2), %v1183_v1  ;;  %1168 = vmatpush3.bf16.msra.mxu1 (!%p164_p2), %v1183_v1 }
   0xc   : > { %1124 = vmatprep.subr.bf16.mxu0 (!%p164_p2), %v1184_v2  ;;  %1164 = vmatprep.subr.bf16.mxu1 (!%p164_p2), %v1184_v2 }
   0xd   : > { %s1407_s21 = smov (!%p190_p3, %s895_s21), 63 }
   0xe   : > { %s896_s24 = sshll.u32 %s1407_s21, 2 }
   0xf   : > { %s1264_s29 = scalar_lea.vmem %s1401_s0, %s896_s24  ;;  %1125 = vmatpush3.bf16.msra.mxu0 %v1184_v2  ;;  %1169 = vmatpush3.bf16.msra.mxu1 %v1184_v2  ;;  %s1332_s12 = scalar_lea.vmem %s1405_s4, %s896_s24 }
  0x10   : > { %v1187_v4 = vld [vmem:[%s1264_s29] sm:$0xff]   ;;  %1126 = vmatprep.subr.bf16.mxu0 %v1185_v3  ;;  %1165 = vmatprep.subr.bf16.mxu1 %v1185_v3  ;;  %v1189_v8 = vld [vmem:[%s1264_s29 + $0x8] sm:$0xff]   ;;  %v1191_v10 = vld [vmem:[%s1264_s29 + $0x10] sm:$0xff]  }
  0x11   : > { %v1188_v5 = vld [vmem:[%s1264_s29 + $0x40] sm:$0xff]   ;;  %1130 = vmatprep.mubr.msk.bf16.mxu0 %vm350_vm0, %v1187_v4  ;;  %v1190_v9 = vld [vmem:[%s1264_s29 + $0x48] sm:$0xff]   ;;  %v1192_v11 = vld [vmem:[%s1264_s29 + $0x50] sm:$0xff]  }
  0x12   : > { %1146 = vmatprep.mubr.msk.bf16.mxu1 %vm350_vm0, %v1188_v5  ;;  %v1193_v12 = vld [vmem:[%s1264_s29 + $0x18] sm:$0xff]   ;;  %v1195_v14 = vld [vmem:[%s1264_s29 + $0x20] sm:$0xff]   ;;  %v1197_v16 = vld [vmem:[%s1264_s29 + $0x28] sm:$0xff]  }
  0x13   : > { %1127 = vmatpush3.bf16.msra.mxu0 %v1185_v3  ;;  %1170 = vmatpush3.bf16.msra.mxu1 %v1185_v3  ;;  %v1194_v13 = vld [vmem:[%s1264_s29 + $0x58] sm:$0xff]   ;;  %v1196_v15 = vld [vmem:[%s1264_s29 + $0x60] sm:$0xff]   ;;  %v1198_v17 = vld [vmem:[%s1264_s29 + $0x68] sm:$0xff]  }
  0x14   : > { %1172 = vmatprep.subr.msk.bf16.mxu0 %vm399_vm1, %v1186_v6  ;;  %1173 = vmatprep.subr.msk.bf16.mxu1 %vm399_vm1, %v1186_v6  ;;  %v1199_v18 = vld [vmem:[%s1264_s29 + $0x30] sm:$0xff]   ;;  %v1201_v20 = vld [vmem:[%s1264_s29 + $0x38] sm:$0xff]  }
  0x15   : > { %v1200_v19 = vld [vmem:[%s1264_s29 + $0x70] sm:$0xff]   ;;  %v1202_v21 = vld [vmem:[%s1264_s29 + $0x78] sm:$0xff]  }
  0x17   : > { %1129 = vmatpush3.bf16.msra.mxu0 %v401_v7  ;;  %1171 = vmatpush3.bf16.msra.mxu1 %v401_v7 }
  0x1a   : > { %1131 = vmatmul.mubr.msk.bf16.vlgmr.msra.gmra.mrb[0].mxu0 %vm350_vm0, %v1189_v8  ;;  %1147 = vmatmul.mubr.msk.bf16.vlgmr.msra.gmra.mrb[0].mxu1 %vm350_vm0, %v1190_v9 }
  0x1b   : > { %1134 = vmatprep.mubr.msk.bf16.mxu0 %vm350_vm0, %v1191_v10  ;;  %1150 = vmatprep.mubr.msk.bf16.mxu1 %vm350_vm0, %v1192_v11 }
  0x22   : > { %1135 = vmatmul.mubr.msk.bf16.gmra.mrb[4].mxu0 %vm350_vm0, %v1193_v12  ;;  %1151 = vmatmul.mubr.msk.bf16.gmra.mrb[4].mxu1 %vm350_vm0, %v1194_v13 }
  0x23   : > { %1138 = vmatprep.mubr.msk.bf16.mxu0 %vm350_vm0, %v1195_v14  ;;  %1154 = vmatprep.mubr.msk.bf16.mxu1 %vm350_vm0, %v1196_v15 }
  0x2a   : > { %1139 = vmatmul.mubr.msk.bf16.gmra.mrb[8].mxu0 %vm350_vm0, %v1197_v16  ;;  %1155 = vmatmul.mubr.msk.bf16.gmra.mrb[8].mxu1 %vm350_vm0, %v1198_v17 }
  0x2b   : > { %1142 = vmatprep.mubr.msk.bf16.mxu0 %vm350_vm0, %v1199_v18  ;;  %1158 = vmatprep.mubr.msk.bf16.mxu1 %vm350_vm0, %v1200_v19 }
  0x32   : > { %1143 = vmatmul.mubr.msk.bf16.gmra.mrb[12].mxu0 %vm350_vm0, %v1201_v20  ;;  %1159 = vmatmul.mubr.msk.bf16.gmra.mrb[12].mxu1 %vm350_vm0, %v1202_v21 }
  0xed   : > { %v1132_v23 = vpop.f32.mrb[0].mxu0  ;;  %v1148_v25 = vpop.f32.mrb[0].mxu1 }
  0xee   : > { %v573_v26 = vmul.f32 %v1132_v23, %v1304_v22  ;;  %v589_v27 = vmul.f32 %v1148_v25, %v1304_v22  ;;  %v437_v28 = vpop.f32.mrb[1].mxu0  ;;  %v501_v29 = vpop.f32.mrb[1].mxu1 }
  0xef   : > { %v571_v30 = vmul.f32 %v1304_v22, %v437_v28  ;;  %v587_v31 = vmul.f32 %v1304_v22, %v501_v29  ;;  %v1133_v32 = vpop.f32.mrb[2].mxu0  ;;  %v1149_v33 = vpop.f32.mrb[2].mxu1 }
  0xf0   : > { %v612_v34 = vadd.f32 %v1309_v24, %v573_v26  ;;  %v628_v35 = vadd.f32 %v1309_v24, %v589_v27  ;;  %v574_v36 = vmul.f32 %v1133_v32, %v1304_v22  ;;  %v590_v37 = vmul.f32 %v1149_v33, %v1304_v22  ;;  %v440_v38 = vpop.f32.mrb[3].mxu0  ;;  %v504_v39 = vpop.f32.mrb[3].mxu1 }
  0xf1   : > { %v610_v40 = vadd.f32 %v1309_v24, %v571_v30  ;;  %v626_v41 = vadd.f32 %v1309_v24, %v587_v31  ;;  %v572_v42 = vmul.f32 %v1304_v22, %v440_v38  ;;  %v588_v43 = vmul.f32 %v1304_v22, %v504_v39 }
  0xf2   : > { %v613_v44 = vadd.f32 %v1309_v24, %v574_v36  ;;  %v629_v45 = vadd.f32 %v1309_v24, %v590_v37  ;;  %v644_v48 = vmax.f32 %v612_v34, 0.0  ;;  %v660_v49 = vmax.f32 %v628_v35, 0.0 }
  0xf3   : > { %v611_v46 = vadd.f32 %v1309_v24, %v572_v42  ;;  %v627_v47 = vadd.f32 %v1309_v24, %v588_v43  ;;  %v642_v52 = vmax.f32 %v610_v40, 0.0  ;;  %v658_v53 = vmax.f32 %v626_v41, 0.0 }
  0xf4   : > { %v645_v50 = vmax.f32 %v613_v44, 0.0  ;;  %v661_v51 = vmax.f32 %v629_v45, 0.0 }
  0xf5   : > { %v643_v54 = vmax.f32 %v611_v46, 0.0  ;;  %v659_v55 = vmax.f32 %v627_v47, 0.0  ;;  %v1136_v56 = vpop.f32.mrb[4].mxu0  ;;  %v1152_v57 = vpop.f32.mrb[4].mxu1 }
  0xf6   : > { %v1012_v58 = vpack.c.bf16 %v645_v50, %v644_v48  ;;  %v1052_v59 = vpack.c.bf16 %v661_v51, %v660_v49  ;;  %v577_v60 = vmul.f32 %v1136_v56, %v1304_v22  ;;  %v593_v61 = vmul.f32 %v1152_v57, %v1304_v22  ;;  %v453_v62 = vpop.f32.mrb[5].mxu0  ;;  %v517_v63 = vpop.f32.mrb[5].mxu1 }
  0xf7   : > { %v1007_v0 = vpack.c.bf16 %v643_v54, %v642_v52  ;;  %v1047_v1 = vpack.c.bf16 %v659_v55, %v658_v53  ;;  %v575_v2 = vmul.f32 %v1304_v22, %v453_v62  ;;  %v591_v3 = vmul.f32 %v1304_v22, %v517_v63  ;;  %v1137_v4 = vpop.f32.mrb[6].mxu0  ;;  %v1153_v5 = vpop.f32.mrb[6].mxu1 }
  0xf8   : > { %1084 = vst [vmem:[%s1332_s12 + $0x8] sm:$0xff] %v1012_v58   ;;  %1092 = vst [vmem:[%s1332_s12 + $0x48] sm:$0xff] %v1052_v59   ;;  %v616_v6 = vadd.f32 %v1309_v24, %v577_v60  ;;  %v632_v7 = vadd.f32 %v1309_v24, %v593_v61  ;;  %v578_v8 = vmul.f32 %v1137_v4, %v1304_v22  ;;  %v456_v10 = vpop.f32.mrb[7].mxu0  ;;  %v520_v11 = vpop.f32.mrb[7].mxu1 }
  0xf9   : > { %v594_v9 = vmul.f32 %v1153_v5, %v1304_v22  ;;  %1008 = vst [vmem:[%s1332_s12] sm:$0xff] %v1007_v0   ;;  %1091 = vst [vmem:[%s1332_s12 + $0x40] sm:$0xff] %v1047_v1   ;;  %v614_v12 = vadd.f32 %v1309_v24, %v575_v2  ;;  %v630_v13 = vadd.f32 %v1309_v24, %v591_v3 }
  0xfa   : > { %v576_v14 = vmul.f32 %v1304_v22, %v456_v10  ;;  %v592_v15 = vmul.f32 %v1304_v22, %v520_v11  ;;  %v617_v16 = vadd.f32 %v1309_v24, %v578_v8  ;;  %v648_v20 = vmax.f32 %v616_v6, 0.0 }
  0xfb   : > { %v633_v17 = vadd.f32 %v1309_v24, %v594_v9  ;;  %v664_v21 = vmax.f32 %v632_v7, 0.0  ;;  %v646_v26 = vmax.f32 %v614_v12, 0.0  ;;  %v662_v27 = vmax.f32 %v630_v13, 0.0 }
  0xfc   : > { %v615_v18 = vadd.f32 %v1309_v24, %v576_v14  ;;  %v631_v19 = vadd.f32 %v1309_v24, %v592_v15  ;;  %v649_v23 = vmax.f32 %v617_v16, 0.0 }
  0xfd   : > { %v665_v25 = vmax.f32 %v633_v17, 0.0  ;;  %v1140_v30 = vpop.f32.mrb[8].mxu0  ;;  %v1156_v31 = vpop.f32.mrb[8].mxu1 }
  0xfe   : > { %v647_v28 = vmax.f32 %v615_v18, 0.0  ;;  %v663_v29 = vmax.f32 %v631_v19, 0.0  ;;  %v1022_v32 = vpack.c.bf16 %v649_v23, %v648_v20  ;;  %v581_v34 = vmul.f32 %v1140_v30, %v1304_v22  ;;  %v469_v36 = vpop.f32.mrb[9].mxu0  ;;  %v533_v37 = vpop.f32.mrb[9].mxu1 }
  0xff   : > { %v1062_v33 = vpack.c.bf16 %v665_v25, %v664_v21  ;;  %v597_v35 = vmul.f32 %v1156_v31, %v1304_v22  ;;  %v579_v40 = vmul.f32 %v1304_v22, %v469_v36  ;;  %v595_v41 = vmul.f32 %v1304_v22, %v533_v37  ;;  %v1141_v42 = vpop.f32.mrb[10].mxu0  ;;  %v1157_v43 = vpop.f32.mrb[10].mxu1 }
 0x100   : > { %v1017_v38 = vpack.c.bf16 %v647_v28, %v646_v26  ;;  %v1057_v39 = vpack.c.bf16 %v663_v29, %v662_v27  ;;  %1086 = vst [vmem:[%s1332_s12 + $0x18] sm:$0xff] %v1022_v32   ;;  %v620_v44 = vadd.f32 %v1309_v24, %v581_v34  ;;  %v582_v46 = vmul.f32 %v1141_v42, %v1304_v22  ;;  %v472_v48 = vpop.f32.mrb[11].mxu0  ;;  %v536_v49 = vpop.f32.mrb[11].mxu1 }
 0x101   : > { %1094 = vst [vmem:[%s1332_s12 + $0x58] sm:$0xff] %v1062_v33   ;;  %v636_v45 = vadd.f32 %v1309_v24, %v597_v35  ;;  %v598_v47 = vmul.f32 %v1157_v43, %v1304_v22  ;;  %v618_v50 = vadd.f32 %v1309_v24, %v579_v40  ;;  %v634_v51 = vadd.f32 %v1309_v24, %v595_v41 }
 0x102   : > { %1085 = vst [vmem:[%s1332_s12 + $0x10] sm:$0xff] %v1017_v38   ;;  %1093 = vst [vmem:[%s1332_s12 + $0x50] sm:$0xff] %v1057_v39   ;;  %v580_v52 = vmul.f32 %v1304_v22, %v472_v48  ;;  %v596_v53 = vmul.f32 %v1304_v22, %v536_v49  ;;  %v621_v54 = vadd.f32 %v1309_v24, %v582_v46  ;;  %v652_v58 = vmax.f32 %v620_v44, 0.0 }
 0x103   : > { %v637_v55 = vadd.f32 %v1309_v24, %v598_v47  ;;  %v668_v59 = vmax.f32 %v636_v45, 0.0  ;;  %v650_v62 = vmax.f32 %v618_v50, 0.0  ;;  %v666_v63 = vmax.f32 %v634_v51, 0.0 }
 0x104   : > { %v619_v56 = vadd.f32 %v1309_v24, %v580_v52  ;;  %v635_v57 = vadd.f32 %v1309_v24, %v596_v53  ;;  %v653_v60 = vmax.f32 %v621_v54, 0.0 }
 0x105   : > { %v669_v61 = vmax.f32 %v637_v55, 0.0  ;;  %v1144_v2 = vpop.f32.mrb[12].mxu0  ;;  %v1160_v3 = vpop.f32.mrb[12].mxu1 }
 0x106   : > { %v651_v0 = vmax.f32 %v619_v56, 0.0  ;;  %v667_v1 = vmax.f32 %v635_v57, 0.0  ;;  %v1032_v4 = vpack.c.bf16 %v653_v60, %v652_v58  ;;  %v585_v6 = vmul.f32 %v1144_v2, %v1304_v22  ;;  %v485_v8 = vpop.f32.mrb[13].mxu0  ;;  %v549_v9 = vpop.f32.mrb[13].mxu1 }
 0x107   : > { %v1072_v5 = vpack.c.bf16 %v669_v61, %v668_v59  ;;  %v601_v7 = vmul.f32 %v1160_v3, %v1304_v22  ;;  %v583_v12 = vmul.f32 %v1304_v22, %v485_v8  ;;  %v599_v13 = vmul.f32 %v1304_v22, %v549_v9  ;;  %v1145_v14 = vpop.f32.mrb[14].mxu0  ;;  %v1161_v15 = vpop.f32.mrb[14].mxu1 }
 0x108   : > { %v1027_v10 = vpack.c.bf16 %v651_v0, %v650_v62  ;;  %v1067_v11 = vpack.c.bf16 %v667_v1, %v666_v63  ;;  %1088 = vst [vmem:[%s1332_s12 + $0x28] sm:$0xff] %v1032_v4   ;;  %v624_v16 = vadd.f32 %v1309_v24, %v585_v6  ;;  %v586_v18 = vmul.f32 %v1145_v14, %v1304_v22  ;;  %v488_v20 = vpop.f32.mrb[15].mxu0  ;;  %v552_v21 = vpop.f32.mrb[15].mxu1 }
 0x109   : > { %1096 = vst [vmem:[%s1332_s12 + $0x68] sm:$0xff] %v1072_v5   ;;  %v640_v17 = vadd.f32 %v1309_v24, %v601_v7  ;;  %v602_v19 = vmul.f32 %v1161_v15, %v1304_v22  ;;  %v622_v23 = vadd.f32 %v1309_v24, %v583_v12  ;;  %v638_v25 = vadd.f32 %v1309_v24, %v599_v13 }
 0x10a   : > { %1087 = vst [vmem:[%s1332_s12 + $0x20] sm:$0xff] %v1027_v10   ;;  %1095 = vst [vmem:[%s1332_s12 + $0x60] sm:$0xff] %v1067_v11   ;;  %v584_v26 = vmul.f32 %v1304_v22, %v488_v20  ;;  %v600_v27 = vmul.f32 %v1304_v22, %v552_v21  ;;  %v625_v28 = vadd.f32 %v1309_v24, %v586_v18  ;;  %v656_v32 = vmax.f32 %v624_v16, 0.0 }
 0x10b   : > { %v641_v29 = vadd.f32 %v1309_v24, %v602_v19  ;;  %v672_v33 = vmax.f32 %v640_v17, 0.0  ;;  %v654_v36 = vmax.f32 %v622_v23, 0.0  ;;  %v670_v37 = vmax.f32 %v638_v25, 0.0 }
 0x10c   : > { %v623_v30 = vadd.f32 %v1309_v24, %v584_v26  ;;  %v639_v31 = vadd.f32 %v1309_v24, %v600_v27  ;;  %v657_v34 = vmax.f32 %v625_v28, 0.0 }
 0x10d   : > { %v673_v35 = vmax.f32 %v641_v29, 0.0 }
 0x10e   : > { %v655_v38 = vmax.f32 %v623_v30, 0.0  ;;  %v671_v22 = vmax.f32 %v639_v31, 0.0  ;;  %v1042_v39 = vpack.c.bf16 %v657_v34, %v656_v32 }
 0x10f   : > { %v1082_v40 = vpack.c.bf16 %v673_v35, %v672_v33 }
 0x110   : > { %v1037_v41 = vpack.c.bf16 %v655_v38, %v654_v36  ;;  %v1077_v42 = vpack.c.bf16 %v671_v22, %v670_v37  ;;  %1090 = vst [vmem:[%s1332_s12 + $0x38] sm:$0xff] %v1042_v39  }
 0x111   : > { %1098 = vst [vmem:[%s1332_s12 + $0x78] sm:$0xff] %v1082_v40  }
 0x112   : > { %1089 = vst [vmem:[%s1332_s12 + $0x30] sm:$0xff] %v1037_v41   ;;  %1097 = vst [vmem:[%s1332_s12 + $0x70] sm:$0xff] %v1077_v42  }
 0x113 PF: > { %s14_s15 = sadd.s32 1, %s1209_s15  }
 0x114   : > { %p11_p4 = scmp.ge.s32.totalorder %s14_s15, 4  }
 0x116   :  { %13 = sbr.rel (!%p11_p4) target bundleno = 1 (0x1), region = 66 }

// kernel: _lambda_.7
= control target key start
LH: loop header
LB: loop body
LE: loop exit
PB: predicated region body
PF: predicated region fallthrough
CT: control target
= control target key end

     0   :  { %s690_s15 = smov 0   ;;  %s758_s0 = inlined_call_operand.vmem [shape: bf16[128,144], index: 0, kind: input, shape index: {}]   ;;  %s759_s1 = inlined_call_operand.vmem [shape: bf16[144,128], index: 1, kind: input, shape index: {}]   ;;  %s760_s2 = inlined_call_operand.vmem [shape: f32[1,128], index: 2, kind: input, shape index: {}]   ;;  %s761_s3 = inlined_call_operand.vmem [shape: f32[1,128], index: 3, kind: input, shape index: {}]   ;;  %s762_s4 = inlined_call_operand.vmem [shape: bf16[128,128], index: 4, kind: output, shape index: {}]  }
   0x1 LB: > { %s533_s16 = sadd.s32 4294967295, %s662_s15   ;;  %p537_p0 = scmp.ge.s32.totalorder %s662_s15, 1  ;;  %s662_s15 = sphi %s690_s15, %s14_s15  }
   0x2   : > { %p164_p1 = scmp.lt.s32.totalorder %s662_s15, 3 }
   0x4   : > { %p165_p2 = pnand %p537_p0, %p164_p1 }
   0x5   : > { %v635_v0 = vld [vmem:[%s759_s1] sm:$0xff] (!%p165_p2)   ;;  %v664_v1 = vmov (!%p165_p2), 0   ;;  %s538_s19 = sshll.u32 (!%p165_p2), %s533_s16, 3  ;;  %v636_v2 = vld [vmem:[%s759_s1 + $0x8] sm:$0xff] (!%p165_p2)   ;;  %v637_v3 = vld [vmem:[%s759_s1 + $0x10] sm:$0xff] (!%p165_p2)   ;;  %vm321_vm0 = vcmask (!%p165_p2), 130048  }
   0x6   : > { %168 = sbr.rel (%p165_p2) target bundleno = 274 (0x112), region = 36  ;;  %334 = vmatprep.subr.bf16.mxu0 (!%p165_p2), %v664_v1  ;;  %608 = vmatprep.subr.bf16.mxu1 (!%p165_p2), %v664_v1  ;;  %p192_p3 = scmp.lt.s32.totalorder (!%p165_p2), %s538_s19, 15  ;;  %v638_v4 = vld [vmem:[%s759_s1 + $0x18] sm:$0xff] (!%p165_p2)   ;;  %v639_v7 = vld [vmem:[%s759_s1 + $0x20] sm:$0xff] (!%p165_p2)   ;;  %v640_v8 = vld [vmem:[%s759_s1 + $0x28] sm:$0xff] (!%p165_p2)  }
   0x7   : > { %335 = vmatpush1.bf16.msra.mxu0 (!%p165_p2), %v635_v0  ;;  %617 = vmatpush1.bf16.msra.mxu1 (!%p165_p2), %v635_v0  ;;  %v641_v9 = vld [vmem:[%s759_s1 + $0x30] sm:$0xff] (!%p165_p2)   ;;  %v642_v10 = vld [vmem:[%s759_s1 + $0x38] sm:$0xff] (!%p165_p2)   ;;  %v643_v11 = vld [vmem:[%s759_s1 + $0x40] sm:$0xff] (!%p165_p2)  }
   0x8   : > { %336 = vmatprep.subr.bf16.mxu0 (!%p165_p2), %v664_v1  ;;  %609 = vmatprep.subr.bf16.mxu1 (!%p165_p2), %v664_v1  ;;  %v564_v18 = vld [vmem:[%s760_s2] ss:$0 sm:$0xff] (!%p165_p2) }
   0x9   : > { %v565_v20 = vld [vmem:[%s761_s3] ss:$0 sm:$0xff] (!%p165_p2) }
   0xb   : > { %337 = vmatpush1.bf16.msra.mxu0 (!%p165_p2), %v636_v2  ;;  %618 = vmatpush1.bf16.msra.mxu1 (!%p165_p2), %v636_v2 }
   0xc   : > { %338 = vmatprep.subr.bf16.mxu0 (!%p165_p2), %v664_v1  ;;  %610 = vmatprep.subr.bf16.mxu1 (!%p165_p2), %v664_v1 }
   0xd   : > { %s764_s19 = smov (!%p192_p3, %s538_s19), 15 }
   0xe   : > { %s576_s24 = sshll.u32 %s764_s19, 3  ;;  %s542_s20 = sshll.u32 %s764_s19, 2 }
   0xf   : > { %s713_s27 = scalar_lea.vmem %s758_s0, %s576_s24  ;;  %339 = vmatpush1.bf16.msra.mxu0 %v637_v3  ;;  %619 = vmatpush1.bf16.msra.mxu1 %v637_v3  ;;  %s202_s23 = scalar_lea.vmem %s762_s4, %s542_s20 }
  0x10   : > { %v646_v5 = vld [vmem:[%s713_s27 + $0x4] ss:$8 sps:$4 sm:$0xff]   ;;  %340 = vmatprep.subr.bf16.mxu0 %v664_v1  ;;  %611 = vmatprep.subr.bf16.mxu1 %v664_v1  ;;  %v644_v12 = vld [vmem:[%s713_s27] ss:$8 sps:$4 sm:$0xff]   ;;  %v650_v14 = vld [vmem:[%s713_s27 + $0x14] ss:$8 sps:$4 sm:$0xff]  }
  0x11   : > { %v649_v6 = vld [vmem:[%s713_s27 + $0x24] ss:$8 sps:$4 sm:$0xff]   ;;  %560 = vmatprep.mubr.msk.bf16.mxu0 %vm321_vm0, %v646_v5  ;;  %v647_v13 = vld [vmem:[%s713_s27 + $0x20] ss:$8 sps:$4 sm:$0xff]   ;;  %v652_v15 = vld [vmem:[%s713_s27 + $0x34] ss:$8 sps:$4 sm:$0xff]  }
  0x12   : > { %562 = vmatprep.mubr.msk.bf16.mxu1 %vm321_vm0, %v649_v6  ;;  %v654_v16 = vld [vmem:[%s713_s27 + $0x10] ss:$8 sps:$4 sm:$0xff]  }
  0x13   : > { %341 = vmatpush1.bf16.msra.mxu0 %v638_v4  ;;  %620 = vmatpush1.bf16.msra.mxu1 %v638_v4  ;;  %v655_v17 = vld [vmem:[%s713_s27 + $0x30] ss:$8 sps:$4 sm:$0xff]  }
  0x14   : > { %342 = vmatprep.subr.bf16.mxu0 %v664_v1  ;;  %612 = vmatprep.subr.bf16.mxu1 %v664_v1 }
  0x17   : > { %343 = vmatpush1.bf16.msra.mxu0 %v639_v7  ;;  %621 = vmatpush1.bf16.msra.mxu1 %v639_v7 }
  0x18   : > { %344 = vmatprep.subr.bf16.mxu0 %v664_v1  ;;  %613 = vmatprep.subr.bf16.mxu1 %v664_v1 }
  0x1b   : > { %345 = vmatpush1.bf16.msra.mxu0 %v640_v8  ;;  %622 = vmatpush1.bf16.msra.mxu1 %v640_v8 }
  0x1c   : > { %346 = vmatprep.subr.bf16.mxu0 %v664_v1  ;;  %614 = vmatprep.subr.bf16.mxu1 %v664_v1 }
  0x1f   : > { %347 = vmatpush1.bf16.msra.mxu0 %v641_v9  ;;  %623 = vmatpush1.bf16.msra.mxu1 %v641_v9 }
  0x20   : > { %348 = vmatprep.subr.bf16.mxu0 %v664_v1  ;;  %615 = vmatprep.subr.bf16.mxu1 %v664_v1 }
  0x23   : > { %349 = vmatpush1.bf16.msra.mxu0 %v642_v10  ;;  %624 = vmatpush1.bf16.msra.mxu1 %v642_v10 }
  0x24   : > { %350 = vmatprep.subr.bf16.mxu0 %v664_v1  ;;  %616 = vmatprep.subr.bf16.mxu1 %v664_v1 }
  0x27   : > { %351 = vmatpush1.bf16.msra.mxu0 %v643_v11  ;;  %625 = vmatpush1.bf16.msra.mxu1 %v643_v11 }
  0x2a   : > { %367 = vmatmul.mubr.bf16.vlgmr.msra.gmra.mrb[0].mxu0 %v644_v12  ;;  %383 = vmatmul.mubr.bf16.vlgmr.msra.gmra.mrb[0].mxu1 %v647_v13 }
  0x2b   : > { %561 = vmatprep.mubr.msk.bf16.mxu0 %vm321_vm0, %v650_v14  ;;  %563 = vmatprep.mubr.msk.bf16.mxu1 %vm321_vm0, %v652_v15 }
  0x32   : > { %375 = vmatmul.mubr.bf16.gmra.mrb[4].mxu0 %v654_v16  ;;  %391 = vmatmul.mubr.bf16.gmra.mrb[4].mxu1 %v655_v17 }
  0xfd   : > { %v368_v19 = vpop.f32.mrb[0].mxu0  ;;  %v384_v21 = vpop.f32.mrb[0].mxu1 }
  0xfe   : > { %v406_v22 = vmul.f32 %v564_v18, %v368_v19  ;;  %v410_v23 = vmul.f32 %v564_v18, %v384_v21  ;;  %v370_v24 = vpop.f32.mrb[1].mxu0  ;;  %v386_v25 = vpop.f32.mrb[1].mxu1 }
  0xff   : > { %v371_v26 = vpop.f32.mrb[2].mxu0  ;;  %v387_v27 = vpop.f32.mrb[2].mxu1 }
 0x100   : > { %v421_v28 = vadd.f32 %v565_v20, %v406_v22  ;;  %v425_v29 = vadd.f32 %v565_v20, %v410_v23  ;;  %v407_v30 = vmul.f32 %v564_v18, %v371_v26  ;;  %v411_v31 = vmul.f32 %v564_v18, %v387_v27  ;;  %v373_v32 = vpop.f32.mrb[3].mxu0  ;;  %v389_v33 = vpop.f32.mrb[3].mxu1 }
 0x102   : > { %v422_v34 = vadd.f32 %v565_v20, %v407_v30  ;;  %v426_v35 = vadd.f32 %v565_v20, %v411_v31  ;;  %v429_v36 = vmax.f32 %v421_v28, 0.0  ;;  %v433_v37 = vmax.f32 %v425_v29, 0.0 }
 0x104   : > { %v430_v38 = vmax.f32 %v422_v34, 0.0  ;;  %v434_v39 = vmax.f32 %v426_v35, 0.0 }
 0x105   : > { %v376_v40 = vpop.f32.mrb[4].mxu0  ;;  %v392_v41 = vpop.f32.mrb[4].mxu1 }
 0x106   : > { %v588_v42 = vpack.c.bf16 %v430_v38, %v429_v36  ;;  %v598_v43 = vpack.c.bf16 %v434_v39, %v433_v37  ;;  %v408_v44 = vmul.f32 %v564_v18, %v376_v40  ;;  %v412_v45 = vmul.f32 %v564_v18, %v392_v41  ;;  %v378_v46 = vpop.f32.mrb[5].mxu0  ;;  %v394_v47 = vpop.f32.mrb[5].mxu1 }
 0x107   : > { %v379_v48 = vpop.f32.mrb[6].mxu0  ;;  %v395_v49 = vpop.f32.mrb[6].mxu1 }
 0x108   : > { %589 = vst [vmem:[%s202_s23] sm:$0xff] %v588_v42   ;;  %606 = vst [vmem:[%s202_s23 + $0x10] sm:$0xff] %v598_v43   ;;  %v423_v50 = vadd.f32 %v565_v20, %v408_v44  ;;  %v427_v51 = vadd.f32 %v565_v20, %v412_v45  ;;  %v409_v52 = vmul.f32 %v564_v18, %v379_v48  ;;  %v381_v54 = vpop.f32.mrb[7].mxu0  ;;  %v397_v55 = vpop.f32.mrb[7].mxu1 }
 0x109   : > { %v413_v53 = vmul.f32 %v564_v18, %v395_v49 }
 0x10a   : > { %v424_v56 = vadd.f32 %v565_v20, %v409_v52  ;;  %v431_v58 = vmax.f32 %v423_v50, 0.0  ;;  %v435_v59 = vmax.f32 %v427_v51, 0.0 }
 0x10b   : > { %v428_v57 = vadd.f32 %v565_v20, %v413_v53 }
 0x10c   : > { %v432_v60 = vmax.f32 %v424_v56, 0.0 }
 0x10d   : > { %v436_v61 = vmax.f32 %v428_v57, 0.0 }
 0x10e   : > { %v593_v62 = vpack.c.bf16 %v432_v60, %v431_v58 }
 0x10f   : > { %v603_v63 = vpack.c.bf16 %v436_v61, %v435_v59 }
 0x110   : > { %605 = vst [vmem:[%s202_s23 + $0x8] sm:$0xff] %v593_v62  }
 0x111   : > { %607 = vst [vmem:[%s202_s23 + $0x18] sm:$0xff] %v603_v63  }
 0x112 PF: > { %s14_s15 = sadd.s32 1, %s662_s15  }
 0x113   : > { %p11_p4 = scmp.ge.s32.totalorder %s14_s15, 4  }
 0x115   :  { %13 = sbr.rel (!%p11_p4) target bundleno = 1 (0x1), region = 66 }

// kernel: _lambda_.8
= control target key start
LH: loop header
LB: loop body
LE: loop exit
PB: predicated region body
PF: predicated region fallthrough
CT: control target
= control target key end

     0   :  { %vm200_vm0 = vcmask 261120   ;;  %s577_s1 = inlined_call_operand.vmem [shape: bf16[288,128], index: 1, kind: input, shape index: {}]   ;;  %s578_s0 = inlined_call_operand.vmem [shape: bf16[32,288], index: 0, kind: input, shape index: {}]   ;;  %s579_s2 = inlined_call_operand.vmem [shape: f32[1,128], index: 2, kind: input, shape index: {}]   ;;  %s580_s3 = inlined_call_operand.vmem [shape: f32[1,128], index: 3, kind: input, shape index: {}]   ;;  %s581_s4 = inlined_call_operand.vmem [shape: bf16[32,128], index: 4, kind: output, shape index: {}]  }
   0x1   :  { %v442_v0 = vld [vmem:[%s577_s1 + $0x40] sm:$0xff]   ;;  %v444_v2 = vld [vmem:[%s577_s1 + $0x48] sm:$0xff]   ;;  %v446_v4 = vld [vmem:[%s577_s1 + $0x50] sm:$0xff]  }
   0x2   :  { %v443_v1 = vld [vmem:[%s577_s1] sm:$0xff]   ;;  %402 = vmatprep.subr.bf16.mxu0 %v442_v0  ;;  %v445_v3 = vld [vmem:[%s577_s1 + $0x8] sm:$0xff]   ;;  %v447_v5 = vld [vmem:[%s577_s1 + $0x10] sm:$0xff]  }
   0x3   :  { %403 = vmatpush3.bf16.msra.mxu0 %v443_v1  ;;  %v448_v6 = vld [vmem:[%s577_s1 + $0x58] sm:$0xff]   ;;  %v450_v8 = vld [vmem:[%s577_s1 + $0x60] sm:$0xff]   ;;  %v452_v11 = vld [vmem:[%s577_s1 + $0x68] sm:$0xff]  }
   0x4   :  { %404 = vmatprep.subr.bf16.mxu0 %v444_v2  ;;  %v449_v7 = vld [vmem:[%s577_s1 + $0x18] sm:$0xff]   ;;  %v456_v9 = vld [vmem:[%s577_s1 + $0x80] sm:$0xff]   ;;  %v453_v12 = vld [vmem:[%s577_s1 + $0x28] sm:$0xff]  }
   0x5   :  { %v451_v10 = vld [vmem:[%s577_s1 + $0x20] sm:$0xff]   ;;  %434 = vmatprep.subr.bf16.mxu1 %v456_v9  ;;  %v459_v13 = vld [vmem:[%s577_s1 + $0x88] sm:$0xff]   ;;  %v454_v14 = vld [vmem:[%s577_s1 + $0x70] sm:$0xff]  }
   0x6   :  { %435 = vmatpush3.bf16.msra.mxu1 %v456_v9  ;;  %v462_v15 = vld [vmem:[%s578_s0 + $0x4] ss:$12 sps:$4 sm:$0xff]   ;;  %v463_v16 = vld [vmem:[%s578_s0 + $0x8] ss:$12 sps:$4 sm:$0xff]   ;;  %v464_v17 = vld [vmem:[%s578_s0 + $0x20] ss:$12 sps:$4 sm:$0xff]  }
   0x7   :  { %405 = vmatpush3.bf16.msra.mxu0 %v445_v3  ;;  %436 = vmatprep.subr.bf16.mxu1 %v459_v13  ;;  %v455_v18 = vld [vmem:[%s577_s1 + $0x30] sm:$0xff]   ;;  %v457_v19 = vld [vmem:[%s577_s1 + $0x78] sm:$0xff]   ;;  %v460_v21 = vld [vmem:[%s578_s0] ss:$12 sps:$4 sm:$0xff]  }
   0x8   :  { %406 = vmatprep.subr.bf16.mxu0 %v446_v4  ;;  %239 = vmatprep.mubr.bf16.mxu0 %v462_v15  ;;  %v458_v20 = vld [vmem:[%s577_s1 + $0x38] sm:$0xff]   ;;  %v381_v33 = vld [vmem:[%s579_s2] ss:$0 sm:$0xff] }
   0x9   :  { %438 = vmatprep.mubr.msk.bf16.mxu1 %vm200_vm0, %v463_v16  ;;  %v465_v22 = vld [vmem:[%s578_s0 + $0x1c] ss:$12 sps:$4 sm:$0xff]   ;;  %v467_v23 = vld [vmem:[%s578_s0 + $0x18] ss:$12 sps:$4 sm:$0xff]   ;;  %v382_v36 = vld [vmem:[%s580_s3] ss:$0 sm:$0xff] }
   0xa   :  { %437 = vmatpush3.bf16.msra.mxu1 %v459_v13 }
   0xb   :  { %407 = vmatpush3.bf16.msra.mxu0 %v447_v5 }
   0xc   :  { %408 = vmatprep.subr.bf16.mxu0 %v448_v6 }
   0xd   :  { %439 = vmatmul.mubr.msk.bf16.vlgmr.msra.gmra.mrb[0].mxu1 %vm200_vm0, %v464_v17 }
   0xf   :  { %409 = vmatpush3.bf16.msra.mxu0 %v449_v7 }
  0x10   :  { %410 = vmatprep.subr.bf16.mxu0 %v450_v8 }
  0x13   :  { %411 = vmatpush3.bf16.msra.mxu0 %v451_v10 }
  0x14   :  { %412 = vmatprep.subr.bf16.mxu0 %v452_v11 }
  0x17   :  { %413 = vmatpush3.bf16.msra.mxu0 %v453_v12 }
  0x18   :  { %414 = vmatprep.subr.bf16.mxu0 %v454_v14 }
  0x1b   :  { %415 = vmatpush3.bf16.msra.mxu0 %v455_v18 }
  0x1c   :  { %416 = vmatprep.subr.bf16.mxu0 %v457_v19 }
  0x1f   :  { %417 = vmatpush3.bf16.msra.mxu0 %v458_v20 }
  0x22   :  { %240 = vmatmul.mubr.bf16.vlgmr.msra.gmra.mrb[0].mxu0 %v460_v21 }
  0x23   :  { %247 = vmatprep.mubr.bf16.mxu0 %v465_v22 }
  0x2a   :  { %248 = vmatmul.mubr.bf16.gmra.mrb[4].mxu0 %v467_v23 }
  0xe0   :  { %v440_v24 = vpop.f32.mrb[0].mxu1 }
  0xe1   :  { %v290_v25 = vpop.f32.mrb[1].mxu1 }
  0xe2   :  { %v441_v26 = vpop.f32.mrb[2].mxu1 }
  0xe3   :  { %v293_v27 = vpop.f32.mrb[3].mxu1 }
  0xf5   :  { %v418_v28 = vpop.f32.mrb[0].mxu0 }
  0xf6   :  { %v419_v29 = vpop.f32.mrb[1].mxu0 }
  0xf7   :  { %v420_v30 = vadd.f32 %v419_v29, %v418_v28  ;;  %v421_v31 = vpop.f32.mrb[2].mxu0 }
  0xf8   :  { %v422_v32 = vpop.f32.mrb[3].mxu0 }
  0xf9   :  { %v423_v34 = vadd.f32 %v422_v32, %v421_v31  ;;  %v291_v35 = vadd.f32 %v420_v30, %v290_v25 }
  0xfb   :  { %v312_v37 = vmul.f32 %v381_v33, %v291_v35  ;;  %v294_v38 = vadd.f32 %v423_v34, %v293_v27 }
  0xfd   :  { %v323_v39 = vadd.f32 %v382_v36, %v312_v37  ;;  %v313_v40 = vmul.f32 %v381_v33, %v294_v38  ;;  %v424_v41 = vpop.f32.mrb[4].mxu0 }
  0xfe   :  { %v425_v42 = vpop.f32.mrb[5].mxu0 }
  0xff   :  { %v324_v43 = vadd.f32 %v382_v36, %v313_v40  ;;  %v426_v44 = vadd.f32 %v425_v42, %v424_v41  ;;  %v427_v45 = vpop.f32.mrb[6].mxu0  ;;  %v327_v47 = vmax.f32 %v323_v39, 0.0 }
 0x100   :  { %v428_v46 = vpop.f32.mrb[7].mxu0 }
 0x101   :  { %v328_v48 = vmax.f32 %v324_v43, 0.0  ;;  %v299_v49 = vadd.f32 %v440_v24, %v426_v44  ;;  %v429_v50 = vadd.f32 %v428_v46, %v427_v45 }
 0x103   :  { %v394_v51 = vpack.c.bf16 %v328_v48, %v327_v47  ;;  %v314_v52 = vmul.f32 %v381_v33, %v299_v49  ;;  %v302_v53 = vadd.f32 %v441_v26, %v429_v50 }
 0x105   :  { %395 = vst [vmem:[%s581_s4] sm:$0xff] %v394_v51   ;;  %v325_v54 = vadd.f32 %v382_v36, %v314_v52  ;;  %v315_v55 = vmul.f32 %v381_v33, %v302_v53 }
 0x107   :  { %v326_v56 = vadd.f32 %v382_v36, %v315_v55  ;;  %v329_v57 = vmax.f32 %v325_v54, 0.0 }
 0x109   :  { %v330_v58 = vmax.f32 %v326_v56, 0.0 }
 0x10b   :  { %v399_v59 = vpack.c.bf16 %v330_v58, %v329_v57 }
 0x10d   :  { %401 = vst [vmem:[%s581_s4 + $0x8] sm:$0xff] %v399_v59  }

// kernel: _lambda_.9
= control target key start
LH: loop header
LB: loop body
LE: loop exit
PB: predicated region body
PF: predicated region fallthrough
CT: control target
= control target key end

     0   :  { %vm1888_vm0 = vcmask 523264   ;;  %s4229_s1 = inlined_call_operand.vmem [shape: bf16[3136,128], index: 1, kind: input, shape index: {}]   ;;  %s4230_s0 = inlined_call_operand.vmem [shape: bf16[32,3136], index: 0, kind: input, shape index: {}]   ;;  %s4231_s2 = inlined_call_operand.vmem [shape: f32[1,128], index: 2, kind: input, shape index: {}]   ;;  %s4232_s3 = inlined_call_operand.vmem [shape: f32[1,128], index: 3, kind: input, shape index: {}]   ;;  %s4233_s4 = inlined_call_operand.vmem [shape: f32[32,128], index: 4, kind: output, shape index: {}]  }
   0x1   :  { %v3170_v0 = vld [vmem:[%s4229_s1 + $0x40] sm:$0xff]   ;;  %v3174_v4 = vld [vmem:[%s4229_s1 + $0x48] sm:$0xff]   ;;  %v3178_v8 = vld [vmem:[%s4229_s1 + $0x50] sm:$0xff]  }
   0x2   :  { %v3171_v1 = vld [vmem:[%s4229_s1 + $0xc0] sm:$0xff]   ;;  %2816 = vmatprep.subr.bf16.mxu0 %v3170_v0  ;;  %v3175_v5 = vld [vmem:[%s4229_s1 + $0xc8] sm:$0xff]   ;;  %v3179_v9 = vld [vmem:[%s4229_s1 + $0xd0] sm:$0xff]  }
   0x3   :  { %v3172_v2 = vld [vmem:[%s4229_s1] sm:$0xff]   ;;  %2844 = vmatprep.subr.bf16.mxu1 %v3171_v1  ;;  %v3176_v6 = vld [vmem:[%s4229_s1 + $0x8] sm:$0xff]   ;;  %v3180_v10 = vld [vmem:[%s4229_s1 + $0x10] sm:$0xff]  }
   0x4   :  { %v3173_v3 = vld [vmem:[%s4229_s1 + $0x80] sm:$0xff]   ;;  %2817 = vmatpush3.bf16.msra.mxu0 %v3172_v2  ;;  %v3177_v7 = vld [vmem:[%s4229_s1 + $0x88] sm:$0xff]   ;;  %v3181_v11 = vld [vmem:[%s4229_s1 + $0x90] sm:$0xff]  }
   0x5   :  { %2845 = vmatpush3.bf16.msra.mxu1 %v3173_v3  ;;  %2818 = vmatprep.subr.bf16.mxu0 %v3174_v4  ;;  %v3182_v12 = vld [vmem:[%s4229_s1 + $0x58] sm:$0xff]   ;;  %v3186_v16 = vld [vmem:[%s4229_s1 + $0x60] sm:$0xff]   ;;  %v3190_v20 = vld [vmem:[%s4229_s1 + $0x68] sm:$0xff]  }
   0x6   :  { %2846 = vmatprep.subr.bf16.mxu1 %v3175_v5  ;;  %v3183_v13 = vld [vmem:[%s4229_s1 + $0xd8] sm:$0xff]   ;;  %v3187_v17 = vld [vmem:[%s4229_s1 + $0xe0] sm:$0xff]   ;;  %v3191_v21 = vld [vmem:[%s4229_s1 + $0xe8] sm:$0xff]  }
   0x7   :  { %v3184_v14 = vld [vmem:[%s4229_s1 + $0x18] sm:$0xff]   ;;  %v3188_v18 = vld [vmem:[%s4229_s1 + $0x20] sm:$0xff]   ;;  %v3192_v22 = vld [vmem:[%s4229_s1 + $0x28] sm:$0xff]  }
   0x8   :  { %2819 = vmatpush3.bf16.msra.mxu0 %v3176_v6  ;;  %v3185_v15 = vld [vmem:[%s4229_s1 + $0x98] sm:$0xff]   ;;  %v3189_v19 = vld [vmem:[%s4229_s1 + $0xa0] sm:$0xff]   ;;  %v3193_v23 = vld [vmem:[%s4229_s1 + $0xa8] sm:$0xff]  }
   0x9   :  { %2847 = vmatpush3.bf16.msra.mxu1 %v3177_v7  ;;  %2820 = vmatprep.subr.bf16.mxu0 %v3178_v8  ;;  %v3194_v24 = vld [vmem:[%s4229_s1 + $0x70] sm:$0xff]   ;;  %v3198_v28 = vld [vmem:[%s4229_s1 + $0x78] sm:$0xff]   ;;  %v3202_v32 = vld [vmem:[%s4230_s0] ss:$100 sps:$4 sm:$0xff]  }
   0xa   :  { %2848 = vmatprep.subr.bf16.mxu1 %v3179_v9  ;;  %v3195_v25 = vld [vmem:[%s4229_s1 + $0xf0] sm:$0xff]   ;;  %v3199_v29 = vld [vmem:[%s4229_s1 + $0xf8] sm:$0xff]   ;;  %v3204_v33 = vld [vmem:[%s4230_s0 + $0x4] ss:$100 sps:$4 sm:$0xff]  }
   0xb   :  { %v3196_v26 = vld [vmem:[%s4229_s1 + $0x30] sm:$0xff]   ;;  %v3200_v30 = vld [vmem:[%s4229_s1 + $0x38] sm:$0xff]   ;;  %v3205_v34 = vld [vmem:[%s4230_s0 + $0x8] ss:$100 sps:$4 sm:$0xff]   ;;  %1927 = vmatprep.mubr.bf16.mxu0 %v3204_v33 }
   0xc   :  { %2821 = vmatpush3.bf16.msra.mxu0 %v3180_v10  ;;  %v3197_v27 = vld [vmem:[%s4229_s1 + $0xb0] sm:$0xff]   ;;  %v3201_v31 = vld [vmem:[%s4229_s1 + $0xb8] sm:$0xff]   ;;  %v3208_v36 = vld [vmem:[%s4229_s1 + $0x140] sm:$0xff]  }
   0xd   :  { %2849 = vmatpush3.bf16.msra.mxu1 %v3181_v11  ;;  %2822 = vmatprep.subr.bf16.mxu0 %v3182_v12  ;;  %v3207_v35 = vld [vmem:[%s4230_s0 + $0xc] ss:$100 sps:$4 sm:$0xff]   ;;  %v3209_v37 = vld [vmem:[%s4229_s1 + $0x100] sm:$0xff]   ;;  %v3220_v48 = vld [vmem:[%s4229_s1 + $0x158] sm:$0xff]  }
   0xe   :  { %2850 = vmatprep.subr.bf16.mxu1 %v3183_v13  ;;  %1976 = vmatprep.mubr.bf16.mxu1 %v3207_v35  ;;  %v3210_v38 = vld [vmem:[%s4229_s1 + $0x1c0] sm:$0xff]   ;;  %v3212_v40 = vld [vmem:[%s4229_s1 + $0x148] sm:$0xff]   ;;  %v3216_v44 = vld [vmem:[%s4229_s1 + $0x150] sm:$0xff]  }
   0xf   :  { %v3211_v39 = vld [vmem:[%s4229_s1 + $0x180] sm:$0xff]   ;;  %v3213_v41 = vld [vmem:[%s4229_s1 + $0x108] sm:$0xff]   ;;  %v3217_v45 = vld [vmem:[%s4229_s1 + $0x110] sm:$0xff]  }
  0x10   :  { %2823 = vmatpush3.bf16.msra.mxu0 %v3184_v14  ;;  %v3214_v42 = vld [vmem:[%s4229_s1 + $0x1c8] sm:$0xff]   ;;  %v3218_v46 = vld [vmem:[%s4229_s1 + $0x1d0] sm:$0xff]   ;;  %v3221_v49 = vld [vmem:[%s4229_s1 + $0x118] sm:$0xff]  }
  0x11   :  { %2851 = vmatpush3.bf16.msra.mxu1 %v3185_v15  ;;  %2824 = vmatprep.subr.bf16.mxu0 %v3186_v16  ;;  %v3215_v43 = vld [vmem:[%s4229_s1 + $0x188] sm:$0xff]   ;;  %v3219_v47 = vld [vmem:[%s4229_s1 + $0x190] sm:$0xff]   ;;  %v3222_v50 = vld [vmem:[%s4229_s1 + $0x1d8] sm:$0xff]  }
  0x12   :  { %2852 = vmatprep.subr.bf16.mxu1 %v3187_v17  ;;  %v3223_v51 = vld [vmem:[%s4229_s1 + $0x198] sm:$0xff]   ;;  %v3224_v52 = vld [vmem:[%s4229_s1 + $0x160] sm:$0xff]   ;;  %v3228_v56 = vld [vmem:[%s4229_s1 + $0x168] sm:$0xff]  }
  0x13   :  { %v3225_v53 = vld [vmem:[%s4229_s1 + $0x120] sm:$0xff]   ;;  %v3229_v57 = vld [vmem:[%s4230_s0 + $0xcc] ss:$100 sps:$4 sm:$0xff]   ;;  %v3231_v58 = vld [vmem:[%s4230_s0 + $0xd4] ss:$100 sps:$4 sm:$0xff]  }
  0x14   :  { %2825 = vmatpush3.bf16.msra.mxu0 %v3188_v18  ;;  %v3226_v54 = vld [vmem:[%s4229_s1 + $0x1e0] sm:$0xff]   ;;  %v3233_v59 = vld [vmem:[%s4229_s1 + $0x128] sm:$0xff]   ;;  %v3235_v61 = vld [vmem:[%s4230_s0 + $0xd0] ss:$100 sps:$4 sm:$0xff]  }
  0x15   :  { %2853 = vmatpush3.bf16.msra.mxu1 %v3189_v19  ;;  %2826 = vmatprep.subr.bf16.mxu0 %v3190_v20  ;;  %v3227_v55 = vld [vmem:[%s4229_s1 + $0x1a0] sm:$0xff]   ;;  %v3234_v60 = vld [vmem:[%s4230_s0 + $0xc8] ss:$100 sps:$4 sm:$0xff]   ;;  %v3238_v0 = vld [vmem:[%s4229_s1 + $0x170] sm:$0xff]  }
  0x16   :  { %2854 = vmatprep.subr.bf16.mxu1 %v3191_v21  ;;  %v3236_v62 = vld [vmem:[%s4229_s1 + $0x1e8] sm:$0xff]   ;;  %v3239_v1 = vld [vmem:[%s4229_s1 + $0x130] sm:$0xff]   ;;  %v3242_v4 = vld [vmem:[%s4229_s1 + $0x178] sm:$0xff]  }
  0x17   :  { %v3237_v63 = vld [vmem:[%s4229_s1 + $0x1a8] sm:$0xff]   ;;  %v3240_v2 = vld [vmem:[%s4229_s1 + $0x1f0] sm:$0xff]   ;;  %v3243_v5 = vld [vmem:[%s4229_s1 + $0x138] sm:$0xff]  }
  0x18   :  { %2827 = vmatpush3.bf16.msra.mxu0 %v3192_v22  ;;  %v3241_v3 = vld [vmem:[%s4229_s1 + $0x1b0] sm:$0xff]   ;;  %v3244_v6 = vld [vmem:[%s4229_s1 + $0x1f8] sm:$0xff]   ;;  %v3249_v10 = vld [vmem:[%s4229_s1 + $0x240] sm:$0xff]  }
  0x19   :  { %2855 = vmatpush3.bf16.msra.mxu1 %v3193_v23  ;;  %2828 = vmatprep.subr.bf16.mxu0 %v3194_v24  ;;  %v3245_v7 = vld [vmem:[%s4230_s0 + $0x10] ss:$100 sps:$4 sm:$0xff]   ;;  %v3248_v9 = vld [vmem:[%s4229_s1 + $0x1b8] sm:$0xff]   ;;  %v3253_v13 = vld [vmem:[%s4229_s1 + $0x200] sm:$0xff]  }
  0x1a   :  { %2856 = vmatprep.subr.bf16.mxu1 %v3195_v25  ;;  %v3247_v8 = vld [vmem:[%s4230_s0 + $0x14] ss:$100 sps:$4 sm:$0xff]   ;;  %v3252_v12 = vld [vmem:[%s4230_s0 + $0x1c] ss:$100 sps:$4 sm:$0xff]   ;;  %v3256_v16 = vld [vmem:[%s4229_s1 + $0x248] sm:$0xff]  }
  0x1b   :  { %v3250_v11 = vld [vmem:[%s4230_s0 + $0x18] ss:$100 sps:$4 sm:$0xff]   ;;  %v3254_v14 = vld [vmem:[%s4229_s1 + $0x2c0] sm:$0xff]   ;;  %v3257_v17 = vld [vmem:[%s4229_s1 + $0x208] sm:$0xff]  }
  0x1c   :  { %2829 = vmatpush3.bf16.msra.mxu0 %v3196_v26  ;;  %v3255_v15 = vld [vmem:[%s4229_s1 + $0x280] sm:$0xff]   ;;  %v3258_v18 = vld [vmem:[%s4229_s1 + $0x2c8] sm:$0xff]   ;;  %v3262_v21 = vld [vmem:[%s4230_s0 + $0xd8] ss:$100 sps:$4 sm:$0xff]  }
  0x1d   :  { %2857 = vmatpush3.bf16.msra.mxu1 %v3197_v27  ;;  %2830 = vmatprep.subr.bf16.mxu0 %v3198_v28  ;;  %v3259_v19 = vld [vmem:[%s4230_s0 + $0xdc] ss:$100 sps:$4 sm:$0xff]   ;;  %v3261_v20 = vld [vmem:[%s4229_s1 + $0x288] sm:$0xff]   ;;  %v3263_v22 = vld [vmem:[%s4229_s1 + $0x250] sm:$0xff]  }
  0x1e   :  { %2858 = vmatprep.subr.bf16.mxu1 %v3199_v29  ;;  %v3264_v23 = vld [vmem:[%s4230_s0 + $0xe4] ss:$100 sps:$4 sm:$0xff]   ;;  %v3266_v24 = vld [vmem:[%s4229_s1 + $0x210] sm:$0xff]   ;;  %v3270_v28 = vld [vmem:[%s4229_s1 + $0x258] sm:$0xff]  }
  0x1f   :  { %v3267_v25 = vld [vmem:[%s4230_s0 + $0xe0] ss:$100 sps:$4 sm:$0xff]   ;;  %v3268_v26 = vld [vmem:[%s4229_s1 + $0x2d0] sm:$0xff]   ;;  %v3271_v29 = vld [vmem:[%s4229_s1 + $0x218] sm:$0xff]  }
  0x20   :  { %2831 = vmatpush3.bf16.msra.mxu0 %v3200_v30  ;;  %v3269_v27 = vld [vmem:[%s4229_s1 + $0x290] sm:$0xff]   ;;  %v3272_v30 = vld [vmem:[%s4229_s1 + $0x2d8] sm:$0xff]   ;;  %v3275_v33 = vld [vmem:[%s4229_s1 + $0x220] sm:$0xff]  }
  0x21   :  { %2859 = vmatpush3.bf16.msra.mxu1 %v3201_v31  ;;  %2872 = vmatprep.subr.bf16.mxu0 %v3208_v36  ;;  %v3273_v31 = vld [vmem:[%s4229_s1 + $0x298] sm:$0xff]   ;;  %v3277_v35 = vld [vmem:[%s4229_s1 + $0x2a0] sm:$0xff]   ;;  %v3278_v36 = vld [vmem:[%s4229_s1 + $0x268] sm:$0xff]  }
  0x22   :  { %2900 = vmatprep.subr.bf16.mxu1 %v3210_v38  ;;  %v3280_v38 = vld [vmem:[%s4229_s1 + $0x2e8] sm:$0xff]  }
  0x23   :  { %1928 = vmatmul.mubr.bf16.vlgmr.msra.gmra.mrb[0].mxu0 %v3202_v32  ;;  %v3274_v32 = vld [vmem:[%s4229_s1 + $0x260] sm:$0xff]  }
  0x24   :  { %1977 = vmatmul.mubr.bf16.vlgmr.msra.gmra.mrb[0].mxu1 %v3205_v34  ;;  %2873 = vmatpush3.bf16.msra.mxu0 %v3209_v37  ;;  %v3276_v34 = vld [vmem:[%s4229_s1 + $0x2e0] sm:$0xff]   ;;  %v3279_v37 = vld [vmem:[%s4229_s1 + $0x228] sm:$0xff]  }
  0x25   :  { %2901 = vmatpush3.bf16.msra.mxu1 %v3211_v39  ;;  %2874 = vmatprep.subr.bf16.mxu0 %v3212_v40  ;;  %v3281_v39 = vld [vmem:[%s4229_s1 + $0x2a8] sm:$0xff]   ;;  %v3282_v40 = vld [vmem:[%s4229_s1 + $0x270] sm:$0xff]  }
  0x26   :  { %2902 = vmatprep.subr.bf16.mxu1 %v3214_v42  ;;  %1935 = vmatprep.mubr.bf16.mxu0 %v3229_v57  ;;  %v3284_v42 = vld [vmem:[%s4229_s1 + $0x2f0] sm:$0xff]   ;;  %v3301_v57 = vld [vmem:[%s4229_s1 + $0x308] sm:$0xff]  }
  0x27   :  { %1984 = vmatprep.mubr.bf16.mxu1 %v3231_v58  ;;  %v3302_v58 = vld [vmem:[%s4229_s1 + $0x3c8] sm:$0xff]  }
  0x28   :  { %2875 = vmatpush3.bf16.msra.mxu0 %v3213_v41  ;;  %v3283_v41 = vld [vmem:[%s4229_s1 + $0x230] sm:$0xff]  }
  0x29   :  { %2903 = vmatpush3.bf16.msra.mxu1 %v3215_v43  ;;  %2876 = vmatprep.subr.bf16.mxu0 %v3216_v44  ;;  %v3285_v43 = vld [vmem:[%s4229_s1 + $0x2b0] sm:$0xff]   ;;  %v3286_v44 = vld [vmem:[%s4229_s1 + $0x278] sm:$0xff]  }
  0x2a   :  { %2904 = vmatprep.subr.bf16.mxu1 %v3218_v46  ;;  %v3288_v46 = vld [vmem:[%s4229_s1 + $0x2f8] sm:$0xff]  }
  0x2b   :  { %1936 = vmatmul.mubr.bf16.gmra.mrb[4].mxu0 %v3234_v60  ;;  %v3305_v60 = vld [vmem:[%s4229_s1 + $0x388] sm:$0xff]  }
  0x2c   :  { %2877 = vmatpush3.bf16.msra.mxu0 %v3217_v45  ;;  %1985 = vmatmul.mubr.bf16.gmra.mrb[4].mxu1 %v3235_v61  ;;  %v3287_v45 = vld [vmem:[%s4229_s1 + $0x238] sm:$0xff]   ;;  %v3306_v61 = vld [vmem:[%s4230_s0 + $0xe8] ss:$100 sps:$4 sm:$0xff]  }
  0x2d   :  { %2905 = vmatpush3.bf16.msra.mxu1 %v3219_v47  ;;  %2878 = vmatprep.subr.bf16.mxu0 %v3220_v48  ;;  %v3289_v47 = vld [vmem:[%s4230_s0 + $0x20] ss:$100 sps:$4 sm:$0xff]  }
  0x2e   :  { %2906 = vmatprep.subr.bf16.mxu1 %v3222_v50  ;;  %2025 = vmatprep.mubr.bf16.mxu0 %v3247_v8  ;;  %v3291_v48 = vld [vmem:[%s4230_s0 + $0x24] ss:$100 sps:$4 sm:$0xff]  }
  0x2f   :  { %2074 = vmatprep.mubr.bf16.mxu1 %v3252_v12  ;;  %v3293_v50 = vld [vmem:[%s4229_s1 + $0x340] sm:$0xff]   ;;  %v3322_v12 = vld [vmem:[%s4229_s1 + $0x368] sm:$0xff]  }
  0x30   :  { %2879 = vmatpush3.bf16.msra.mxu0 %v3221_v49  ;;  %v3292_v49 = vld [vmem:[%s4229_s1 + $0x2b8] sm:$0xff]   ;;  %v3318_v8 = vld [vmem:[%s4229_s1 + $0x360] sm:$0xff]  }
  0x31   :  { %2907 = vmatpush3.bf16.msra.mxu1 %v3223_v51  ;;  %2880 = vmatprep.subr.bf16.mxu0 %v3224_v52  ;;  %v3294_v51 = vld [vmem:[%s4230_s0 + $0x28] ss:$100 sps:$4 sm:$0xff]  }
  0x32   :  { %2908 = vmatprep.subr.bf16.mxu1 %v3226_v54  ;;  %v3296_v52 = vld [vmem:[%s4230_s0 + $0x2c] ss:$100 sps:$4 sm:$0xff]   ;;  %v3298_v54 = vld [vmem:[%s4229_s1 + $0x3c0] sm:$0xff]  }
  0x34   :  { %2881 = vmatpush3.bf16.msra.mxu0 %v3225_v53  ;;  %v3297_v53 = vld [vmem:[%s4229_s1 + $0x300] sm:$0xff]  }
  0x35   :  { %2909 = vmatpush3.bf16.msra.mxu1 %v3227_v55  ;;  %2882 = vmatprep.subr.bf16.mxu0 %v3228_v56  ;;  %v3299_v55 = vld [vmem:[%s4229_s1 + $0x380] sm:$0xff]   ;;  %v3300_v56 = vld [vmem:[%s4229_s1 + $0x348] sm:$0xff]  }
  0x36   :  { %2910 = vmatprep.subr.bf16.mxu1 %v3236_v62  ;;  %v3307_v62 = vld [vmem:[%s4229_s1 + $0x350] sm:$0xff]  }
  0x38   :  { %2883 = vmatpush3.bf16.msra.mxu0 %v3233_v59  ;;  %v3303_v59 = vld [vmem:[%s4230_s0 + $0xec] ss:$100 sps:$4 sm:$0xff]  }
  0x39   :  { %2911 = vmatpush3.bf16.msra.mxu1 %v3237_v63  ;;  %2884 = vmatprep.subr.bf16.mxu0 %v3238_v0  ;;  %v3308_v63 = vld [vmem:[%s4230_s0 + $0xf4] ss:$100 sps:$4 sm:$0xff]  }
  0x3a   :  { %2912 = vmatprep.subr.bf16.mxu1 %v3240_v2  ;;  %v3310_v0 = vld [vmem:[%s4229_s1 + $0x310] sm:$0xff]  }
  0x3b   :  { %v3312_v2 = vld [vmem:[%s4229_s1 + $0x3d0] sm:$0xff]  }
  0x3c   :  { %2885 = vmatpush3.bf16.msra.mxu0 %v3239_v1  ;;  %v3311_v1 = vld [vmem:[%s4230_s0 + $0xf0] ss:$100 sps:$4 sm:$0xff]  }
  0x3d   :  { %2913 = vmatpush3.bf16.msra.mxu1 %v3241_v3  ;;  %2886 = vmatprep.subr.bf16.mxu0 %v3242_v4  ;;  %v3313_v3 = vld [vmem:[%s4229_s1 + $0x390] sm:$0xff]   ;;  %v3314_v4 = vld [vmem:[%s4229_s1 + $0x358] sm:$0xff]  }
  0x3e   :  { %2914 = vmatprep.subr.bf16.mxu1 %v3244_v6  ;;  %v3316_v6 = vld [vmem:[%s4229_s1 + $0x3d8] sm:$0xff]  }
  0x40   :  { %2887 = vmatpush3.bf16.msra.mxu0 %v3243_v5  ;;  %v3315_v5 = vld [vmem:[%s4229_s1 + $0x318] sm:$0xff]  }
  0x41   :  { %2915 = vmatpush3.bf16.msra.mxu1 %v3248_v9  ;;  %2928 = vmatprep.subr.bf16.mxu0 %v3249_v10  ;;  %v3319_v9 = vld [vmem:[%s4229_s1 + $0x320] sm:$0xff]  }
  0x42   :  { %2956 = vmatprep.subr.bf16.mxu1 %v3254_v14  ;;  %v3320_v10 = vld [vmem:[%s4229_s1 + $0x3e0] sm:$0xff]   ;;  %v3324_v14 = vld [vmem:[%s4229_s1 + $0x3e8] sm:$0xff]  }
  0x43   :  { %2026 = vmatmul.mubr.bf16.vlgmr.msra.gmra.mrb[8].mxu0 %v3245_v7  ;;  %v3317_v7 = vld [vmem:[%s4229_s1 + $0x398] sm:$0xff]  }
  0x44   :  { %2929 = vmatpush3.bf16.msra.mxu0 %v3253_v13  ;;  %2075 = vmatmul.mubr.bf16.vlgmr.msra.gmra.mrb[8].mxu1 %v3250_v11  ;;  %v3321_v11 = vld [vmem:[%s4229_s1 + $0x3a0] sm:$0xff]   ;;  %v3323_v13 = vld [vmem:[%s4229_s1 + $0x328] sm:$0xff]  }
  0x45   :  { %2957 = vmatpush3.bf16.msra.mxu1 %v3255_v15  ;;  %2930 = vmatprep.subr.bf16.mxu0 %v3256_v16  ;;  %v3325_v15 = vld [vmem:[%s4229_s1 + $0x3a8] sm:$0xff]   ;;  %v3326_v16 = vld [vmem:[%s4229_s1 + $0x370] sm:$0xff]  }
  0x46   :  { %2958 = vmatprep.subr.bf16.mxu1 %v3258_v18  ;;  %2033 = vmatprep.mubr.bf16.mxu0 %v3259_v19  ;;  %v3328_v18 = vld [vmem:[%s4229_s1 + $0x3f0] sm:$0xff]  }
  0x47   :  { %2082 = vmatprep.mubr.bf16.mxu1 %v3264_v23  ;;  %v3329_v19 = vld [vmem:[%s4229_s1 + $0x3b0] sm:$0xff]  }
  0x48   :  { %2931 = vmatpush3.bf16.msra.mxu0 %v3257_v17  ;;  %v3327_v17 = vld [vmem:[%s4229_s1 + $0x330] sm:$0xff]  }
  0x49   :  { %2959 = vmatpush3.bf16.msra.mxu1 %v3261_v20  ;;  %2932 = vmatprep.subr.bf16.mxu0 %v3263_v22  ;;  %v3330_v20 = vld [vmem:[%s4229_s1 + $0x378] sm:$0xff]   ;;  %v3333_v23 = vld [vmem:[%s4230_s0 + $0x30] ss:$100 sps:$4 sm:$0xff]  }
  0x4a   :  { %2960 = vmatprep.subr.bf16.mxu1 %v3268_v26  ;;  %v3332_v22 = vld [vmem:[%s4229_s1 + $0x3f8] sm:$0xff]   ;;  %v3337_v26 = vld [vmem:[%s4229_s1 + $0x440] sm:$0xff]  }
  0x4b   :  { %2034 = vmatmul.mubr.bf16.gmra.mrb[12].mxu0 %v3262_v21  ;;  %v3331_v21 = vld [vmem:[%s4229_s1 + $0x338] sm:$0xff]  }
  0x4c   :  { %2933 = vmatpush3.bf16.msra.mxu0 %v3266_v24  ;;  %2083 = vmatmul.mubr.bf16.gmra.mrb[12].mxu1 %v3267_v25  ;;  %v3335_v24 = vld [vmem:[%s4230_s0 + $0x34] ss:$100 sps:$4 sm:$0xff]  }
  0x4d   :  { %2961 = vmatpush3.bf16.msra.mxu1 %v3269_v27  ;;  %2934 = vmatprep.subr.bf16.mxu0 %v3270_v28  ;;  %v3336_v25 = vld [vmem:[%s4229_s1 + $0x3b8] sm:$0xff]  }
  0x4e   :  { %2962 = vmatprep.subr.bf16.mxu1 %v3272_v30  ;;  %2123 = vmatprep.mubr.bf16.mxu0 %v3291_v48  ;;  %v3338_v27 = vld [vmem:[%s4230_s0 + $0x38] ss:$100 sps:$4 sm:$0xff]   ;;  %v3342_v30 = vld [vmem:[%s4229_s1 + $0x4c0] sm:$0xff]  }
  0x4f   :  { %2172 = vmatprep.mubr.bf16.mxu1 %v3296_v52  ;;  %v3340_v28 = vld [vmem:[%s4230_s0 + $0x3c] ss:$100 sps:$4 sm:$0xff]   ;;  %v3366_v52 = vld [vmem:[%s4229_s1 + $0x468] sm:$0xff]  }
  0x50   :  { %2935 = vmatpush3.bf16.msra.mxu0 %v3271_v29  ;;  %v3341_v29 = vld [vmem:[%s4229_s1 + $0x400] sm:$0xff]  }
  0x51   :  { %2963 = vmatpush3.bf16.msra.mxu1 %v3273_v31  ;;  %2936 = vmatprep.subr.bf16.mxu0 %v3274_v32  ;;  %v3343_v31 = vld [vmem:[%s4229_s1 + $0x480] sm:$0xff]   ;;  %v3344_v32 = vld [vmem:[%s4229_s1 + $0x448] sm:$0xff]  }
  0x52   :  { %2964 = vmatprep.subr.bf16.mxu1 %v3276_v34  ;;  %v3346_v34 = vld [vmem:[%s4229_s1 + $0x4c8] sm:$0xff]   ;;  %v3362_v48 = vld [vmem:[%s4229_s1 + $0x460] sm:$0xff]  }
  0x54   :  { %2937 = vmatpush3.bf16.msra.mxu0 %v3275_v33  ;;  %v3345_v33 = vld [vmem:[%s4229_s1 + $0x408] sm:$0xff]  }
  0x55   :  { %2965 = vmatpush3.bf16.msra.mxu1 %v3277_v35  ;;  %2938 = vmatprep.subr.bf16.mxu0 %v3278_v36  ;;  %v3347_v35 = vld [vmem:[%s4230_s0 + $0xfc] ss:$100 sps:$4 sm:$0xff]   ;;  %v3349_v36 = vld [vmem:[%s4229_s1 + $0x488] sm:$0xff]  }
  0x56   :  { %2966 = vmatprep.subr.bf16.mxu1 %v3280_v38  ;;  %v3351_v38 = vld [vmem:[%s4229_s1 + $0x450] sm:$0xff]  }
  0x58   :  { %2939 = vmatpush3.bf16.msra.mxu0 %v3279_v37  ;;  %v3350_v37 = vld [vmem:[%s4230_s0 + $0xf8] ss:$100 sps:$4 sm:$0xff]  }
  0x59   :  { %2967 = vmatpush3.bf16.msra.mxu1 %v3281_v39  ;;  %2940 = vmatprep.subr.bf16.mxu0 %v3282_v40  ;;  %v3352_v39 = vld [vmem:[%s4230_s0 + $0x104] ss:$100 sps:$4 sm:$0xff]   ;;  %v3354_v40 = vld [vmem:[%s4229_s1 + $0x410] sm:$0xff]  }
  0x5a   :  { %2968 = vmatprep.subr.bf16.mxu1 %v3284_v42  ;;  %v3356_v42 = vld [vmem:[%s4229_s1 + $0x4d0] sm:$0xff]  }
  0x5c   :  { %2941 = vmatpush3.bf16.msra.mxu0 %v3283_v41  ;;  %v3355_v41 = vld [vmem:[%s4230_s0 + $0x100] ss:$100 sps:$4 sm:$0xff]  }
  0x5d   :  { %2969 = vmatpush3.bf16.msra.mxu1 %v3285_v43  ;;  %2942 = vmatprep.subr.bf16.mxu0 %v3286_v44  ;;  %v3357_v43 = vld [vmem:[%s4229_s1 + $0x490] sm:$0xff]   ;;  %v3358_v44 = vld [vmem:[%s4229_s1 + $0x458] sm:$0xff]  }
  0x5e   :  { %2970 = vmatprep.subr.bf16.mxu1 %v3288_v46  ;;  %v3360_v46 = vld [vmem:[%s4229_s1 + $0x4d8] sm:$0xff]  }
  0x60   :  { %2943 = vmatpush3.bf16.msra.mxu0 %v3287_v45  ;;  %v3359_v45 = vld [vmem:[%s4229_s1 + $0x418] sm:$0xff]  }
  0x61   :  { %2971 = vmatpush3.bf16.msra.mxu1 %v3292_v49  ;;  %2984 = vmatprep.subr.bf16.mxu0 %v3293_v50  ;;  %v3363_v49 = vld [vmem:[%s4229_s1 + $0x420] sm:$0xff]  }
  0x62   :  { %3012 = vmatprep.subr.bf16.mxu1 %v3298_v54  ;;  %v3364_v50 = vld [vmem:[%s4229_s1 + $0x4e0] sm:$0xff]   ;;  %v3368_v54 = vld [vmem:[%s4229_s1 + $0x4e8] sm:$0xff]  }
  0x63   :  { %2124 = vmatmul.mubr.bf16.vlgmr.msra.gmra.mrb[16].mxu0 %v3289_v47  ;;  %v3361_v47 = vld [vmem:[%s4229_s1 + $0x498] sm:$0xff]  }
  0x64   :  { %2985 = vmatpush3.bf16.msra.mxu0 %v3297_v53  ;;  %2173 = vmatmul.mubr.bf16.vlgmr.msra.gmra.mrb[16].mxu1 %v3294_v51  ;;  %v3365_v51 = vld [vmem:[%s4229_s1 + $0x4a0] sm:$0xff]   ;;  %v3367_v53 = vld [vmem:[%s4229_s1 + $0x428] sm:$0xff]  }
  0x65   :  { %3013 = vmatpush3.bf16.msra.mxu1 %v3299_v55  ;;  %2986 = vmatprep.subr.bf16.mxu0 %v3300_v56  ;;  %v3369_v55 = vld [vmem:[%s4229_s1 + $0x4a8] sm:$0xff]   ;;  %v3370_v56 = vld [vmem:[%s4229_s1 + $0x470] sm:$0xff]  }
  0x66   :  { %3014 = vmatprep.subr.bf16.mxu1 %v3302_v58  ;;  %2131 = vmatprep.mubr.bf16.mxu0 %v3303_v59  ;;  %v3372_v58 = vld [vmem:[%s4229_s1 + $0x4f0] sm:$0xff]  }
  0x67   :  { %2180 = vmatprep.mubr.bf16.mxu1 %v3308_v63  ;;  %v3373_v59 = vld [vmem:[%s4229_s1 + $0x4b0] sm:$0xff]   ;;  %v3377_v63 = vld [vmem:[%s4230_s0 + $0x40] ss:$100 sps:$4 sm:$0xff]  }
  0x68   :  { %2987 = vmatpush3.bf16.msra.mxu0 %v3301_v57  ;;  %v3371_v57 = vld [vmem:[%s4229_s1 + $0x430] sm:$0xff]  }
  0x69   :  { %3015 = vmatpush3.bf16.msra.mxu1 %v3305_v60  ;;  %2988 = vmatprep.subr.bf16.mxu0 %v3307_v62  ;;  %v3374_v60 = vld [vmem:[%s4229_s1 + $0x478] sm:$0xff]  }
  0x6a   :  { %3016 = vmatprep.subr.bf16.mxu1 %v3312_v2  ;;  %v3376_v62 = vld [vmem:[%s4229_s1 + $0x4f8] sm:$0xff]   ;;  %v3381_v2 = vld [vmem:[%s4229_s1 + $0x540] sm:$0xff]  }
  0x6b   :  { %2132 = vmatmul.mubr.bf16.gmra.mrb[20].mxu0 %v3306_v61  ;;  %v3375_v61 = vld [vmem:[%s4229_s1 + $0x438] sm:$0xff]  }
  0x6c   :  { %2989 = vmatpush3.bf16.msra.mxu0 %v3310_v0  ;;  %2181 = vmatmul.mubr.bf16.gmra.mrb[20].mxu1 %v3311_v1  ;;  %v3379_v0 = vld [vmem:[%s4230_s0 + $0x44] ss:$100 sps:$4 sm:$0xff]   ;;  %v3380_v1 = vld [vmem:[%s4229_s1 + $0x4b8] sm:$0xff]  }
  0x6d   :  { %3017 = vmatpush3.bf16.msra.mxu1 %v3313_v3  ;;  %2990 = vmatprep.subr.bf16.mxu0 %v3314_v4  ;;  %v3382_v3 = vld [vmem:[%s4230_s0 + $0x48] ss:$100 sps:$4 sm:$0xff]  }
  0x6e   :  { %3018 = vmatprep.subr.bf16.mxu1 %v3316_v6  ;;  %2221 = vmatprep.mubr.bf16.mxu0 %v3335_v24  ;;  %v3384_v4 = vld [vmem:[%s4230_s0 + $0x4c] ss:$100 sps:$4 sm:$0xff]   ;;  %v3386_v6 = vld [vmem:[%s4229_s1 + $0x5c0] sm:$0xff]  }
  0x6f   :  { %2270 = vmatprep.mubr.bf16.mxu1 %v3340_v28  ;;  %v3406_v24 = vld [vmem:[%s4229_s1 + $0x560] sm:$0xff]   ;;  %v3410_v28 = vld [vmem:[%s4229_s1 + $0x568] sm:$0xff]  }
  0x70   :  { %2991 = vmatpush3.bf16.msra.mxu0 %v3315_v5  ;;  %v3385_v5 = vld [vmem:[%s4229_s1 + $0x500] sm:$0xff]  }
  0x71   :  { %3019 = vmatpush3.bf16.msra.mxu1 %v3317_v7  ;;  %2992 = vmatprep.subr.bf16.mxu0 %v3318_v8  ;;  %v3387_v7 = vld [vmem:[%s4229_s1 + $0x580] sm:$0xff]   ;;  %v3388_v8 = vld [vmem:[%s4229_s1 + $0x548] sm:$0xff]  }
  0x72   :  { %3020 = vmatprep.subr.bf16.mxu1 %v3320_v10  ;;  %v3390_v10 = vld [vmem:[%s4229_s1 + $0x5c8] sm:$0xff]  }
  0x74   :  { %2993 = vmatpush3.bf16.msra.mxu0 %v3319_v9  ;;  %v3389_v9 = vld [vmem:[%s4229_s1 + $0x508] sm:$0xff]  }
  0x75   :  { %3021 = vmatpush3.bf16.msra.mxu1 %v3321_v11  ;;  %2994 = vmatprep.subr.bf16.mxu0 %v3322_v12  ;;  %v3391_v11 = vld [vmem:[%s4230_s0 + $0x10c] ss:$100 sps:$4 sm:$0xff]  }
  0x76   :  { %3022 = vmatprep.subr.bf16.mxu1 %v3324_v14  ;;  %v3393_v12 = vld [vmem:[%s4229_s1 + $0x588] sm:$0xff]   ;;  %v3395_v14 = vld [vmem:[%s4229_s1 + $0x550] sm:$0xff]  }
  0x78   :  { %2995 = vmatpush3.bf16.msra.mxu0 %v3323_v13  ;;  %v3394_v13 = vld [vmem:[%s4230_s0 + $0x108] ss:$100 sps:$4 sm:$0xff]  }
  0x79   :  { %3023 = vmatpush3.bf16.msra.mxu1 %v3325_v15  ;;  %2996 = vmatprep.subr.bf16.mxu0 %v3326_v16  ;;  %v3396_v15 = vld [vmem:[%s4230_s0 + $0x114] ss:$100 sps:$4 sm:$0xff]  }
  0x7a   :  { %3024 = vmatprep.subr.bf16.mxu1 %v3328_v18  ;;  %v3398_v16 = vld [vmem:[%s4229_s1 + $0x510] sm:$0xff]  }
  0x7b   :  { %v3400_v18 = vld [vmem:[%s4229_s1 + $0x5d0] sm:$0xff]  }
  0x7c   :  { %2997 = vmatpush3.bf16.msra.mxu0 %v3327_v17  ;;  %v3399_v17 = vld [vmem:[%s4230_s0 + $0x110] ss:$100 sps:$4 sm:$0xff]  }
  0x7d   :  { %3025 = vmatpush3.bf16.msra.mxu1 %v3329_v19  ;;  %2998 = vmatprep.subr.bf16.mxu0 %v3330_v20  ;;  %v3401_v19 = vld [vmem:[%s4229_s1 + $0x590] sm:$0xff]   ;;  %v3402_v20 = vld [vmem:[%s4229_s1 + $0x558] sm:$0xff]  }
  0x7e   :  { %3026 = vmatprep.subr.bf16.mxu1 %v3332_v22  ;;  %v3404_v22 = vld [vmem:[%s4229_s1 + $0x5d8] sm:$0xff]  }
  0x80   :  { %2999 = vmatpush3.bf16.msra.mxu0 %v3331_v21  ;;  %v3403_v21 = vld [vmem:[%s4229_s1 + $0x518] sm:$0xff]  }
  0x81   :  { %3027 = vmatpush3.bf16.msra.mxu1 %v3336_v25  ;;  %3040 = vmatprep.subr.bf16.mxu0 %v3337_v26  ;;  %v3407_v25 = vld [vmem:[%s4229_s1 + $0x520] sm:$0xff]  }
  0x82   :  { %3068 = vmatprep.subr.bf16.mxu1 %v3342_v30  ;;  %v3408_v26 = vld [vmem:[%s4229_s1 + $0x5e0] sm:$0xff]   ;;  %v3412_v30 = vld [vmem:[%s4229_s1 + $0x5e8] sm:$0xff]  }
  0x83   :  { %2222 = vmatmul.mubr.bf16.vlgmr.msra.gmra.mrb[24].mxu0 %v3333_v23  ;;  %v3405_v23 = vld [vmem:[%s4229_s1 + $0x598] sm:$0xff]  }
  0x84   :  { %3041 = vmatpush3.bf16.msra.mxu0 %v3341_v29  ;;  %2271 = vmatmul.mubr.bf16.vlgmr.msra.gmra.mrb[24].mxu1 %v3338_v27  ;;  %v3409_v27 = vld [vmem:[%s4229_s1 + $0x5a0] sm:$0xff]   ;;  %v3411_v29 = vld [vmem:[%s4229_s1 + $0x528] sm:$0xff]  }
  0x85   :  { %3069 = vmatpush3.bf16.msra.mxu1 %v3343_v31  ;;  %3042 = vmatprep.subr.bf16.mxu0 %v3344_v32  ;;  %v3413_v31 = vld [vmem:[%s4229_s1 + $0x5a8] sm:$0xff]   ;;  %v3414_v32 = vld [vmem:[%s4229_s1 + $0x570] sm:$0xff]  }
  0x86   :  { %3070 = vmatprep.subr.bf16.mxu1 %v3346_v34  ;;  %2229 = vmatprep.mubr.bf16.mxu0 %v3347_v35  ;;  %v3416_v34 = vld [vmem:[%s4229_s1 + $0x5f0] sm:$0xff]  }
  0x87   :  { %2278 = vmatprep.mubr.bf16.mxu1 %v3352_v39  ;;  %v3417_v35 = vld [vmem:[%s4229_s1 + $0x5b0] sm:$0xff]  }
  0x88   :  { %3043 = vmatpush3.bf16.msra.mxu0 %v3345_v33  ;;  %v3415_v33 = vld [vmem:[%s4229_s1 + $0x530] sm:$0xff]  }
  0x89   :  { %3071 = vmatpush3.bf16.msra.mxu1 %v3349_v36  ;;  %3044 = vmatprep.subr.bf16.mxu0 %v3351_v38  ;;  %v3418_v36 = vld [vmem:[%s4229_s1 + $0x578] sm:$0xff]   ;;  %v3421_v39 = vld [vmem:[%s4230_s0 + $0x50] ss:$100 sps:$4 sm:$0xff]  }
  0x8a   :  { %3072 = vmatprep.subr.bf16.mxu1 %v3356_v42  ;;  %v3420_v38 = vld [vmem:[%s4229_s1 + $0x5f8] sm:$0xff]   ;;  %v3425_v42 = vld [vmem:[%s4229_s1 + $0x600] sm:$0xff]  }
  0x8b   :  { %2230 = vmatmul.mubr.bf16.gmra.mrb[28].mxu0 %v3350_v37  ;;  %v3419_v37 = vld [vmem:[%s4229_s1 + $0x538] sm:$0xff]  }
  0x8c   :  { %3045 = vmatpush3.bf16.msra.mxu0 %v3354_v40  ;;  %2279 = vmatmul.mubr.bf16.gmra.mrb[28].mxu1 %v3355_v41  ;;  %v3423_v40 = vld [vmem:[%s4230_s0 + $0x54] ss:$100 sps:$4 sm:$0xff]  }
  0x8d   :  { %3073 = vmatpush3.bf16.msra.mxu1 %v3357_v43  ;;  %3046 = vmatprep.subr.bf16.mxu0 %v3358_v44  ;;  %v3424_v41 = vld [vmem:[%s4229_s1 + $0x5b8] sm:$0xff]  }
  0x8e   :  { %3074 = vmatprep.subr.bf16.mxu1 %v3360_v46  ;;  %2319 = vmatprep.mubr.bf16.mxu0 %v3379_v0  ;;  %v3426_v43 = vld [vmem:[%s4230_s0 + $0x58] ss:$100 sps:$4 sm:$0xff]  }
  0x8f   :  { %2368 = vmatprep.mubr.bf16.mxu1 %v3384_v4  ;;  %v3428_v44 = vld [vmem:[%s4230_s0 + $0x5c] ss:$100 sps:$4 sm:$0xff]  }
  0x90   :  { %3047 = vmatpush3.bf16.msra.mxu0 %v3359_v45  ;;  %v3429_v45 = vld [vmem:[%s4229_s1 + $0x608] sm:$0xff]   ;;  %v3430_v46 = vld [vmem:[%s4230_s0 + $0x11c] ss:$100 sps:$4 sm:$0xff]  }
  0x91   :  { %3075 = vmatpush3.bf16.msra.mxu1 %v3361_v47  ;;  %3048 = vmatprep.subr.bf16.mxu0 %v3362_v48  ;;  %v3432_v47 = vld [vmem:[%s4230_s0 + $0x118] ss:$100 sps:$4 sm:$0xff]   ;;  %v3433_v48 = vld [vmem:[%s4229_s1 + $0x610] sm:$0xff]  }
  0x92   :  { %3076 = vmatprep.subr.bf16.mxu1 %v3364_v50  ;;  %v3437_v50 = vld [vmem:[%s4229_s1 + $0x618] sm:$0xff]  }
  0x94   :  { %3049 = vmatpush3.bf16.msra.mxu0 %v3363_v49  ;;  %v3434_v49 = vld [vmem:[%s4230_s0 + $0x124] ss:$100 sps:$4 sm:$0xff]  }
  0x95   :  { %3077 = vmatpush3.bf16.msra.mxu1 %v3365_v51  ;;  %3050 = vmatprep.subr.bf16.mxu0 %v3366_v52  ;;  %v3438_v51 = vld [vmem:[%s4230_s0 + $0x60] ss:$100 sps:$4 sm:$0xff]  }
  0x96   :  { %3078 = vmatprep.subr.bf16.mxu1 %v3368_v54  ;;  %v3436_v52 = vld [vmem:[%s4230_s0 + $0x120] ss:$100 sps:$4 sm:$0xff]  }
  0x98   :  { %3051 = vmatpush3.bf16.msra.mxu0 %v3367_v53  ;;  %v3439_v53 = vld [vmem:[%s4230_s0 + $0x128] ss:$100 sps:$4 sm:$0xff]  }
  0x99   :  { %3079 = vmatpush3.bf16.msra.mxu1 %v3369_v55  ;;  %3052 = vmatprep.subr.bf16.mxu0 %v3370_v56 }
  0x9a   :  { %3080 = vmatprep.subr.bf16.mxu1 %v3372_v58 }
  0x9c   :  { %3053 = vmatpush3.bf16.msra.mxu0 %v3371_v57 }
  0x9d   :  { %3081 = vmatpush3.bf16.msra.mxu1 %v3373_v59  ;;  %3054 = vmatprep.subr.bf16.mxu0 %v3374_v60 }
  0x9e   :  { %3082 = vmatprep.subr.bf16.mxu1 %v3376_v62 }
  0xa0   :  { %3055 = vmatpush3.bf16.msra.mxu0 %v3375_v61 }
  0xa1   :  { %3083 = vmatpush3.bf16.msra.mxu1 %v3380_v1  ;;  %3096 = vmatprep.subr.bf16.mxu0 %v3381_v2 }
  0xa2   :  { %3124 = vmatprep.subr.bf16.mxu1 %v3386_v6 }
  0xa3   :  { %2320 = vmatmul.mubr.bf16.vlgmr.msra.gmra.mrb[32].mxu0 %v3377_v63 }
  0xa4   :  { %3097 = vmatpush3.bf16.msra.mxu0 %v3385_v5  ;;  %2369 = vmatmul.mubr.bf16.vlgmr.msra.gmra.mrb[32].mxu1 %v3382_v3 }
  0xa5   :  { %3125 = vmatpush3.bf16.msra.mxu1 %v3387_v7  ;;  %3098 = vmatprep.subr.bf16.mxu0 %v3388_v8 }
  0xa6   :  { %3126 = vmatprep.subr.bf16.mxu1 %v3390_v10  ;;  %2327 = vmatprep.mubr.bf16.mxu0 %v3391_v11 }
  0xa7   :  { %2376 = vmatprep.mubr.bf16.mxu1 %v3396_v15 }
  0xa8   :  { %3099 = vmatpush3.bf16.msra.mxu0 %v3389_v9 }
  0xa9   :  { %3127 = vmatpush3.bf16.msra.mxu1 %v3393_v12  ;;  %3100 = vmatprep.subr.bf16.mxu0 %v3395_v14 }
  0xaa   :  { %3128 = vmatprep.subr.bf16.mxu1 %v3400_v18 }
  0xab   :  { %2328 = vmatmul.mubr.bf16.gmra.mrb[36].mxu0 %v3394_v13 }
  0xac   :  { %3101 = vmatpush3.bf16.msra.mxu0 %v3398_v16  ;;  %2377 = vmatmul.mubr.bf16.gmra.mrb[36].mxu1 %v3399_v17 }
  0xad   :  { %3129 = vmatpush3.bf16.msra.mxu1 %v3401_v19  ;;  %3102 = vmatprep.subr.bf16.mxu0 %v3402_v20 }
  0xae   :  { %3130 = vmatprep.subr.bf16.mxu1 %v3404_v22  ;;  %2417 = vmatprep.mubr.bf16.mxu0 %v3423_v40 }
  0xaf   :  { %2466 = vmatprep.mubr.bf16.mxu1 %v3428_v44 }
  0xb0   :  { %3103 = vmatpush3.bf16.msra.mxu0 %v3403_v21 }
  0xb1   :  { %3131 = vmatpush3.bf16.msra.mxu1 %v3405_v23  ;;  %3104 = vmatprep.subr.bf16.mxu0 %v3406_v24 }
  0xb2   :  { %3132 = vmatprep.subr.bf16.mxu1 %v3408_v26 }
  0xb4   :  { %3105 = vmatpush3.bf16.msra.mxu0 %v3407_v25 }
  0xb5   :  { %3133 = vmatpush3.bf16.msra.mxu1 %v3409_v27  ;;  %3106 = vmatprep.subr.bf16.mxu0 %v3410_v28 }
  0xb6   :  { %3134 = vmatprep.subr.bf16.mxu1 %v3412_v30 }
  0xb8   :  { %3107 = vmatpush3.bf16.msra.mxu0 %v3411_v29 }
  0xb9   :  { %3135 = vmatpush3.bf16.msra.mxu1 %v3413_v31  ;;  %3108 = vmatprep.subr.bf16.mxu0 %v3414_v32 }
  0xba   :  { %3136 = vmatprep.subr.bf16.mxu1 %v3416_v34 }
  0xbc   :  { %3109 = vmatpush3.bf16.msra.mxu0 %v3415_v33 }
  0xbd   :  { %3137 = vmatpush3.bf16.msra.mxu1 %v3417_v35  ;;  %3110 = vmatprep.subr.bf16.mxu0 %v3418_v36 }
  0xbe   :  { %3138 = vmatprep.subr.bf16.mxu1 %v3420_v38 }
  0xc0   :  { %3111 = vmatpush3.bf16.msra.mxu0 %v3419_v37 }
  0xc1   :  { %3139 = vmatpush3.bf16.msra.mxu1 %v3424_v41  ;;  %3158 = vmatprep.subr.bf16.mxu0 %v3425_v42 }
  0xc3   :  { %2418 = vmatmul.mubr.bf16.vlgmr.msra.gmra.mrb[40].mxu0 %v3421_v39 }
  0xc4   :  { %3159 = vmatpush3.bf16.msra.mxu0 %v3425_v42  ;;  %2467 = vmatmul.mubr.bf16.vlgmr.msra.gmra.mrb[40].mxu1 %v3426_v43 }
  0xc5   :  { %3160 = vmatprep.subr.bf16.mxu0 %v3429_v45  ;;  %2425 = vmatprep.mubr.bf16.mxu0 %v3430_v46 }
  0xc6   :  { %2474 = vmatprep.mubr.bf16.mxu1 %v3434_v49 }
  0xc8   :  { %3161 = vmatpush3.bf16.msra.mxu0 %v3429_v45 }
  0xc9   :  { %3162 = vmatprep.subr.bf16.mxu0 %v3433_v48 }
  0xcb   :  { %2426 = vmatmul.mubr.bf16.gmra.mrb[44].mxu0 %v3432_v47 }
  0xcc   :  { %3166 = vmatprep.mubr.msk.bf16.mxu0 %vm1888_vm0, %v3438_v51  ;;  %3163 = vmatpush3.bf16.msra.mxu0 %v3433_v48 }
  0xcd   :  { %3164 = vmatprep.subr.bf16.mxu0 %v3437_v50  ;;  %2475 = vmatmul.mubr.bf16.gmra.mrb[44].mxu1 %v3436_v52 }
  0xd0   :  { %3165 = vmatpush3.bf16.msra.mxu0 %v3437_v50 }
  0xd3   :  { %3167 = vmatmul.mubr.msk.bf16.vlgmr.msra.gmra.mrb[48].mxu0 %vm1888_vm0, %v3439_v53 }
  0xf6   :  { %v2832_v54 = vpop.f32.mrb[0].mxu0 }
  0xf7   :  { %v2860_v55 = vpop.f32.mrb[0].mxu1  ;;  %v2833_v56 = vpop.f32.mrb[1].mxu0 }
  0xf8   :  { %v2834_v57 = vadd.f32 %v2833_v56, %v2832_v54  ;;  %v2861_v58 = vpop.f32.mrb[1].mxu1  ;;  %v2835_v59 = vpop.f32.mrb[2].mxu0 }
  0xf9   :  { %v2862_v60 = vadd.f32 %v2861_v58, %v2860_v55  ;;  %v2863_v61 = vpop.f32.mrb[2].mxu1  ;;  %v2836_v62 = vpop.f32.mrb[3].mxu0 }
  0xfa   :  { %v2837_v63 = vadd.f32 %v2836_v62, %v2835_v59  ;;  %v2864_v0 = vpop.f32.mrb[3].mxu1 }
  0xfb   :  { %v1979_v1 = vadd.f32 %v2862_v60, %v2834_v57  ;;  %v2865_v2 = vadd.f32 %v2864_v0, %v2863_v61 }
  0xfd   :  { %v1982_v3 = vadd.f32 %v2865_v2, %v2837_v63 }
  0xfe   :  { %v2838_v4 = vpop.f32.mrb[4].mxu0 }
  0xff   :  { %v2866_v5 = vpop.f32.mrb[4].mxu1  ;;  %v2839_v6 = vpop.f32.mrb[5].mxu0 }
 0x100   :  { %v2867_v7 = vpop.f32.mrb[5].mxu1  ;;  %v2840_v8 = vadd.f32 %v2839_v6, %v2838_v4  ;;  %v2841_v10 = vpop.f32.mrb[6].mxu0 }
 0x101   :  { %v2868_v9 = vadd.f32 %v2867_v7, %v2866_v5  ;;  %v2869_v11 = vpop.f32.mrb[6].mxu1  ;;  %v2842_v12 = vpop.f32.mrb[7].mxu0 }
 0x102   :  { %v2870_v13 = vpop.f32.mrb[7].mxu1  ;;  %v2843_v15 = vadd.f32 %v2842_v12, %v2841_v10 }
 0x103   :  { %v1987_v14 = vadd.f32 %v2868_v9, %v2840_v8  ;;  %v2871_v16 = vadd.f32 %v2870_v13, %v2869_v11 }
 0x105   :  { %v1990_v17 = vadd.f32 %v2871_v16, %v2843_v15 }
 0x116   :  { %v2888_v18 = vpop.f32.mrb[8].mxu0 }
 0x117   :  { %v2889_v19 = vpop.f32.mrb[9].mxu0  ;;  %v2916_v22 = vpop.f32.mrb[8].mxu1 }
 0x118   :  { %v2890_v20 = vadd.f32 %v2889_v19, %v2888_v18  ;;  %v2891_v21 = vpop.f32.mrb[10].mxu0  ;;  %v2917_v26 = vpop.f32.mrb[9].mxu1 }
 0x119   :  { %v2892_v23 = vpop.f32.mrb[11].mxu0  ;;  %v2918_v27 = vadd.f32 %v2917_v26, %v2916_v22  ;;  %v2919_v28 = vpop.f32.mrb[10].mxu1 }
 0x11a   :  { %v2028_v24 = vadd.f32 %v2890_v20, %v1979_v1  ;;  %v2893_v25 = vadd.f32 %v2892_v23, %v2891_v21  ;;  %v2920_v30 = vpop.f32.mrb[11].mxu1 }
 0x11b   :  { %v2921_v32 = vadd.f32 %v2920_v30, %v2919_v28 }
 0x11c   :  { %v2031_v29 = vadd.f32 %v2893_v25, %v1982_v3  ;;  %v2077_v31 = vadd.f32 %v2918_v27, %v2028_v24 }
 0x11e   :  { %v2080_v33 = vadd.f32 %v2921_v32, %v2031_v29  ;;  %v2894_v34 = vpop.f32.mrb[12].mxu0 }
 0x11f   :  { %v2895_v35 = vpop.f32.mrb[13].mxu0  ;;  %v2922_v38 = vpop.f32.mrb[12].mxu1 }
 0x120   :  { %v2896_v36 = vadd.f32 %v2895_v35, %v2894_v34  ;;  %v2897_v37 = vpop.f32.mrb[14].mxu0  ;;  %v2923_v42 = vpop.f32.mrb[13].mxu1 }
 0x121   :  { %v2898_v39 = vpop.f32.mrb[15].mxu0  ;;  %v2924_v43 = vadd.f32 %v2923_v42, %v2922_v38  ;;  %v2925_v44 = vpop.f32.mrb[14].mxu1 }
 0x122   :  { %v2036_v40 = vadd.f32 %v2896_v36, %v1987_v14  ;;  %v2899_v41 = vadd.f32 %v2898_v39, %v2897_v37  ;;  %v2926_v46 = vpop.f32.mrb[15].mxu1 }
 0x123   :  { %v2927_v48 = vadd.f32 %v2926_v46, %v2925_v44 }
 0x124   :  { %v2039_v45 = vadd.f32 %v2899_v41, %v1990_v17  ;;  %v2085_v47 = vadd.f32 %v2924_v43, %v2036_v40 }
 0x126   :  { %v2088_v49 = vadd.f32 %v2927_v48, %v2039_v45 }
 0x136   :  { %v2944_v50 = vpop.f32.mrb[16].mxu0 }
 0x137   :  { %v2945_v51 = vpop.f32.mrb[17].mxu0  ;;  %v2972_v56 = vpop.f32.mrb[16].mxu1 }
 0x138   :  { %v2946_v52 = vadd.f32 %v2945_v51, %v2944_v50  ;;  %v2947_v53 = vpop.f32.mrb[18].mxu0  ;;  %v2973_v58 = vpop.f32.mrb[17].mxu1 }
 0x139   :  { %v2948_v54 = vpop.f32.mrb[19].mxu0  ;;  %v2974_v60 = vadd.f32 %v2973_v58, %v2972_v56  ;;  %v2975_v61 = vpop.f32.mrb[18].mxu1 }
 0x13a   :  { %v2126_v55 = vadd.f32 %v2946_v52, %v2077_v31  ;;  %v2949_v57 = vadd.f32 %v2948_v54, %v2947_v53  ;;  %v2976_v62 = vpop.f32.mrb[19].mxu1 }
 0x13b   :  { %v2977_v0 = vadd.f32 %v2976_v62, %v2975_v61 }
 0x13c   :  { %v2129_v59 = vadd.f32 %v2949_v57, %v2080_v33  ;;  %v2175_v63 = vadd.f32 %v2974_v60, %v2126_v55 }
 0x13e   :  { %v2178_v1 = vadd.f32 %v2977_v0, %v2129_v59  ;;  %v2950_v2 = vpop.f32.mrb[20].mxu0 }
 0x13f   :  { %v2951_v3 = vpop.f32.mrb[21].mxu0  ;;  %v2978_v6 = vpop.f32.mrb[20].mxu1 }
 0x140   :  { %v2952_v4 = vadd.f32 %v2951_v3, %v2950_v2  ;;  %v2953_v5 = vpop.f32.mrb[22].mxu0  ;;  %v2979_v10 = vpop.f32.mrb[21].mxu1 }
 0x141   :  { %v2954_v7 = vpop.f32.mrb[23].mxu0  ;;  %v2980_v11 = vadd.f32 %v2979_v10, %v2978_v6  ;;  %v2981_v12 = vpop.f32.mrb[22].mxu1 }
 0x142   :  { %v2134_v8 = vadd.f32 %v2952_v4, %v2085_v47  ;;  %v2955_v9 = vadd.f32 %v2954_v7, %v2953_v5  ;;  %v2982_v14 = vpop.f32.mrb[23].mxu1 }
 0x143   :  { %v2983_v16 = vadd.f32 %v2982_v14, %v2981_v12 }
 0x144   :  { %v2137_v13 = vadd.f32 %v2955_v9, %v2088_v49  ;;  %v2183_v15 = vadd.f32 %v2980_v11, %v2134_v8 }
 0x146   :  { %v2186_v17 = vadd.f32 %v2983_v16, %v2137_v13 }
 0x156   :  { %v3000_v18 = vpop.f32.mrb[24].mxu0 }
 0x157   :  { %v3001_v19 = vpop.f32.mrb[25].mxu0  ;;  %v3028_v22 = vpop.f32.mrb[24].mxu1 }
 0x158   :  { %v3002_v20 = vadd.f32 %v3001_v19, %v3000_v18  ;;  %v3003_v21 = vpop.f32.mrb[26].mxu0  ;;  %v3029_v26 = vpop.f32.mrb[25].mxu1 }
 0x159   :  { %v3004_v23 = vpop.f32.mrb[27].mxu0  ;;  %v3030_v27 = vadd.f32 %v3029_v26, %v3028_v22  ;;  %v3031_v28 = vpop.f32.mrb[26].mxu1 }
 0x15a   :  { %v2224_v24 = vadd.f32 %v3002_v20, %v2175_v63  ;;  %v3005_v25 = vadd.f32 %v3004_v23, %v3003_v21  ;;  %v3032_v30 = vpop.f32.mrb[27].mxu1 }
 0x15b   :  { %v3033_v32 = vadd.f32 %v3032_v30, %v3031_v28 }
 0x15c   :  { %v2227_v29 = vadd.f32 %v3005_v25, %v2178_v1  ;;  %v2273_v31 = vadd.f32 %v3030_v27, %v2224_v24 }
 0x15e   :  { %v2276_v33 = vadd.f32 %v3033_v32, %v2227_v29  ;;  %v3006_v34 = vpop.f32.mrb[28].mxu0 }
 0x15f   :  { %v3007_v35 = vpop.f32.mrb[29].mxu0  ;;  %v3034_v40 = vpop.f32.mrb[28].mxu1 }
 0x160   :  { %v3008_v36 = vadd.f32 %v3007_v35, %v3006_v34  ;;  %v3009_v37 = vpop.f32.mrb[30].mxu0  ;;  %v3035_v42 = vpop.f32.mrb[29].mxu1 }
 0x161   :  { %v3010_v38 = vpop.f32.mrb[31].mxu0  ;;  %v3036_v44 = vadd.f32 %v3035_v42, %v3034_v40  ;;  %v3037_v45 = vpop.f32.mrb[30].mxu1 }
 0x162   :  { %v2232_v39 = vadd.f32 %v3008_v36, %v2183_v15  ;;  %v3011_v41 = vadd.f32 %v3010_v38, %v3009_v37  ;;  %v3038_v46 = vpop.f32.mrb[31].mxu1 }
 0x163   :  { %v3039_v48 = vadd.f32 %v3038_v46, %v3037_v45 }
 0x164   :  { %v2235_v43 = vadd.f32 %v3011_v41, %v2186_v17  ;;  %v2281_v47 = vadd.f32 %v3036_v44, %v2232_v39 }
 0x166   :  { %v2284_v49 = vadd.f32 %v3039_v48, %v2235_v43 }
 0x176   :  { %v3056_v50 = vpop.f32.mrb[32].mxu0 }
 0x177   :  { %v3057_v51 = vpop.f32.mrb[33].mxu0  ;;  %v3084_v54 = vpop.f32.mrb[32].mxu1 }
 0x178   :  { %v3058_v52 = vadd.f32 %v3057_v51, %v3056_v50  ;;  %v3059_v53 = vpop.f32.mrb[34].mxu0  ;;  %v3085_v58 = vpop.f32.mrb[33].mxu1  ;;  %v2814_v50 = vld [vmem:[%s4231_s2] ss:$0 sm:$0xff] }
 0x179   :  { %v3060_v55 = vpop.f32.mrb[35].mxu0  ;;  %v3086_v59 = vadd.f32 %v3085_v58, %v3084_v54  ;;  %v3087_v60 = vpop.f32.mrb[34].mxu1  ;;  %v2815_v54 = vld [vmem:[%s4232_s3] ss:$0 sm:$0xff] }
 0x17a   :  { %v2322_v56 = vadd.f32 %v3058_v52, %v2273_v31  ;;  %v3061_v57 = vadd.f32 %v3060_v55, %v3059_v53  ;;  %v3088_v62 = vpop.f32.mrb[35].mxu1 }
 0x17b   :  { %v3089_v0 = vadd.f32 %v3088_v62, %v3087_v60 }
 0x17c   :  { %v2325_v61 = vadd.f32 %v3061_v57, %v2276_v33  ;;  %v2371_v63 = vadd.f32 %v3086_v59, %v2322_v56 }
 0x17e   :  { %v2374_v1 = vadd.f32 %v3089_v0, %v2325_v61  ;;  %v3062_v2 = vpop.f32.mrb[36].mxu0 }
 0x17f   :  { %v3063_v3 = vpop.f32.mrb[37].mxu0  ;;  %v3090_v6 = vpop.f32.mrb[36].mxu1 }
 0x180   :  { %v3064_v4 = vadd.f32 %v3063_v3, %v3062_v2  ;;  %v3065_v5 = vpop.f32.mrb[38].mxu0  ;;  %v3091_v10 = vpop.f32.mrb[37].mxu1 }
 0x181   :  { %v3066_v7 = vpop.f32.mrb[39].mxu0  ;;  %v3092_v11 = vadd.f32 %v3091_v10, %v3090_v6  ;;  %v3093_v12 = vpop.f32.mrb[38].mxu1 }
 0x182   :  { %v2330_v8 = vadd.f32 %v3064_v4, %v2281_v47  ;;  %v3067_v9 = vadd.f32 %v3066_v7, %v3065_v5  ;;  %v3094_v14 = vpop.f32.mrb[39].mxu1 }
 0x183   :  { %v3095_v16 = vadd.f32 %v3094_v14, %v3093_v12 }
 0x184   :  { %v2333_v13 = vadd.f32 %v3067_v9, %v2284_v49  ;;  %v2379_v15 = vadd.f32 %v3092_v11, %v2330_v8 }
 0x186   :  { %v2382_v17 = vadd.f32 %v3095_v16, %v2333_v13 }
 0x196   :  { %v3112_v18 = vpop.f32.mrb[40].mxu0 }
 0x197   :  { %v3113_v19 = vpop.f32.mrb[41].mxu0  ;;  %v3140_v24 = vpop.f32.mrb[40].mxu1 }
 0x198   :  { %v3114_v20 = vadd.f32 %v3113_v19, %v3112_v18  ;;  %v3115_v21 = vpop.f32.mrb[42].mxu0  ;;  %v3141_v26 = vpop.f32.mrb[41].mxu1 }
 0x199   :  { %v3116_v22 = vpop.f32.mrb[43].mxu0  ;;  %v3142_v28 = vadd.f32 %v3141_v26, %v3140_v24  ;;  %v3143_v29 = vpop.f32.mrb[42].mxu1 }
 0x19a   :  { %v2420_v23 = vadd.f32 %v3114_v20, %v2371_v63  ;;  %v3117_v25 = vadd.f32 %v3116_v22, %v3115_v21  ;;  %v3144_v30 = vpop.f32.mrb[43].mxu1 }
 0x19b   :  { %v3145_v31 = vadd.f32 %v3144_v30, %v3143_v29 }
 0x19c   :  { %v2423_v27 = vadd.f32 %v3117_v25, %v2374_v1  ;;  %v2469_v33 = vadd.f32 %v3142_v28, %v2420_v23 }
 0x19e   :  { %v3118_v32 = vpop.f32.mrb[44].mxu0  ;;  %v2472_v37 = vadd.f32 %v3145_v31, %v2423_v27 }
 0x19f   :  { %v3119_v34 = vpop.f32.mrb[45].mxu0 }
 0x1a0   :  { %v3120_v35 = vadd.f32 %v3119_v34, %v3118_v32  ;;  %v3121_v36 = vpop.f32.mrb[46].mxu0  ;;  %v3146_v40 = vpop.f32.mrb[44].mxu1 }
 0x1a1   :  { %v3122_v38 = vpop.f32.mrb[47].mxu0  ;;  %v3147_v42 = vpop.f32.mrb[45].mxu1 }
 0x1a2   :  { %v2428_v39 = vadd.f32 %v3120_v35, %v2379_v15  ;;  %v3123_v41 = vadd.f32 %v3122_v38, %v3121_v36  ;;  %v3148_v44 = vadd.f32 %v3147_v42, %v3146_v40  ;;  %v3149_v45 = vpop.f32.mrb[46].mxu1 }
 0x1a3   :  { %v3150_v46 = vpop.f32.mrb[47].mxu1 }
 0x1a4   :  { %v2431_v43 = vadd.f32 %v3123_v41, %v2382_v17  ;;  %v3151_v47 = vadd.f32 %v3150_v46, %v3149_v45  ;;  %v2477_v48 = vadd.f32 %v3148_v44, %v2428_v39 }
 0x1a6   :  { %v3168_v49 = vpop.f32.mrb[48].mxu0  ;;  %v2480_v53 = vadd.f32 %v3151_v47, %v2431_v43 }
 0x1a7   :  { %v2526_v51 = vadd.f32 %v3168_v49, %v2477_v48  ;;  %v2517_v52 = vpop.f32.mrb[49].mxu0 }
 0x1a8   :  { %v2518_v55 = vadd.f32 %v2517_v52, %v2469_v33  ;;  %v3169_v56 = vpop.f32.mrb[50].mxu0 }
 0x1a9   :  { %v2541_v57 = vmul.f32 %v2814_v50, %v2526_v51  ;;  %v2529_v58 = vadd.f32 %v3169_v56, %v2480_v53  ;;  %v2520_v59 = vpop.f32.mrb[51].mxu0 }
 0x1aa   :  { %v2539_v60 = vmul.f32 %v2814_v50, %v2518_v55  ;;  %v2521_v61 = vadd.f32 %v2520_v59, %v2472_v37 }
 0x1ab   :  { %v2552_v62 = vadd.f32 %v2815_v54, %v2541_v57  ;;  %v2542_v63 = vmul.f32 %v2814_v50, %v2529_v58 }
 0x1ac   :  { %v2550_v0 = vadd.f32 %v2815_v54, %v2539_v60  ;;  %v2540_v1 = vmul.f32 %v2814_v50, %v2521_v61 }
 0x1ad   :  { %3440 = vtanh.f32 %v2552_v62  ;;  %v2553_v2 = vadd.f32 %v2815_v54, %v2542_v63 }
 0x1ae   :  { %3442 = vtanh.f32 %v2550_v0  ;;  %v2551_v3 = vadd.f32 %v2815_v54, %v2540_v1 }
 0x1af   :  { %3444 = vtanh.f32 %v2553_v2 }
 0x1b0   :  { %3446 = vtanh.f32 %v2551_v3 }
 0x1b7   :  { %v3441_v4 = vpop.eup %3440 }
 0x1b8   :  { %v3443_v5 = vpop.eup %3442  ;;  %2560 = vst [vmem:[%s4233_s4 + $0x10] sm:$0xff] %v3441_v4 }
 0x1b9   :  { %v3445_v6 = vpop.eup %3444  ;;  %2558 = vst [vmem:[%s4233_s4] sm:$0xff] %v3443_v5 }
 0x1ba   :  { %v3447_v7 = vpop.eup %3446  ;;  %2561 = vst [vmem:[%s4233_s4 + $0x18] sm:$0xff] %v3445_v6 }
 0x1bb   :  { %2559 = vst [vmem:[%s4233_s4 + $0x8] sm:$0xff] %v3447_v7 }

</bundles_post_ra>
